<compile_context>
chip_gen: v5e
topology: v5e:2x2
jax: 0.10.0
libtpu: 0.0.40
codegen_flags: <defaults>
</compile_context>

<pallas_src>
import functools

import jax
import jax.numpy as jnp
from jax.experimental import pallas as pl
from jax.experimental.pallas import tpu as pltpu


LANE = 128   # pad hidden/class channel dims to a multiple of the lane width
SUB = 8      # pad tiny input-channel dims to a multiple of the sublane width


# Order in which the folded/padded parameters are passed to the fused kernel.
_PARAM_ORDER = (
    # layer 1
    "w_f1", "w_s1", "b1_l1", "b2_l1", "g_ge1", "a_ge1", "g_se1", "a_se1",
    "wc1a", "wc1b", "bc1", "g_bn1", "a_bn1",
    # layer 2
    "w_m1_l2", "wg_se2", "ws_se2", "b1_l2", "b2_l2",
    "g_ge2", "a_ge2", "g_se2", "a_se2",
    "wc2a", "wc2b", "bc2", "g_bn2", "a_bn2",
    # layer 3 + head
    "w_m1_l3", "wg_se3", "ws_se3", "b1_l3", "b2_l3",
    "wc3a", "wc3b", "bc3",
)


# ----------------------------------------------------------------------------
# Fused Pallas kernel: whole CS_GCN forward for one batch tile
# ----------------------------------------------------------------------------
def _cs_gcn_fused_kernel(adj_ref, feat_ref, node_ref, *rest):
    (w_f1, w_s1, b1_l1, b2_l1, g_ge1, a_ge1, g_se1, a_se1,
     wc1a, wc1b, bc1, g_bn1, a_bn1,
     w_m1_l2, wg_se2, ws_se2, b1_l2, b2_l2, g_ge2, a_ge2, g_se2, a_se2,
     wc2a, wc2b, bc2, g_bn2, a_bn2,
     w_m1_l3, wg_se3, ws_se3, b1_l3, b2_l3,
     wc3a, wc3b, bc3,
     prob_ref, logit_ref) = rest

    bt, N, _ = adj_ref.shape
    rows = bt * N
    f32 = jnp.float32
    Hp = b1_l1.shape[-1]
    Cp = b1_l3.shape[-1]

    adj = adj_ref[...]                                   # (bt, N, N), compute dtype

    def mm(x, w_ref):
        # Flattened (bt*N, K) @ (K, H) matmul, f32 accumulation.
        w = w_ref[...]
        return jnp.dot(x.astype(w.dtype), w, preferred_element_type=f32)

    def agg(z):
        # adj @ z, batched over the batch tile; z: (rows, W) f32, W is 2*Hp/2*Cp
        # wide so the MXU columns are filled on 256-wide parts.
        width = z.shape[-1]
        zb = z.astype(adj.dtype).reshape(bt, N, width)
        out = jnp.einsum("bij,bjh->bih", adj, zb, preferred_element_type=f32)
        return out.reshape(rows, width)

    def bn_relu(x, g_ref, a_ref):
        return jnp.maximum(x * g_ref[...] + a_ref[...], 0.0)

    xf = feat_ref[...].reshape(rows, feat_ref.shape[-1])
    xn = node_ref[...].reshape(rows, node_ref.shape[-1])

    # ---- layer 1: two GraphConv + SelfLoop branches, one shared adj matmul.
    z1 = mm(xf, w_f1)                                    # [feat@Wg1 | feat@Ws1]
    z2 = mm(xn, w_s1)                                    # [node@Wg  | node@Ws ]
    ag = agg(jnp.concatenate([z1[:, :Hp], z2[:, :Hp]], axis=-1))
    m1 = ag[:, :Hp] + z1[:, Hp:] + b1_l1[...]
    m2 = ag[:, Hp:] + z2[:, Hp:] + b2_l1[...]
    model = jnp.maximum(
        (mm(m1, wc1a) + mm(m2, wc1b) + bc1[...]) * g_bn1[...] + a_bn1[...], 0.0)
    m1a = bn_relu(m1, g_ge1, a_ge1)
    m2a = bn_relu(m2, g_se1, a_se1)

    # ---- layer 2
    z1 = mm(m1a, w_m1_l2)                                # [m1a@Wg2 | m1a@Ws2]
    zg2 = mm(model, wg_se2)
    zs2 = mm(m2a, ws_se2)
    ag = agg(jnp.concatenate([z1[:, :Hp], zg2], axis=-1))
    m1 = ag[:, :Hp] + z1[:, Hp:] + b1_l2[...]
    m2 = ag[:, Hp:] + zs2 + b2_l2[...]
    model = jnp.maximum(
        (mm(m1, wc2a) + mm(m2, wc2b) + bc2[...]) * g_bn2[...] + a_bn2[...], 0.0)
    m1a = bn_relu(m1, g_ge2, a_ge2)
    m2a = bn_relu(m2, g_se2, a_se2)

    # ---- layer 3 + cnd3 head with fused sigmoid
    z1 = mm(m1a, w_m1_l3)                                # [m1a@Wg3 | m1a@Ws3]
    zg2 = mm(model, wg_se3)
    zs2 = mm(m2a, ws_se3)
    ag = agg(jnp.concatenate([z1[:, :Cp], zg2], axis=-1))
    m1 = ag[:, :Cp] + z1[:, Cp:] + b1_l3[...]
    m2 = ag[:, Cp:] + zs2 + b2_l3[...]
    logits = mm(m1, wc3a) + mm(m2, wc3b) + bc3[...]
    logit_ref[...] = logits.reshape(bt, N, Cp).astype(logit_ref.dtype)
    prob_ref[...] = jax.nn.sigmoid(logits).reshape(bt, N, Cp).astype(prob_ref.dtype)


# ----------------------------------------------------------------------------
# Tiling helpers (generation-aware)
# ----------------------------------------------------------------------------
def _round_up(x, m):
    return ((x + m - 1) // m) * m


def _device_info():
    """(vmem_capacity_bytes, is_multi_tensorcore) with safe fallbacks."""
    vmem_cap = 64 << 20          # conservative default (v7x-sized)
    multi_tc = False
    try:
        vmem_cap = int(pltpu.get_tpu_info().vmem_capacity_bytes)
    except Exception:
        pass
    try:
        multi_tc = "v7" in jax.devices()[0].device_kind.lower()
    except Exception:
        pass
    return vmem_cap, multi_tc


def _pick_bt(batch, per_batch_bytes, budget_bytes, multi_tc):
    """Largest batch tile fitting the VMEM budget; on multi-TensorCore parts
    keep >= 2 grid steps so both cores get work (single-TC parts take the
    biggest tile -- fewer grid steps, less fixed per-step overhead)."""
    bt = max(1, min(batch, budget_bytes // max(per_batch_bytes, 1)))
    if multi_tc and batch >= 2:
        bt = max(1, min(bt, -(-batch // 2)))
    return int(bt)


# ----------------------------------------------------------------------------
# Forward: single fused pallas_call
# ----------------------------------------------------------------------------
@functools.partial(jax.jit, static_argnames=("nclass",))
def cs_gcn_forward(P, node_input, att_input, adj, Fadj, feat, *, nclass):
    del att_input, Fadj                       # unused by the reference forward
    cdt = P["w_f1"].dtype
    B, N, _ = adj.shape
    Fp = P["w_f1"].shape[0]
    Sp = P["w_s1"].shape[0]
    Hp = P["b1_l1"].shape[-1]
    Cp = P["b1_l3"].shape[-1]

    # Pad tiny input-channel dims and cast to the compute dtype.
    featp = jnp.pad(feat, ((0, 0), (0, 0), (0, Fp - feat.shape[-1]))).astype(cdt)
    nodep = jnp.pad(node_input,
                    ((0, 0), (0, 0), (0, Sp - node_input.shape[-1]))).astype(cdt)
    adjp = adj.astype(cdt)

    vmem_cap, multi_tc = _device_info()
    dt_bytes = jnp.dtype(cdt).itemsize
    weight_bytes = sum(int(P[k].size) * P[k].dtype.itemsize for k in _PARAM_ORDER)
    per_batch = (2 * dt_bytes * (N * N + N * (Fp + Sp))      # double-buffered inputs
                 + 2 * 4 * (2 * N * Cp)                      # double-buffered outputs
                 + 20 * 4 * N * max(Hp, Cp))                 # in-kernel f32 temporaries
    budget = int(0.70 * vmem_cap) - 2 * weight_bytes
    bt = _pick_bt(B, per_batch, budget, multi_tc)
    # TODO(synk): adjacency-row grid axis for graphs where even bt=1 overflows VMEM.

    Bp = _round_up(B, bt)
    if Bp != B:                               # pad awkward batch sizes (no bt=1 cliff)
        pad = ((0, Bp - B), (0, 0), (0, 0))
        adjp, featp, nodep = (jnp.pad(t, pad) for t in (adjp, featp, nodep))
    grid = (Bp // bt,)

    def batched(c):
        return pl.BlockSpec((bt, N, c), lambda i: (i, 0, 0))

    def rep(arr):
        nd = arr.ndim
        # TODO(synk): weights are grid-invariant; single-buffering them
        #             (pipeline_mode=pl.Buffered(1)) would halve their VMEM cost.
        return pl.BlockSpec(arr.shape, lambda i, _nd=nd: (0,) * _nd)

    params = [P[k] for k in _PARAM_ORDER]
    in_specs = [batched(N), batched(Fp), batched(Sp)] + [rep(p) for p in params]
    out_block = pl.BlockSpec((bt, N, Cp), lambda i: (i, 0, 0))
    out_shape = (jax.ShapeDtypeStruct((Bp, N, Cp), jnp.float32),   # probs
                 jax.ShapeDtypeStruct((Bp, N, Cp), jnp.float32))   # logits

    dense_kh = (Fp * 2 * Hp + Sp * 2 * Hp + 2 * Hp * Hp            # layer 1 + cnd1
                + Hp * 2 * Hp + 2 * Hp * Hp + 2 * Hp * Hp          # layer 2 + cnd2
                + Hp * 2 * Cp + 2 * Hp * Cp + 2 * Cp * Cp)         # layer 3 + cnd3
    flops = 2 * Bp * N * (dense_kh + N * (2 * Hp + 2 * Hp + 2 * Cp))
    bytes_accessed = (Bp * dt_bytes * (N * N + N * (Fp + Sp))
                      + Bp * 4 * 2 * N * Cp + weight_bytes)
    needed = 2 * weight_bytes + bt * per_batch
    vmem_limit = int(min(max(2 * needed, 32 << 20), int(0.75 * vmem_cap)))

    probs, logits = pl.pallas_call(
        _cs_gcn_fused_kernel,
        out_shape=out_shape,
        grid=grid,
        in_specs=in_specs,
        out_specs=(out_block, out_block),
        compiler_params=pltpu.CompilerParams(
            dimension_semantics=("parallel",),
            vmem_limit_bytes=vmem_limit),
        cost_estimate=pl.CostEstimate(flops=int(flops),
                                      transcendentals=int(Bp * N * Cp),
                                      bytes_accessed=int(bytes_accessed)),
    )(adjp, featp, nodep, *params)

    return probs[:B, :, :nclass], logits[:B, :, :nclass]


# ----------------------------------------------------------------------------
# Parameter init (deterministic, synthetic) + pre-folding / padding
# ----------------------------------------------------------------------------
def init_params(key, nfeat, nhid, nclass):
    keys = iter(jax.random.split(key, 64))

    def lin(fan_in, fan_out):
        k1, k2 = next(keys), next(keys)
        scale = 1.0 / jnp.sqrt(jnp.float32(fan_in))
        w = jax.random.uniform(k1, (fan_in, fan_out), jnp.float32, -scale, scale)
        b = jax.random.uniform(k2, (1, fan_out), jnp.float32, -scale, scale)
        return {"w": w, "b": b}

    def bn(c):
        gamma = 1.0 + 0.1 * jax.random.normal(next(keys), (c,), jnp.float32)
        beta = 0.1 * jax.random.normal(next(keys), (c,), jnp.float32)
        return (gamma, beta, jnp.zeros((c,), jnp.float32), jnp.ones((c,), jnp.float32))

    return {
        "graph_encoder1": lin(nfeat, nhid), "structure_encoder1": lin(2, nhid),
        "self_GE1": lin(nfeat, nhid), "self_SE1": lin(2, nhid),
        "bn_GE1": bn(nhid), "bn_SE1": bn(nhid), "bn1": bn(nhid),
        "cnd1": lin(2 * nhid, nhid),
        "graph_encoder2": lin(nhid, nhid), "structure_encoder2": lin(nhid, nhid),
        "self_GE2": lin(nhid, nhid), "self_SE2": lin(nhid, nhid),
        "bn_GE2": bn(nhid), "bn_SE2": bn(nhid), "bn2": bn(nhid),
        "cnd2": lin(2 * nhid, nhid),
        "graph_encoder3": lin(nhid, nclass), "structure_encoder3": lin(nhid, nclass),
        "self_GE3": lin(nhid, nclass), "self_SE3": lin(nhid, nclass),
        "cnd3": lin(2 * nclass, nclass),
    }


def _pad2d(w, rp, cp):
    r, c = w.shape
    return jnp.pad(w, ((0, rp - r), (0, cp - c)))


def _pad_vec(v, cp):
    v = v.reshape(1, -1)
    return jnp.pad(v, ((0, 0), (0, cp - v.shape[-1])))


def _fold_bn(bn, cp, eps=1e-5):
    gamma, beta, rmean, rvar = bn
    g = gamma / jnp.sqrt(rvar + eps)
    a = beta - rmean * g
    return _pad_vec(g, cp), _pad_vec(a, cp)   # padded channels: g=a=0 -> stay 0


def prepare_params(p, nfeat, nhid, nclass, lane=LANE, compute_dtype=jnp.float32):
    """Fold GC+Self biases and BN running stats, concatenate [Wg | Wself] when
    the graph conv and self loop share an input, zero-pad channel dims (hidden/
    class -> lane multiples, tiny inputs -> sublane multiples) and cast matmul
    weights to `compute_dtype` (biases/affines stay f32 for f32 epilogues)."""
    Hp, Cp = _round_up(nhid, lane), _round_up(nclass, lane)
    Fp, Sp = _round_up(nfeat, SUB), _round_up(2, SUB)
    cdt = compute_dtype

    def wcat(wa, wb, rows, h):
        return jnp.concatenate([_pad2d(wa, rows, h), _pad2d(wb, rows, h)],
                               axis=1).astype(cdt)

    out = {}
    # ---- layer 1
    out["w_f1"] = wcat(p["graph_encoder1"]["w"], p["self_GE1"]["w"], Fp, Hp)
    out["w_s1"] = wcat(p["structure_encoder1"]["w"], p["self_SE1"]["w"], Sp, Hp)
    out["b1_l1"] = _pad_vec(p["graph_encoder1"]["b"] + p["self_GE1"]["b"], Hp)
    out["b2_l1"] = _pad_vec(p["structure_encoder1"]["b"] + p["self_SE1"]["b"], Hp)
    out["g_ge1"], out["a_ge1"] = _fold_bn(p["bn_GE1"], Hp)
    out["g_se1"], out["a_se1"] = _fold_bn(p["bn_SE1"], Hp)
    w = p["cnd1"]["w"]
    out["wc1a"] = _pad2d(w[:nhid], Hp, Hp).astype(cdt)
    out["wc1b"] = _pad2d(w[nhid:], Hp, Hp).astype(cdt)
    out["bc1"] = _pad_vec(p["cnd1"]["b"], Hp)
    out["g_bn1"], out["a_bn1"] = _fold_bn(p["bn1"], Hp)
    # ---- layer 2
    out["w_m1_l2"] = wcat(p["graph_encoder2"]["w"], p["self_GE2"]["w"], Hp, Hp)
    out["wg_se2"] = _pad2d(p["structure_encoder2"]["w"], Hp, Hp).astype(cdt)
    out["ws_se2"] = _pad2d(p["self_SE2"]["w"], Hp, Hp).astype(cdt)
    out["b1_l2"] = _pad_vec(p["graph_encoder2"]["b"] + p["self_GE2"]["b"], Hp)
    out["b2_l2"] = _pad_vec(p["structure_encoder2"]["b"] + p["self_SE2"]["b"], Hp)
    out["g_ge2"], out["a_ge2"] = _fold_bn(p["bn_GE2"], Hp)
    out["g_se2"], out["a_se2"] = _fold_bn(p["bn_SE2"], Hp)
    w = p["cnd2"]["w"]
    out["wc2a"] = _pad2d(w[:nhid], Hp, Hp).astype(cdt)
    out["wc2b"] = _pad2d(w[nhid:], Hp, Hp).astype(cdt)
    out["bc2"] = _pad_vec(p["cnd2"]["b"], Hp)
    out["g_bn2"], out["a_bn2"] = _fold_bn(p["bn2"], Hp)
    # ---- layer 3 + head
    out["w_m1_l3"] = wcat(p["graph_encoder3"]["w"], p["self_GE3"]["w"], Hp, Cp)
    out["wg_se3"] = _pad2d(p["structure_encoder3"]["w"], Hp, Cp).astype(cdt)
    out["ws_se3"] = _pad2d(p["self_SE3"]["w"], Hp, Cp).astype(cdt)
    out["b1_l3"] = _pad_vec(p["graph_encoder3"]["b"] + p["self_GE3"]["b"], Cp)
    out["b2_l3"] = _pad_vec(p["structure_encoder3"]["b"] + p["self_SE3"]["b"], Cp)
    w = p["cnd3"]["w"]
    out["wc3a"] = _pad2d(w[:nclass], Cp, Cp).astype(cdt)
    out["wc3b"] = _pad2d(w[nclass:], Cp, Cp).astype(cdt)
    out["bc3"] = _pad_vec(p["cnd3"]["b"], Cp)
    return out


# ----------------------------------------------------------------------------
# Pure-JAX reference (unpadded, fp32) for numerical validation
# ----------------------------------------------------------------------------
def _reference_forward(p, node_input, adj, feat, eps=1e-5):
    def gc(x, lin):
        return jnp.einsum("bij,bjh->bih", adj, x @ lin["w"]) + lin["b"]

    def sl(x, lin):
        return x @ lin["w"] + lin["b"]

    def bn_relu(x, bn):
        gamma, beta, rmean, rvar = bn
        return jnp.maximum((x - rmean) / jnp.sqrt(rvar + eps) * gamma + beta, 0.0)

    m1 = gc(feat, p["graph_encoder1"]) + sl(feat, p["self_GE1"])
    m2 = gc(node_input, p["structure_encoder1"]) + sl(node_input, p["self_SE1"])
    model = bn_relu(sl(jnp.concatenate([m1, m2], -1), p["cnd1"]), p["bn1"])
    m1b = bn_relu(m1, p["bn_GE1"])
    m1 = gc(m1b, p["graph_encoder2"]) + sl(m1b, p["self_GE2"])
    mse = bn_relu(m2, p["bn_SE1"])
    m2 = gc(model, p["structure_encoder2"]) + sl(mse, p["self_SE2"])
    model = bn_relu(sl(jnp.concatenate([m1, m2], -1), p["cnd2"]), p["bn2"])
    m1b = bn_relu(m1, p["bn_GE2"])
    m1 = gc(m1b, p["graph_encoder3"]) + sl(m1b, p["self_GE3"])
    mse = bn_relu(m2, p["bn_SE2"])
    m2 = gc(model, p["structure_encoder3"]) + sl(mse, p["self_SE3"])
    logits = sl(jnp.concatenate([m1, m2], -1), p["cnd3"])
    return jax.nn.sigmoid(logits), logits


if __name__ == "__main__":
    B, N = 2, 16
    nfeat, nhid, nclass = 8, 32, 4

    key = jax.random.PRNGKey(0)
    k_param, k_node, k_att, k_adj, k_fadj, k_feat = jax.random.split(key, 6)

    params = init_params(k_param, nfeat, nhid, nclass)

    node_input = jax.random.normal(k_node, (B, N, 2), jnp.float32)
    att_input = jax.random.normal(k_att, (B, N, 1), jnp.float32)
    adj = jax.random.uniform(k_adj, (B, N, N), jnp.float32)
    adj = adj / jnp.sum(adj, axis=-1, keepdims=True)      # row-normalized adjacency
    Fadj = jax.random.uniform(k_fadj, (B, N, N), jnp.float32)
    feat = jax.random.normal(k_feat, (B, N, nfeat), jnp.float32)

    ref_probs, ref_logits = _reference_forward(params, node_input, adj, feat)

    # --- fp32 path: exact reproduction, tight tolerance ---
    prep32 = prepare_params(params, nfeat, nhid, nclass)
    probs, logits = cs_gcn_forward(prep32, node_input, att_input, adj, Fadj, feat,
                                   nclass=nclass)
    jax.block_until_ready((probs, logits))
    assert probs.shape == (B, N, nclass) and logits.shape == (B, N, nclass)
    assert bool(jnp.all(jnp.isfinite(probs))) and bool(jnp.all(jnp.isfinite(logits)))
    err_l = float(jnp.max(jnp.abs(logits - ref_logits)))
    err_p = float(jnp.max(jnp.abs(probs - ref_probs)))
    assert err_l < 1e-3 and err_p < 1e-3, (err_l, err_p)

    # --- bf16 storage/compute path (f32 accumulation + f32 epilogues) ---
    prep16 = prepare_params(params, nfeat, nhid, nclass, compute_dtype=jnp.bfloat16)
    probs16, logits16 = cs_gcn_forward(prep16, node_input, att_input, adj, Fadj, feat,
                                       nclass=nclass)
    jax.block_until_ready((probs16, logits16))
    assert bool(jnp.all(jnp.isfinite(probs16))) and bool(jnp.all(jnp.isfinite(logits16)))
    assert float(jnp.max(jnp.abs(probs16 - ref_probs))) < 0.2

    print("KERNEL_OK")
</pallas_src>

<mosaic_0001>
module attributes {stable_mosaic.version = 11 : i64} {
  func.func @_cs_gcn_fused_kernel(%arg0: i32, %arg1: memref<2x16x16xf32, #tpu.memory_space<vmem>>, %arg2: memref<2x16x8xf32, #tpu.memory_space<vmem>>, %arg3: memref<2x16x8xf32, #tpu.memory_space<vmem>>, %arg4: memref<8x256xf32, #tpu.memory_space<vmem>>, %arg5: memref<8x256xf32, #tpu.memory_space<vmem>>, %arg6: memref<1x128xf32, #tpu.memory_space<vmem>>, %arg7: memref<1x128xf32, #tpu.memory_space<vmem>>, %arg8: memref<1x128xf32, #tpu.memory_space<vmem>>, %arg9: memref<1x128xf32, #tpu.memory_space<vmem>>, %arg10: memref<1x128xf32, #tpu.memory_space<vmem>>, %arg11: memref<1x128xf32, #tpu.memory_space<vmem>>, %arg12: memref<128x128xf32, #tpu.memory_space<vmem>>, %arg13: memref<128x128xf32, #tpu.memory_space<vmem>>, %arg14: memref<1x128xf32, #tpu.memory_space<vmem>>, %arg15: memref<1x128xf32, #tpu.memory_space<vmem>>, %arg16: memref<1x128xf32, #tpu.memory_space<vmem>>, %arg17: memref<128x256xf32, #tpu.memory_space<vmem>>, %arg18: memref<128x128xf32, #tpu.memory_space<vmem>>, %arg19: memref<128x128xf32, #tpu.memory_space<vmem>>, %arg20: memref<1x128xf32, #tpu.memory_space<vmem>>, %arg21: memref<1x128xf32, #tpu.memory_space<vmem>>, %arg22: memref<1x128xf32, #tpu.memory_space<vmem>>, %arg23: memref<1x128xf32, #tpu.memory_space<vmem>>, %arg24: memref<1x128xf32, #tpu.memory_space<vmem>>, %arg25: memref<1x128xf32, #tpu.memory_space<vmem>>, %arg26: memref<128x128xf32, #tpu.memory_space<vmem>>, %arg27: memref<128x128xf32, #tpu.memory_space<vmem>>, %arg28: memref<1x128xf32, #tpu.memory_space<vmem>>, %arg29: memref<1x128xf32, #tpu.memory_space<vmem>>, %arg30: memref<1x128xf32, #tpu.memory_space<vmem>>, %arg31: memref<128x256xf32, #tpu.memory_space<vmem>>, %arg32: memref<128x128xf32, #tpu.memory_space<vmem>>, %arg33: memref<128x128xf32, #tpu.memory_space<vmem>>, %arg34: memref<1x128xf32, #tpu.memory_space<vmem>>, %arg35: memref<1x128xf32, #tpu.memory_space<vmem>>, %arg36: memref<128x128xf32, #tpu.memory_space<vmem>>, %arg37: memref<128x128xf32, #tpu.memory_space<vmem>>, %arg38: memref<1x128xf32, #tpu.memory_space<vmem>>, %arg39: memref<2x16x128xf32, #tpu.memory_space<vmem>>, %arg40: memref<2x16x128xf32, #tpu.memory_space<vmem>>) attributes {dimension_semantics = [#tpu.dimension_semantics<parallel>], iteration_bounds = array<i64: 1>, scalar_prefetch = 0 : i64, scratch_operands = 0 : i64, tpu.core_type = #tpu.core_type<tc>, window_params = [{transform_indices = @transform_0, window_bounds = array<i64: 2, 16, 16>}, {transform_indices = @transform_1, window_bounds = array<i64: 2, 16, 8>}, {transform_indices = @transform_2, window_bounds = array<i64: 2, 16, 8>}, {pipeline_mode = #tpu.pipeline_mode<synchronous>, transform_indices = @transform_3, window_bounds = array<i64: 8, 256>}, {pipeline_mode = #tpu.pipeline_mode<synchronous>, transform_indices = @transform_4, window_bounds = array<i64: 8, 256>}, {pipeline_mode = #tpu.pipeline_mode<synchronous>, transform_indices = @transform_5, window_bounds = array<i64: 1, 128>}, {pipeline_mode = #tpu.pipeline_mode<synchronous>, transform_indices = @transform_6, window_bounds = array<i64: 1, 128>}, {pipeline_mode = #tpu.pipeline_mode<synchronous>, transform_indices = @transform_7, window_bounds = array<i64: 1, 128>}, {pipeline_mode = #tpu.pipeline_mode<synchronous>, transform_indices = @transform_8, window_bounds = array<i64: 1, 128>}, {pipeline_mode = #tpu.pipeline_mode<synchronous>, transform_indices = @transform_9, window_bounds = array<i64: 1, 128>}, {pipeline_mode = #tpu.pipeline_mode<synchronous>, transform_indices = @transform_10, window_bounds = array<i64: 1, 128>}, {pipeline_mode = #tpu.pipeline_mode<synchronous>, transform_indices = @transform_11, window_bounds = array<i64: 128, 128>}, {pipeline_mode = #tpu.pipeline_mode<synchronous>, transform_indices = @transform_12, window_bounds = array<i64: 128, 128>}, {pipeline_mode = #tpu.pipeline_mode<synchronous>, transform_indices = @transform_13, window_bounds = array<i64: 1, 128>}, {pipeline_mode = #tpu.pipeline_mode<synchronous>, transform_indices = @transform_14, window_bounds = array<i64: 1, 128>}, {pipeline_mode = #tpu.pipeline_mode<synchronous>, transform_indices = @transform_15, window_bounds = array<i64: 1, 128>}, {pipeline_mode = #tpu.pipeline_mode<synchronous>, transform_indices = @transform_16, window_bounds = array<i64: 128, 256>}, {pipeline_mode = #tpu.pipeline_mode<synchronous>, transform_indices = @transform_17, window_bounds = array<i64: 128, 128>}, {pipeline_mode = #tpu.pipeline_mode<synchronous>, transform_indices = @transform_18, window_bounds = array<i64: 128, 128>}, {pipeline_mode = #tpu.pipeline_mode<synchronous>, transform_indices = @transform_19, window_bounds = array<i64: 1, 128>}, {pipeline_mode = #tpu.pipeline_mode<synchronous>, transform_indices = @transform_20, window_bounds = array<i64: 1, 128>}, {pipeline_mode = #tpu.pipeline_mode<synchronous>, transform_indices = @transform_21, window_bounds = array<i64: 1, 128>}, {pipeline_mode = #tpu.pipeline_mode<synchronous>, transform_indices = @transform_22, window_bounds = array<i64: 1, 128>}, {pipeline_mode = #tpu.pipeline_mode<synchronous>, transform_indices = @transform_23, window_bounds = array<i64: 1, 128>}, {pipeline_mode = #tpu.pipeline_mode<synchronous>, transform_indices = @transform_24, window_bounds = array<i64: 1, 128>}, {pipeline_mode = #tpu.pipeline_mode<synchronous>, transform_indices = @transform_25, window_bounds = array<i64: 128, 128>}, {pipeline_mode = #tpu.pipeline_mode<synchronous>, transform_indices = @transform_26, window_bounds = array<i64: 128, 128>}, {pipeline_mode = #tpu.pipeline_mode<synchronous>, transform_indices = @transform_27, window_bounds = array<i64: 1, 128>}, {pipeline_mode = #tpu.pipeline_mode<synchronous>, transform_indices = @transform_28, window_bounds = array<i64: 1, 128>}, {pipeline_mode = #tpu.pipeline_mode<synchronous>, transform_indices = @transform_29, window_bounds = array<i64: 1, 128>}, {pipeline_mode = #tpu.pipeline_mode<synchronous>, transform_indices = @transform_30, window_bounds = array<i64: 128, 256>}, {pipeline_mode = #tpu.pipeline_mode<synchronous>, transform_indices = @transform_31, window_bounds = array<i64: 128, 128>}, {pipeline_mode = #tpu.pipeline_mode<synchronous>, transform_indices = @transform_32, window_bounds = array<i64: 128, 128>}, {pipeline_mode = #tpu.pipeline_mode<synchronous>, transform_indices = @transform_33, window_bounds = array<i64: 1, 128>}, {pipeline_mode = #tpu.pipeline_mode<synchronous>, transform_indices = @transform_34, window_bounds = array<i64: 1, 128>}, {pipeline_mode = #tpu.pipeline_mode<synchronous>, transform_indices = @transform_35, window_bounds = array<i64: 128, 128>}, {pipeline_mode = #tpu.pipeline_mode<synchronous>, transform_indices = @transform_36, window_bounds = array<i64: 128, 128>}, {pipeline_mode = #tpu.pipeline_mode<synchronous>, transform_indices = @transform_37, window_bounds = array<i64: 1, 128>}, {transform_indices = @transform_38, window_bounds = array<i64: 2, 16, 128>}, {transform_indices = @transform_39, window_bounds = array<i64: 2, 16, 128>}]} {
    %c0 = arith.constant 0 : index
    %c0_0 = arith.constant 0 : index
    %c0_1 = arith.constant 0 : index
    %0 = vector.load %arg1[%c0, %c0_0, %c0_1] : memref<2x16x16xf32, #tpu.memory_space<vmem>>, vector<2x16x16xf32>
    %c0_2 = arith.constant 0 : index
    %c0_3 = arith.constant 0 : index
    %c0_4 = arith.constant 0 : index
    %1 = vector.load %arg2[%c0_2, %c0_3, %c0_4] : memref<2x16x8xf32, #tpu.memory_space<vmem>>, vector<2x16x8xf32>
    %2 = vector.shape_cast %1 : vector<2x16x8xf32> to vector<32x8xf32>
    %c0_5 = arith.constant 0 : index
    %c0_6 = arith.constant 0 : index
    %c0_7 = arith.constant 0 : index
    %3 = vector.load %arg3[%c0_5, %c0_6, %c0_7] : memref<2x16x8xf32, #tpu.memory_space<vmem>>, vector<2x16x8xf32>
    %4 = vector.shape_cast %3 : vector<2x16x8xf32> to vector<32x8xf32>
    %c0_8 = arith.constant 0 : index
    %c0_9 = arith.constant 0 : index
    %5 = vector.load %arg4[%c0_8, %c0_9] : memref<8x256xf32, #tpu.memory_space<vmem>>, vector<8x256xf32>
    %cst = arith.constant dense<0.000000e+00> : vector<32x256xf32>
    %6 = tpu.matmul %2, %5, %cst {dimension_numbers = #tpu.dot_dimension_numbers<[1], [0], [0], [1], [0, 0, 1, 1], [], []>} : vector<32x8xf32>, vector<8x256xf32>, vector<32x256xf32> -> vector<32x256xf32>
    %c0_10 = arith.constant 0 : index
    %c0_11 = arith.constant 0 : index
    %7 = vector.load %arg5[%c0_10, %c0_11] : memref<8x256xf32, #tpu.memory_space<vmem>>, vector<8x256xf32>
    %cst_12 = arith.constant dense<0.000000e+00> : vector<32x256xf32>
    %8 = tpu.matmul %4, %7, %cst_12 {dimension_numbers = #tpu.dot_dimension_numbers<[1], [0], [0], [1], [0, 0, 1, 1], [], []>} : vector<32x8xf32>, vector<8x256xf32>, vector<32x256xf32> -> vector<32x256xf32>
    %9 = vector.extract_strided_slice %6 {offsets = [0, 0], sizes = [32, 128], strides = [1, 1]} : vector<32x256xf32> to vector<32x128xf32>
    %10 = vector.extract_strided_slice %8 {offsets = [0, 0], sizes = [32, 128], strides = [1, 1]} : vector<32x256xf32> to vector<32x128xf32>
    %11 = tpu.concatenate %9, %10 in 1 : vector<32x128xf32>, vector<32x128xf32> -> vector<32x256xf32>
    %12 = vector.shape_cast %11 : vector<32x256xf32> to vector<2x16x256xf32>
    "tpu.trace_start"() <{level = 10 : i32, message = "bij,bjh->bih"}> : () -> ()
    %cst_13 = arith.constant dense<0.000000e+00> : vector<2x16x256xf32>
    %13 = tpu.matmul %0, %12, %cst_13 {dimension_numbers = #tpu.dot_dimension_numbers<[2], [1], [1], [2], [0, 0, 0, 1, 1, 2], [0], [0]>} : vector<2x16x16xf32>, vector<2x16x256xf32>, vector<2x16x256xf32> -> vector<2x16x256xf32>
    "tpu.trace_stop"() : () -> ()
    %14 = vector.shape_cast %13 : vector<2x16x256xf32> to vector<32x256xf32>
    %15 = vector.extract_strided_slice %14 {offsets = [0, 0], sizes = [32, 128], strides = [1, 1]} : vector<32x256xf32> to vector<32x128xf32>
    %16 = vector.extract_strided_slice %6 {offsets = [0, 128], sizes = [32, 128], strides = [1, 1]} : vector<32x256xf32> to vector<32x128xf32>
    %17 = arith.addf %15, %16 : vector<32x128xf32>
    %c0_14 = arith.constant 0 : index
    %c0_15 = arith.constant 0 : index
    %18 = vector.load %arg6[%c0_14, %c0_15] : memref<1x128xf32, #tpu.memory_space<vmem>>, vector<1x128xf32>
    %19 = vector.broadcast %18 : vector<1x128xf32> to vector<32x128xf32>
    %20 = arith.addf %17, %19 : vector<32x128xf32>
    %21 = vector.extract_strided_slice %14 {offsets = [0, 128], sizes = [32, 128], strides = [1, 1]} : vector<32x256xf32> to vector<32x128xf32>
    %22 = vector.extract_strided_slice %8 {offsets = [0, 128], sizes = [32, 128], strides = [1, 1]} : vector<32x256xf32> to vector<32x128xf32>
    %23 = arith.addf %21, %22 : vector<32x128xf32>
    %c0_16 = arith.constant 0 : index
    %c0_17 = arith.constant 0 : index
    %24 = vector.load %arg7[%c0_16, %c0_17] : memref<1x128xf32, #tpu.memory_space<vmem>>, vector<1x128xf32>
    %25 = vector.broadcast %24 : vector<1x128xf32> to vector<32x128xf32>
    %26 = arith.addf %23, %25 : vector<32x128xf32>
    %c0_18 = arith.constant 0 : index
    %c0_19 = arith.constant 0 : index
    %27 = vector.load %arg12[%c0_18, %c0_19] : memref<128x128xf32, #tpu.memory_space<vmem>>, vector<128x128xf32>
    %cst_20 = arith.constant dense<0.000000e+00> : vector<32x128xf32>
    %28 = tpu.matmul %20, %27, %cst_20 {dimension_numbers = #tpu.dot_dimension_numbers<[1], [0], [0], [1], [0, 0, 1, 1], [], []>} : vector<32x128xf32>, vector<128x128xf32>, vector<32x128xf32> -> vector<32x128xf32>
    %c0_21 = arith.constant 0 : index
    %c0_22 = arith.constant 0 : index
    %29 = vector.load %arg13[%c0_21, %c0_22] : memref<128x128xf32, #tpu.memory_space<vmem>>, vector<128x128xf32>
    %cst_23 = arith.constant dense<0.000000e+00> : vector<32x128xf32>
    %30 = tpu.matmul %26, %29, %cst_23 {dimension_numbers = #tpu.dot_dimension_numbers<[1], [0], [0], [1], [0, 0, 1, 1], [], []>} : vector<32x128xf32>, vector<128x128xf32>, vector<32x128xf32> -> vector<32x128xf32>
    %31 = arith.addf %28, %30 : vector<32x128xf32>
    %c0_24 = arith.constant 0 : index
    %c0_25 = arith.constant 0 : index
    %32 = vector.load %arg14[%c0_24, %c0_25] : memref<1x128xf32, #tpu.memory_space<vmem>>, vector<1x128xf32>
    %33 = vector.broadcast %32 : vector<1x128xf32> to vector<32x128xf32>
    %34 = arith.addf %31, %33 : vector<32x128xf32>
    %c0_26 = arith.constant 0 : index
    %c0_27 = arith.constant 0 : index
    %35 = vector.load %arg15[%c0_26, %c0_27] : memref<1x128xf32, #tpu.memory_space<vmem>>, vector<1x128xf32>
    %36 = vector.broadcast %35 : vector<1x128xf32> to vector<32x128xf32>
    %37 = arith.mulf %34, %36 : vector<32x128xf32>
    %c0_28 = arith.constant 0 : index
    %c0_29 = arith.constant 0 : index
    %38 = vector.load %arg16[%c0_28, %c0_29] : memref<1x128xf32, #tpu.memory_space<vmem>>, vector<1x128xf32>
    %39 = vector.broadcast %38 : vector<1x128xf32> to vector<32x128xf32>
    %40 = arith.addf %37, %39 : vector<32x128xf32>
    %cst_30 = arith.constant 0.000000e+00 : f32
    %41 = vector.broadcast %cst_30 : f32 to vector<32x128xf32>
    %42 = arith.maximumf %40, %41 : vector<32x128xf32>
    %c0_31 = arith.constant 0 : index
    %c0_32 = arith.constant 0 : index
    %43 = vector.load %arg8[%c0_31, %c0_32] : memref<1x128xf32, #tpu.memory_space<vmem>>, vector<1x128xf32>
    %44 = vector.broadcast %43 : vector<1x128xf32> to vector<32x128xf32>
    %45 = arith.mulf %20, %44 : vector<32x128xf32>
    %c0_33 = arith.constant 0 : index
    %c0_34 = arith.constant 0 : index
    %46 = vector.load %arg9[%c0_33, %c0_34] : memref<1x128xf32, #tpu.memory_space<vmem>>, vector<1x128xf32>
    %47 = vector.broadcast %46 : vector<1x128xf32> to vector<32x128xf32>
    %48 = arith.addf %45, %47 : vector<32x128xf32>
    %cst_35 = arith.constant 0.000000e+00 : f32
    %49 = vector.broadcast %cst_35 : f32 to vector<32x128xf32>
    %50 = arith.maximumf %48, %49 : vector<32x128xf32>
    %c0_36 = arith.constant 0 : index
    %c0_37 = arith.constant 0 : index
    %51 = vector.load %arg10[%c0_36, %c0_37] : memref<1x128xf32, #tpu.memory_space<vmem>>, vector<1x128xf32>
    %52 = vector.broadcast %51 : vector<1x128xf32> to vector<32x128xf32>
    %53 = arith.mulf %26, %52 : vector<32x128xf32>
    %c0_38 = arith.constant 0 : index
    %c0_39 = arith.constant 0 : index
    %54 = vector.load %arg11[%c0_38, %c0_39] : memref<1x128xf32, #tpu.memory_space<vmem>>, vector<1x128xf32>
    %55 = vector.broadcast %54 : vector<1x128xf32> to vector<32x128xf32>
    %56 = arith.addf %53, %55 : vector<32x128xf32>
    %cst_40 = arith.constant 0.000000e+00 : f32
    %57 = vector.broadcast %cst_40 : f32 to vector<32x128xf32>
    %58 = arith.maximumf %56, %57 : vector<32x128xf32>
    %c0_41 = arith.constant 0 : index
    %c0_42 = arith.constant 0 : index
    %59 = vector.load %arg17[%c0_41, %c0_42] : memref<128x256xf32, #tpu.memory_space<vmem>>, vector<128x256xf32>
    %cst_43 = arith.constant dense<0.000000e+00> : vector<32x256xf32>
    %60 = tpu.matmul %50, %59, %cst_43 {dimension_numbers = #tpu.dot_dimension_numbers<[1], [0], [0], [1], [0, 0, 1, 1], [], []>} : vector<32x128xf32>, vector<128x256xf32>, vector<32x256xf32> -> vector<32x256xf32>
    %c0_44 = arith.constant 0 : index
    %c0_45 = arith.constant 0 : index
    %61 = vector.load %arg18[%c0_44, %c0_45] : memref<128x128xf32, #tpu.memory_space<vmem>>, vector<128x128xf32>
    %cst_46 = arith.constant dense<0.000000e+00> : vector<32x128xf32>
    %62 = tpu.matmul %42, %61, %cst_46 {dimension_numbers = #tpu.dot_dimension_numbers<[1], [0], [0], [1], [0, 0, 1, 1], [], []>} : vector<32x128xf32>, vector<128x128xf32>, vector<32x128xf32> -> vector<32x128xf32>
    %c0_47 = arith.constant 0 : index
    %c0_48 = arith.constant 0 : index
    %63 = vector.load %arg19[%c0_47, %c0_48] : memref<128x128xf32, #tpu.memory_space<vmem>>, vector<128x128xf32>
    %cst_49 = arith.constant dense<0.000000e+00> : vector<32x128xf32>
    %64 = tpu.matmul %58, %63, %cst_49 {dimension_numbers = #tpu.dot_dimension_numbers<[1], [0], [0], [1], [0, 0, 1, 1], [], []>} : vector<32x128xf32>, vector<128x128xf32>, vector<32x128xf32> -> vector<32x128xf32>
    %65 = vector.extract_strided_slice %60 {offsets = [0, 0], sizes = [32, 128], strides = [1, 1]} : vector<32x256xf32> to vector<32x128xf32>
    %66 = tpu.concatenate %65, %62 in 1 : vector<32x128xf32>, vector<32x128xf32> -> vector<32x256xf32>
    %67 = vector.shape_cast %66 : vector<32x256xf32> to vector<2x16x256xf32>
    "tpu.trace_start"() <{level = 10 : i32, message = "bij,bjh->bih"}> : () -> ()
    %cst_50 = arith.constant dense<0.000000e+00> : vector<2x16x256xf32>
    %68 = tpu.matmul %0, %67, %cst_50 {dimension_numbers = #tpu.dot_dimension_numbers<[2], [1], [1], [2], [0, 0, 0, 1, 1, 2], [0], [0]>} : vector<2x16x16xf32>, vector<2x16x256xf32>, vector<2x16x256xf32> -> vector<2x16x256xf32>
    "tpu.trace_stop"() : () -> ()
    %69 = vector.shape_cast %68 : vector<2x16x256xf32> to vector<32x256xf32>
    %70 = vector.extract_strided_slice %69 {offsets = [0, 0], sizes = [32, 128], strides = [1, 1]} : vector<32x256xf32> to vector<32x128xf32>
    %71 = vector.extract_strided_slice %60 {offsets = [0, 128], sizes = [32, 128], strides = [1, 1]} : vector<32x256xf32> to vector<32x128xf32>
    %72 = arith.addf %70, %71 : vector<32x128xf32>
    %c0_51 = arith.constant 0 : index
    %c0_52 = arith.constant 0 : index
    %73 = vector.load %arg20[%c0_51, %c0_52] : memref<1x128xf32, #tpu.memory_space<vmem>>, vector<1x128xf32>
    %74 = vector.broadcast %73 : vector<1x128xf32> to vector<32x128xf32>
    %75 = arith.addf %72, %74 : vector<32x128xf32>
    %76 = vector.extract_strided_slice %69 {offsets = [0, 128], sizes = [32, 128], strides = [1, 1]} : vector<32x256xf32> to vector<32x128xf32>
    %77 = arith.addf %76, %64 : vector<32x128xf32>
    %c0_53 = arith.constant 0 : index
    %c0_54 = arith.constant 0 : index
    %78 = vector.load %arg21[%c0_53, %c0_54] : memref<1x128xf32, #tpu.memory_space<vmem>>, vector<1x128xf32>
    %79 = vector.broadcast %78 : vector<1x128xf32> to vector<32x128xf32>
    %80 = arith.addf %77, %79 : vector<32x128xf32>
    %c0_55 = arith.constant 0 : index
    %c0_56 = arith.constant 0 : index
    %81 = vector.load %arg26[%c0_55, %c0_56] : memref<128x128xf32, #tpu.memory_space<vmem>>, vector<128x128xf32>
    %cst_57 = arith.constant dense<0.000000e+00> : vector<32x128xf32>
    %82 = tpu.matmul %75, %81, %cst_57 {dimension_numbers = #tpu.dot_dimension_numbers<[1], [0], [0], [1], [0, 0, 1, 1], [], []>} : vector<32x128xf32>, vector<128x128xf32>, vector<32x128xf32> -> vector<32x128xf32>
    %c0_58 = arith.constant 0 : index
    %c0_59 = arith.constant 0 : index
    %83 = vector.load %arg27[%c0_58, %c0_59] : memref<128x128xf32, #tpu.memory_space<vmem>>, vector<128x128xf32>
    %cst_60 = arith.constant dense<0.000000e+00> : vector<32x128xf32>
    %84 = tpu.matmul %80, %83, %cst_60 {dimension_numbers = #tpu.dot_dimension_numbers<[1], [0], [0], [1], [0, 0, 1, 1], [], []>} : vector<32x128xf32>, vector<128x128xf32>, vector<32x128xf32> -> vector<32x128xf32>
    %85 = arith.addf %82, %84 : vector<32x128xf32>
    %c0_61 = arith.constant 0 : index
    %c0_62 = arith.constant 0 : index
    %86 = vector.load %arg28[%c0_61, %c0_62] : memref<1x128xf32, #tpu.memory_space<vmem>>, vector<1x128xf32>
    %87 = vector.broadcast %86 : vector<1x128xf32> to vector<32x128xf32>
    %88 = arith.addf %85, %87 : vector<32x128xf32>
    %c0_63 = arith.constant 0 : index
    %c0_64 = arith.constant 0 : index
    %89 = vector.load %arg29[%c0_63, %c0_64] : memref<1x128xf32, #tpu.memory_space<vmem>>, vector<1x128xf32>
    %90 = vector.broadcast %89 : vector<1x128xf32> to vector<32x128xf32>
    %91 = arith.mulf %88, %90 : vector<32x128xf32>
    %c0_65 = arith.constant 0 : index
    %c0_66 = arith.constant 0 : index
    %92 = vector.load %arg30[%c0_65, %c0_66] : memref<1x128xf32, #tpu.memory_space<vmem>>, vector<1x128xf32>
    %93 = vector.broadcast %92 : vector<1x128xf32> to vector<32x128xf32>
    %94 = arith.addf %91, %93 : vector<32x128xf32>
    %cst_67 = arith.constant 0.000000e+00 : f32
    %95 = vector.broadcast %cst_67 : f32 to vector<32x128xf32>
    %96 = arith.maximumf %94, %95 : vector<32x128xf32>
    %c0_68 = arith.constant 0 : index
    %c0_69 = arith.constant 0 : index
    %97 = vector.load %arg22[%c0_68, %c0_69] : memref<1x128xf32, #tpu.memory_space<vmem>>, vector<1x128xf32>
    %98 = vector.broadcast %97 : vector<1x128xf32> to vector<32x128xf32>
    %99 = arith.mulf %75, %98 : vector<32x128xf32>
    %c0_70 = arith.constant 0 : index
    %c0_71 = arith.constant 0 : index
    %100 = vector.load %arg23[%c0_70, %c0_71] : memref<1x128xf32, #tpu.memory_space<vmem>>, vector<1x128xf32>
    %101 = vector.broadcast %100 : vector<1x128xf32> to vector<32x128xf32>
    %102 = arith.addf %99, %101 : vector<32x128xf32>
    %cst_72 = arith.constant 0.000000e+00 : f32
    %103 = vector.broadcast %cst_72 : f32 to vector<32x128xf32>
    %104 = arith.maximumf %102, %103 : vector<32x128xf32>
    %c0_73 = arith.constant 0 : index
    %c0_74 = arith.constant 0 : index
    %105 = vector.load %arg24[%c0_73, %c0_74] : memref<1x128xf32, #tpu.memory_space<vmem>>, vector<1x128xf32>
    %106 = vector.broadcast %105 : vector<1x128xf32> to vector<32x128xf32>
    %107 = arith.mulf %80, %106 : vector<32x128xf32>
    %c0_75 = arith.constant 0 : index
    %c0_76 = arith.constant 0 : index
    %108 = vector.load %arg25[%c0_75, %c0_76] : memref<1x128xf32, #tpu.memory_space<vmem>>, vector<1x128xf32>
    %109 = vector.broadcast %108 : vector<1x128xf32> to vector<32x128xf32>
    %110 = arith.addf %107, %109 : vector<32x128xf32>
    %cst_77 = arith.constant 0.000000e+00 : f32
    %111 = vector.broadcast %cst_77 : f32 to vector<32x128xf32>
    %112 = arith.maximumf %110, %111 : vector<32x128xf32>
    %c0_78 = arith.constant 0 : index
    %c0_79 = arith.constant 0 : index
    %113 = vector.load %arg31[%c0_78, %c0_79] : memref<128x256xf32, #tpu.memory_space<vmem>>, vector<128x256xf32>
    %cst_80 = arith.constant dense<0.000000e+00> : vector<32x256xf32>
    %114 = tpu.matmul %104, %113, %cst_80 {dimension_numbers = #tpu.dot_dimension_numbers<[1], [0], [0], [1], [0, 0, 1, 1], [], []>} : vector<32x128xf32>, vector<128x256xf32>, vector<32x256xf32> -> vector<32x256xf32>
    %c0_81 = arith.constant 0 : index
    %c0_82 = arith.constant 0 : index
    %115 = vector.load %arg32[%c0_81, %c0_82] : memref<128x128xf32, #tpu.memory_space<vmem>>, vector<128x128xf32>
    %cst_83 = arith.constant dense<0.000000e+00> : vector<32x128xf32>
    %116 = tpu.matmul %96, %115, %cst_83 {dimension_numbers = #tpu.dot_dimension_numbers<[1], [0], [0], [1], [0, 0, 1, 1], [], []>} : vector<32x128xf32>, vector<128x128xf32>, vector<32x128xf32> -> vector<32x128xf32>
    %c0_84 = arith.constant 0 : index
    %c0_85 = arith.constant 0 : index
    %117 = vector.load %arg33[%c0_84, %c0_85] : memref<128x128xf32, #tpu.memory_space<vmem>>, vector<128x128xf32>
    %cst_86 = arith.constant dense<0.000000e+00> : vector<32x128xf32>
    %118 = tpu.matmul %112, %117, %cst_86 {dimension_numbers = #tpu.dot_dimension_numbers<[1], [0], [0], [1], [0, 0, 1, 1], [], []>} : vector<32x128xf32>, vector<128x128xf32>, vector<32x128xf32> -> vector<32x128xf32>
    %119 = vector.extract_strided_slice %114 {offsets = [0, 0], sizes = [32, 128], strides = [1, 1]} : vector<32x256xf32> to vector<32x128xf32>
    %120 = tpu.concatenate %119, %116 in 1 : vector<32x128xf32>, vector<32x128xf32> -> vector<32x256xf32>
    %121 = vector.shape_cast %120 : vector<32x256xf32> to vector<2x16x256xf32>
    "tpu.trace_start"() <{level = 10 : i32, message = "bij,bjh->bih"}> : () -> ()
    %cst_87 = arith.constant dense<0.000000e+00> : vector<2x16x256xf32>
    %122 = tpu.matmul %0, %121, %cst_87 {dimension_numbers = #tpu.dot_dimension_numbers<[2], [1], [1], [2], [0, 0, 0, 1, 1, 2], [0], [0]>} : vector<2x16x16xf32>, vector<2x16x256xf32>, vector<2x16x256xf32> -> vector<2x16x256xf32>
    "tpu.trace_stop"() : () -> ()
    %123 = vector.shape_cast %122 : vector<2x16x256xf32> to vector<32x256xf32>
    %124 = vector.extract_strided_slice %123 {offsets = [0, 0], sizes = [32, 128], strides = [1, 1]} : vector<32x256xf32> to vector<32x128xf32>
    %125 = vector.extract_strided_slice %114 {offsets = [0, 128], sizes = [32, 128], strides = [1, 1]} : vector<32x256xf32> to vector<32x128xf32>
    %126 = arith.addf %124, %125 : vector<32x128xf32>
    %c0_88 = arith.constant 0 : index
    %c0_89 = arith.constant 0 : index
    %127 = vector.load %arg34[%c0_88, %c0_89] : memref<1x128xf32, #tpu.memory_space<vmem>>, vector<1x128xf32>
    %128 = vector.broadcast %127 : vector<1x128xf32> to vector<32x128xf32>
    %129 = arith.addf %126, %128 : vector<32x128xf32>
    %130 = vector.extract_strided_slice %123 {offsets = [0, 128], sizes = [32, 128], strides = [1, 1]} : vector<32x256xf32> to vector<32x128xf32>
    %131 = arith.addf %130, %118 : vector<32x128xf32>
    %c0_90 = arith.constant 0 : index
    %c0_91 = arith.constant 0 : index
    %132 = vector.load %arg35[%c0_90, %c0_91] : memref<1x128xf32, #tpu.memory_space<vmem>>, vector<1x128xf32>
    %133 = vector.broadcast %132 : vector<1x128xf32> to vector<32x128xf32>
    %134 = arith.addf %131, %133 : vector<32x128xf32>
    %c0_92 = arith.constant 0 : index
    %c0_93 = arith.constant 0 : index
    %135 = vector.load %arg36[%c0_92, %c0_93] : memref<128x128xf32, #tpu.memory_space<vmem>>, vector<128x128xf32>
    %cst_94 = arith.constant dense<0.000000e+00> : vector<32x128xf32>
    %136 = tpu.matmul %129, %135, %cst_94 {dimension_numbers = #tpu.dot_dimension_numbers<[1], [0], [0], [1], [0, 0, 1, 1], [], []>} : vector<32x128xf32>, vector<128x128xf32>, vector<32x128xf32> -> vector<32x128xf32>
    %c0_95 = arith.constant 0 : index
    %c0_96 = arith.constant 0 : index
    %137 = vector.load %arg37[%c0_95, %c0_96] : memref<128x128xf32, #tpu.memory_space<vmem>>, vector<128x128xf32>
    %cst_97 = arith.constant dense<0.000000e+00> : vector<32x128xf32>
    %138 = tpu.matmul %134, %137, %cst_97 {dimension_numbers = #tpu.dot_dimension_numbers<[1], [0], [0], [1], [0, 0, 1, 1], [], []>} : vector<32x128xf32>, vector<128x128xf32>, vector<32x128xf32> -> vector<32x128xf32>
    %139 = arith.addf %136, %138 : vector<32x128xf32>
    %c0_98 = arith.constant 0 : index
    %c0_99 = arith.constant 0 : index
    %140 = vector.load %arg38[%c0_98, %c0_99] : memref<1x128xf32, #tpu.memory_space<vmem>>, vector<1x128xf32>
    %141 = vector.broadcast %140 : vector<1x128xf32> to vector<32x128xf32>
    %142 = arith.addf %139, %141 : vector<32x128xf32>
    %143 = vector.shape_cast %142 : vector<32x128xf32> to vector<2x16x128xf32>
    %c0_100 = arith.constant 0 : index
    %c0_101 = arith.constant 0 : index
    %c0_102 = arith.constant 0 : index
    %144 = vector.load %arg40[%c0_100, %c0_101, %c0_102] : memref<2x16x128xf32, #tpu.memory_space<vmem>>, vector<2x16x128xf32>
    tpu.vector_store %arg40[%c0_100, %c0_101, %c0_102], %143 {strides = array<i32>} : memref<2x16x128xf32, #tpu.memory_space<vmem>>, vector<2x16x128xf32>,
    %145 = arith.negf %142 : vector<32x128xf32>
    %146 = math.exp %145 : vector<32x128xf32>
    %cst_103 = arith.constant 1.000000e+00 : f32
    %147 = vector.broadcast %cst_103 : f32 to vector<32x128xf32>
    %148 = arith.addf %147, %146 : vector<32x128xf32>
    %149 = arith.divf %147, %148 : vector<32x128xf32>
    %150 = vector.shape_cast %149 : vector<32x128xf32> to vector<2x16x128xf32>
    %c0_104 = arith.constant 0 : index
    %c0_105 = arith.constant 0 : index
    %c0_106 = arith.constant 0 : index
    %151 = vector.load %arg39[%c0_104, %c0_105, %c0_106] : memref<2x16x128xf32, #tpu.memory_space<vmem>>, vector<2x16x128xf32>
    tpu.vector_store %arg39[%c0_104, %c0_105, %c0_106], %150 {strides = array<i32>} : memref<2x16x128xf32, #tpu.memory_space<vmem>>, vector<2x16x128xf32>,
    return
  }
  func.func @transform_0(%arg0: i32) -> (i32, i32, i32) {
    %c0_i32 = arith.constant 0 : i32
    %c0_i32_0 = arith.constant 0 : i32
    %c0_i32_1 = arith.constant 0 : i32
    return %arg0, %c0_i32, %c0_i32_0 : i32, i32, i32
  }
  func.func @transform_1(%arg0: i32) -> (i32, i32, i32) {
    %c0_i32 = arith.constant 0 : i32
    %c0_i32_0 = arith.constant 0 : i32
    %c0_i32_1 = arith.constant 0 : i32
    return %arg0, %c0_i32, %c0_i32_0 : i32, i32, i32
  }
  func.func @transform_2(%arg0: i32) -> (i32, i32, i32) {
    %c0_i32 = arith.constant 0 : i32
    %c0_i32_0 = arith.constant 0 : i32
    %c0_i32_1 = arith.constant 0 : i32
    return %arg0, %c0_i32, %c0_i32_0 : i32, i32, i32
  }
  func.func @transform_3(%arg0: i32) -> (i32, i32) {
    %c0_i32 = arith.constant 0 : i32
    %c0_i32_0 = arith.constant 0 : i32
    %c0_i32_1 = arith.constant 0 : i32
    return %c0_i32, %c0_i32_0 : i32, i32
  }
  func.func @transform_4(%arg0: i32) -> (i32, i32) {
    %c0_i32 = arith.constant 0 : i32
    %c0_i32_0 = arith.constant 0 : i32
    %c0_i32_1 = arith.constant 0 : i32
    return %c0_i32, %c0_i32_0 : i32, i32
  }
  func.func @transform_5(%arg0: i32) -> (i32, i32) {
    %c0_i32 = arith.constant 0 : i32
    %c0_i32_0 = arith.constant 0 : i32
    %c0_i32_1 = arith.constant 0 : i32
    return %c0_i32, %c0_i32_0 : i32, i32
  }
  func.func @transform_6(%arg0: i32) -> (i32, i32) {
    %c0_i32 = arith.constant 0 : i32
    %c0_i32_0 = arith.constant 0 : i32
    %c0_i32_1 = arith.constant 0 : i32
    return %c0_i32, %c0_i32_0 : i32, i32
  }
  func.func @transform_7(%arg0: i32) -> (i32, i32) {
    %c0_i32 = arith.constant 0 : i32
    %c0_i32_0 = arith.constant 0 : i32
    %c0_i32_1 = arith.constant 0 : i32
    return %c0_i32, %c0_i32_0 : i32, i32
  }
  func.func @transform_8(%arg0: i32) -> (i32, i32) {
    %c0_i32 = arith.constant 0 : i32
    %c0_i32_0 = arith.constant 0 : i32
    %c0_i32_1 = arith.constant 0 : i32
    return %c0_i32, %c0_i32_0 : i32, i32
  }
  func.func @transform_9(%arg0: i32) -> (i32, i32) {
    %c0_i32 = arith.constant 0 : i32
    %c0_i32_0 = arith.constant 0 : i32
    %c0_i32_1 = arith.constant 0 : i32
    return %c0_i32, %c0_i32_0 : i32, i32
  }
  func.func @transform_10(%arg0: i32) -> (i32, i32) {
    %c0_i32 = arith.constant 0 : i32
    %c0_i32_0 = arith.constant 0 : i32
    %c0_i32_1 = arith.constant 0 : i32
    return %c0_i32, %c0_i32_0 : i32, i32
  }
  func.func @transform_11(%arg0: i32) -> (i32, i32) {
    %c0_i32 = arith.constant 0 : i32
    %c0_i32_0 = arith.constant 0 : i32
    %c0_i32_1 = arith.constant 0 : i32
    return %c0_i32, %c0_i32_0 : i32, i32
  }
  func.func @transform_12(%arg0: i32) -> (i32, i32) {
    %c0_i32 = arith.constant 0 : i32
    %c0_i32_0 = arith.constant 0 : i32
    %c0_i32_1 = arith.constant 0 : i32
    return %c0_i32, %c0_i32_0 : i32, i32
  }
  func.func @transform_13(%arg0: i32) -> (i32, i32) {
    %c0_i32 = arith.constant 0 : i32
    %c0_i32_0 = arith.constant 0 : i32
    %c0_i32_1 = arith.constant 0 : i32
    return %c0_i32, %c0_i32_0 : i32, i32
  }
  func.func @transform_14(%arg0: i32) -> (i32, i32) {
    %c0_i32 = arith.constant 0 : i32
    %c0_i32_0 = arith.constant 0 : i32
    %c0_i32_1 = arith.constant 0 : i32
    return %c0_i32, %c0_i32_0 : i32, i32
  }
  func.func @transform_15(%arg0: i32) -> (i32, i32) {
    %c0_i32 = arith.constant 0 : i32
    %c0_i32_0 = arith.constant 0 : i32
    %c0_i32_1 = arith.constant 0 : i32
    return %c0_i32, %c0_i32_0 : i32, i32
  }
  func.func @transform_16(%arg0: i32) -> (i32, i32) {
    %c0_i32 = arith.constant 0 : i32
    %c0_i32_0 = arith.constant 0 : i32
    %c0_i32_1 = arith.constant 0 : i32
    return %c0_i32, %c0_i32_0 : i32, i32
  }
  func.func @transform_17(%arg0: i32) -> (i32, i32) {
    %c0_i32 = arith.constant 0 : i32
    %c0_i32_0 = arith.constant 0 : i32
    %c0_i32_1 = arith.constant 0 : i32
    return %c0_i32, %c0_i32_0 : i32, i32
  }
  func.func @transform_18(%arg0: i32) -> (i32, i32) {
    %c0_i32 = arith.constant 0 : i32
    %c0_i32_0 = arith.constant 0 : i32
    %c0_i32_1 = arith.constant 0 : i32
    return %c0_i32, %c0_i32_0 : i32, i32
  }
  func.func @transform_19(%arg0: i32) -> (i32, i32) {
    %c0_i32 = arith.constant 0 : i32
    %c0_i32_0 = arith.constant 0 : i32
    %c0_i32_1 = arith.constant 0 : i32
    return %c0_i32, %c0_i32_0 : i32, i32
  }
  func.func @transform_20(%arg0: i32) -> (i32, i32) {
    %c0_i32 = arith.constant 0 : i32
    %c0_i32_0 = arith.constant 0 : i32
    %c0_i32_1 = arith.constant 0 : i32
    return %c0_i32, %c0_i32_0 : i32, i32
  }
  func.func @transform_21(%arg0: i32) -> (i32, i32) {
    %c0_i32 = arith.constant 0 : i32
    %c0_i32_0 = arith.constant 0 : i32
    %c0_i32_1 = arith.constant 0 : i32
    return %c0_i32, %c0_i32_0 : i32, i32
  }
  func.func @transform_22(%arg0: i32) -> (i32, i32) {
    %c0_i32 = arith.constant 0 : i32
    %c0_i32_0 = arith.constant 0 : i32
    %c0_i32_1 = arith.constant 0 : i32
    return %c0_i32, %c0_i32_0 : i32, i32
  }
  func.func @transform_23(%arg0: i32) -> (i32, i32) {
    %c0_i32 = arith.constant 0 : i32
    %c0_i32_0 = arith.constant 0 : i32
    %c0_i32_1 = arith.constant 0 : i32
    return %c0_i32, %c0_i32_0 : i32, i32
  }
  func.func @transform_24(%arg0: i32) -> (i32, i32) {
    %c0_i32 = arith.constant 0 : i32
    %c0_i32_0 = arith.constant 0 : i32
    %c0_i32_1 = arith.constant 0 : i32
    return %c0_i32, %c0_i32_0 : i32, i32
  }
  func.func @transform_25(%arg0: i32) -> (i32, i32) {
    %c0_i32 = arith.constant 0 : i32
    %c0_i32_0 = arith.constant 0 : i32
    %c0_i32_1 = arith.constant 0 : i32
    return %c0_i32, %c0_i32_0 : i32, i32
  }
  func.func @transform_26(%arg0: i32) -> (i32, i32) {
    %c0_i32 = arith.constant 0 : i32
    %c0_i32_0 = arith.constant 0 : i32
    %c0_i32_1 = arith.constant 0 : i32
    return %c0_i32, %c0_i32_0 : i32, i32
  }
  func.func @transform_27(%arg0: i32) -> (i32, i32) {
    %c0_i32 = arith.constant 0 : i32
    %c0_i32_0 = arith.constant 0 : i32
    %c0_i32_1 = arith.constant 0 : i32
    return %c0_i32, %c0_i32_0 : i32, i32
  }
  func.func @transform_28(%arg0: i32) -> (i32, i32) {
    %c0_i32 = arith.constant 0 : i32
    %c0_i32_0 = arith.constant 0 : i32
    %c0_i32_1 = arith.constant 0 : i32
    return %c0_i32, %c0_i32_0 : i32, i32
  }
  func.func @transform_29(%arg0: i32) -> (i32, i32) {
    %c0_i32 = arith.constant 0 : i32
    %c0_i32_0 = arith.constant 0 : i32
    %c0_i32_1 = arith.constant 0 : i32
    return %c0_i32, %c0_i32_0 : i32, i32
  }
  func.func @transform_30(%arg0: i32) -> (i32, i32) {
    %c0_i32 = arith.constant 0 : i32
    %c0_i32_0 = arith.constant 0 : i32
    %c0_i32_1 = arith.constant 0 : i32
    return %c0_i32, %c0_i32_0 : i32, i32
  }
  func.func @transform_31(%arg0: i32) -> (i32, i32) {
    %c0_i32 = arith.constant 0 : i32
    %c0_i32_0 = arith.constant 0 : i32
    %c0_i32_1 = arith.constant 0 : i32
    return %c0_i32, %c0_i32_0 : i32, i32
  }
  func.func @transform_32(%arg0: i32) -> (i32, i32) {
    %c0_i32 = arith.constant 0 : i32
    %c0_i32_0 = arith.constant 0 : i32
    %c0_i32_1 = arith.constant 0 : i32
    return %c0_i32, %c0_i32_0 : i32, i32
  }
  func.func @transform_33(%arg0: i32) -> (i32, i32) {
    %c0_i32 = arith.constant 0 : i32
    %c0_i32_0 = arith.constant 0 : i32
    %c0_i32_1 = arith.constant 0 : i32
    return %c0_i32, %c0_i32_0 : i32, i32
  }
  func.func @transform_34(%arg0: i32) -> (i32, i32) {
    %c0_i32 = arith.constant 0 : i32
    %c0_i32_0 = arith.constant 0 : i32
    %c0_i32_1 = arith.constant 0 : i32
    return %c0_i32, %c0_i32_0 : i32, i32
  }
  func.func @transform_35(%arg0: i32) -> (i32, i32) {
    %c0_i32 = arith.constant 0 : i32
    %c0_i32_0 = arith.constant 0 : i32
    %c0_i32_1 = arith.constant 0 : i32
    return %c0_i32, %c0_i32_0 : i32, i32
  }
  func.func @transform_36(%arg0: i32) -> (i32, i32) {
    %c0_i32 = arith.constant 0 : i32
    %c0_i32_0 = arith.constant 0 : i32
    %c0_i32_1 = arith.constant 0 : i32
    return %c0_i32, %c0_i32_0 : i32, i32
  }
  func.func @transform_37(%arg0: i32) -> (i32, i32) {
    %c0_i32 = arith.constant 0 : i32
    %c0_i32_0 = arith.constant 0 : i32
    %c0_i32_1 = arith.constant 0 : i32
    return %c0_i32, %c0_i32_0 : i32, i32
  }
  func.func @transform_38(%arg0: i32) -> (i32, i32, i32) {
    %c0_i32 = arith.constant 0 : i32
    %c0_i32_0 = arith.constant 0 : i32
    %c0_i32_1 = arith.constant 0 : i32
    return %arg0, %c0_i32, %c0_i32_0 : i32, i32, i32
  }
  func.func @transform_39(%arg0: i32) -> (i32, i32, i32) {
    %c0_i32 = arith.constant 0 : i32
    %c0_i32_0 = arith.constant 0 : i32
    %c0_i32_1 = arith.constant 0 : i32
    return %arg0, %c0_i32, %c0_i32_0 : i32, i32, i32
  }
}

</mosaic_0001>

<bundles_post_ra>
// kernel: cs_gcn_forward.1
= control target key start
LH: loop header
LB: loop body
LE: loop exit
PB: predicated region body
PF: predicated region fallthrough
CT: control target
= control target key end

     0   :  { %s3100_s6 = smov 1   ;;  %s3101_s10 = smov 2   ;;  %s3710_s0 = inlined_call_operand.smem [shape: u32[40], index: -1, kind: input, shape index: {}] }
   0x1   :  { %s3185_s5 = sld [smem:[%s3710_s0]]   ;;  %s3102_s14 = smov 3  }
   0x2   :  { %s3190_s9 = sld [smem:[%s3710_s0 + %s3100_s6]]   ;;  %s3103_s18 = smov 4  }
   0x3   :  { %s3195_s13 = sld [smem:[%s3710_s0 + %s3101_s10]]   ;;  %s3104_s22 = smov 5  }
   0x4   :  { %s3200_s17 = sld [smem:[%s3710_s0 + %s3102_s14]]   ;;  %s3105_s26 = smov 6  }
   0x5   :  { %s3205_s21 = sld [smem:[%s3710_s0 + %s3103_s18]]   ;;  %s3106_s30 = smov 7  }
   0x6   :  { %s3210_s25 = sld [smem:[%s3710_s0 + %s3104_s22]]   ;;  %s3107_s4 = smov 8  }
   0x7   :  { %3733 = sst [smem:[#allocation72_spill]] %s3185_s5  ;;  %s3108_s10 = smov 9  }
   0x8   :  { %3734 = sst [smem:[#allocation73_spill]] %s3190_s9  ;;  %s3109_s15 = smov 10  }
   0x9   :  { %3735 = sst [smem:[#allocation74_spill]] %s3195_s13  ;;  %s3110_s20 = smov 11  }
   0xa   :  { %3736 = sst [smem:[#allocation75_spill]] %s3200_s17  ;;  %s3112_s1 = smov 13  }
   0xb   :  { %s3215_s29 = sld [smem:[%s3710_s0 + %s3105_s26]]   ;;  %s3111_s26 = smov 12  }
   0xc   :  { %3737 = sst [smem:[#allocation76_spill]] %s3210_s25  ;;  %s3113_s7 = smov 14  }
   0xd   :  { %s3220_s3 = sld [smem:[%s3710_s0 + %s3106_s30]]   ;;  %s3115_s22 = smov 16  }
   0xe   :  { %s3225_s8 = sld [smem:[%s3710_s0 + %s3107_s4]]   ;;  %s3116_s28 = smov 17  }
   0xf   :  { %s3230_s14 = sld [smem:[%s3710_s0 + %s3108_s10]]  }
  0x10   :  { %s3235_s19 = sld [smem:[%s3710_s0 + %s3109_s15]]   ;;  %s3114_s15 = smov 15  }
  0x11   :  { %s3240_s24 = sld [smem:[%s3710_s0 + %s3110_s20]]  }
  0x12   :  { %s3245_s30 = sld [smem:[%s3710_s0 + %s3111_s26]]  }
  0x13   :  { %3738 = sst [smem:[#allocation77_spill]] %s3220_s3 }
  0x14   :  { %s3250_s6 = sld [smem:[%s3710_s0 + %s3112_s1]]  }
  0x15   :  { %3739 = sst [smem:[#allocation78_spill]] %s3230_s14 }
  0x16   :  { %s3255_s12 = sld [smem:[%s3710_s0 + %s3113_s7]]   ;;  %s3117_s7 = smov 18  }
  0x17   :  { %3740 = sst [smem:[#allocation79_spill]] %s3240_s24 }
  0x18   :  { %3741 = sst [smem:[#allocation80_spill]] %s3245_s30 }
  0x19   :  { %s3260_s20 = sld [smem:[%s3710_s0 + %s3114_s15]]   ;;  %s3118_s15 = smov 19  }
  0x1a   :  { %s3265_s27 = sld [smem:[%s3710_s0 + %s3115_s22]]   ;;  %s3119_s22 = smov 20  }
  0x1b   :  { %s3270_s4 = sld [smem:[%s3710_s0 + %s3116_s28]]   ;;  %s3120_s28 = smov 21  }
  0x1c   :  { %3742 = sst [smem:[#allocation81_spill]] %s3255_s12 }
  0x1d   :  { %s3275_s24 = sld [smem:[%s3710_s0 + %s3117_s7]]   ;;  %s3121_s7 = smov 22  }
  0x1e   :  { %s3280_s5 = sld [smem:[%s3710_s0 + %s3118_s15]]   ;;  %s3122_s15 = smov 23  }
  0x1f   :  { %s3285_s13 = sld [smem:[%s3710_s0 + %s3119_s22]]   ;;  %s3123_s22 = smov 24  }
  0x20   :  { %3743 = sst [smem:[#allocation82_spill]] %s3265_s27 }
  0x21   :  { %s3290_s9 = sld [smem:[%s3710_s0 + %s3120_s28]]   ;;  %s3124_s28 = smov 25  }
  0x22   :  { %s3300_s27 = sld [smem:[%s3710_s0 + %s3122_s15]]   ;;  %s3126_s15 = smov 27  }
  0x23   :  { %3744 = sst [smem:[#allocation83_spill]] %s3275_s24 }
  0x24   :  { %s3295_s24 = sld [smem:[%s3710_s0 + %s3121_s7]]   ;;  %s3125_s7 = smov 26  }
  0x25   :  { %3745 = sst [smem:[#allocation84_spill]] %s3285_s13 }
  0x26   :  { %s3305_s13 = sld [smem:[%s3710_s0 + %s3123_s22]]   ;;  %s3127_s22 = smov 28  }
  0x27   :  { %s3310_s12 = sld [smem:[%s3710_s0 + %s3124_s28]]   ;;  %s3128_s28 = smov 29  }
  0x28   :  { %s3320_s30 = sld [smem:[%s3710_s0 + %s3126_s15]]   ;;  %s3130_s15 = smov 31  }
  0x29   :  { %s3330_s14 = sld [smem:[%s3710_s0 + %s3128_s28]]   ;;  %s3132_s28 = smov 33  }
  0x2a   :  { %3746 = sst [smem:[#allocation85_spill]] %s3295_s24 }
  0x2b   :  { %s3315_s24 = sld [smem:[%s3710_s0 + %s3125_s7]]   ;;  %s3129_s7 = smov 30  }
  0x2c   :  { %3747 = sst [smem:[#allocation86_spill]] %s3305_s13 }
  0x2d   :  { %s3325_s13 = sld [smem:[%s3710_s0 + %s3127_s22]]   ;;  %s3131_s22 = smov 32  }
  0x2e   :  { %s3340_s3 = sld [smem:[%s3710_s0 + %s3130_s15]]   ;;  %s3134_s15 = smov 35  }
  0x2f   :  { %s3350_s25 = sld [smem:[%s3710_s0 + %s3132_s28]]   ;;  %s3136_s28 = smov 37  }
  0x30   :  { %s3360_s17 = sld [smem:[%s3710_s0 + %s3134_s15]]   ;;  %s3138_s15 = smov 39  }
  0x31   :  { %3748 = sst [smem:[#allocation87_spill]] %s3315_s24 }
  0x32   :  { %s3335_s24 = sld [smem:[%s3710_s0 + %s3129_s7]]   ;;  %s3133_s7 = smov 34  }
  0x33   :  { %3749 = sst [smem:[#allocation88_spill]] %s3325_s13 }
  0x34   :  { %s3345_s13 = sld [smem:[%s3710_s0 + %s3131_s22]]   ;;  %s3135_s22 = smov 36  }
  0x35   :  { %3752 = sst [smem:[#allocation91_spill]] %s3350_s25 }
  0x36   :  { %3754 = sst [smem:[#allocation93_spill]] %s3360_s17 }
  0x37   :  { %s3370_s25 = sld [smem:[%s3710_s0 + %s3136_s28]]  }
  0x38   :  { %3750 = sst [smem:[#allocation89_spill]] %s3335_s24 }
  0x39   :  { %s3355_s24 = sld [smem:[%s3710_s0 + %s3133_s7]]   ;;  %s3137_s7 = smov 38  }
  0x3a   :  { %3751 = sst [smem:[#allocation90_spill]] %s3345_s13 }
  0x3b   :  { %s3365_s13 = sld [smem:[%s3710_s0 + %s3135_s22]]  }
  0x3c   :  { %s3380_s17 = sld [smem:[%s3710_s0 + %s3138_s15]]  }
  0x3f   :  { %3753 = sst [smem:[#allocation92_spill]] %s3355_s24 }
  0x40   :  { %s3375_s24 = sld [smem:[%s3710_s0 + %s3137_s7]]  }
  0x41   :  { %85 = vsyncpa [#allocation3], 0 }
  0x42   :  { %86 = vsyncpa [#allocation5], 0 }
  0x43   :  { %87 = vsyncpa [#allocation8], 0 }
  0x44   :  { %88 = vsyncpa [#allocation11], 0 }
  0x45   :  { %89 = vsyncpa [#allocation14], 0 }
  0x46   :  { %90 = vsyncpa [#allocation17], 0 }
  0x47   :  { %91 = vsyncpa [#allocation20], 0 }
  0x48   :  { %92 = vsyncpa [#allocation23], 0 }
  0x49   :  { %93 = vsyncpa [#allocation26], 0 }
  0x4a   :  { %94 = vsyncpa [#allocation29], 0 }
  0x4b   :  { %95 = vsyncpa [#allocation32], 0 }
  0x4c   :  { %96 = vsyncpa [#allocation35], 0 }
  0x4d   :  { %97 = vsyncpa [#allocation38], 0 }
  0x4e   :  { %98 = vsyncpa [#allocation41], 0 }
  0x4f   :  { %99 = vsyncpa [#allocation44], 0 }
  0x50   :  { %100 = vsyncpa [#allocation47], 0 }
  0x51   :  { %101 = vsyncpa [#allocation50], 0  ;;  %s125_s0 = sshll.u32 %s3205_s21, 4  ;;  %s126_s0 = int_to_ptr.hbm [resolvable:$true] %s125_s0 }
  0x52   :  { %102 = vsyncpa [#allocation53], 0  ;;  %s3139_s22 = smov [#allocation4]   ;;  %s147_s26 = sshll.u32 %s3215_s29, 4  ;;  %s148_s26 = int_to_ptr.hbm [resolvable:$true] %s147_s26 }
  0x53   :  { %s127_s23 = sshll.u32 %s3139_s22, 4  ;;  %s2248_s28 = sshra.s32 %s126_s0, 4  ;;  %s128_s23 = int_to_ptr.vmem [resolvable:$true] %s127_s23  ;;  %s2249_s28 = int_to_ptr.hbm [resolvable:$true] %s2248_s28 }
  0x54   :  { %s2250_s1 = scalar_lea.hbm %s2249_s28, 16  ;;  %s2252_s2 = scalar_lea.hbm %s3205_s21, 16 }
  0x55   :  { %p2251_p0 = scmp.ne.s32.totalorder %s2249_s28, %s2250_s1  ;;  %p2253_p1 = scmp.lt.s32.totalorder %s2249_s28, %s3205_s21 }
  0x56   :  { %p2254_p2 = scmp.lt.s32.totalorder %s2252_s2, %s2250_s1 }
  0x58   :  { %p2255_p3 = por %p2254_p2, %p2253_p1 }
  0x5a   :  { %p2256_p4 = pnand %p2255_p3, %p2251_p0 }
  0x5c   :  { %2259 = shalt.err (!%p2256_p4)
}
  0x5d   :  { %130 = dma.hbm_to_vmem [thread:$0]  %s126_s0, 256, %s128_s23, [#allocation5]  }
  0x5e   :  { %s3140_s7 = smov [#allocation7]   ;;  %s169_s11 = sshll.u32 %s3225_s8, 4  ;;  %s170_s11 = int_to_ptr.hbm [resolvable:$true] %s169_s11 }
  0x5f   :  { %s149_s10 = sshll.u32 %s3140_s7, 4  ;;  %s2272_s15 = sshra.s32 %s148_s26, 4  ;;  %s150_s10 = int_to_ptr.vmem [resolvable:$true] %s149_s10  ;;  %s2273_s15 = int_to_ptr.hbm [resolvable:$true] %s2272_s15 }
  0x60   :  { %s2274_s16 = scalar_lea.hbm %s2273_s15, 1  ;;  %s2276_s18 = scalar_lea.hbm %s3215_s29, 1 }
  0x61   :  { %p2275_p5 = scmp.ne.s32.totalorder %s2273_s15, %s2274_s16  ;;  %p2277_p6 = scmp.lt.s32.totalorder %s2273_s15, %s3215_s29 }
  0x62   :  { %p2278_p7 = scmp.lt.s32.totalorder %s2276_s18, %s2274_s16 }
  0x64   :  { %p2279_p8 = por %p2278_p7, %p2277_p6 }
  0x66   :  { %p2280_p9 = pnand %p2279_p8, %p2275_p5 }
  0x68   :  { %2283 = shalt.err (!%p2280_p9)
}
  0x69   :  { %152 = dma.hbm_to_vmem [thread:$0]  %s148_s26, 16, %s150_s10, [#allocation8]  }
  0x6a   :  { %s191_s21 = sshll.u32 %s3235_s19, 4  ;;  %s3141_s0 = smov [#allocation10]   ;;  %s192_s21 = int_to_ptr.hbm [resolvable:$true] %s191_s21 }
  0x6b   :  { %s171_s22 = sshll.u32 %s3141_s0, 4  ;;  %s2296_s23 = sshra.s32 %s170_s11, 4  ;;  %s172_s22 = int_to_ptr.vmem [resolvable:$true] %s171_s22  ;;  %s2297_s23 = int_to_ptr.hbm [resolvable:$true] %s2296_s23 }
  0x6c   :  { %s2298_s28 = scalar_lea.hbm %s2297_s23, 1  ;;  %s2300_s1 = scalar_lea.hbm %s3225_s8, 1 }
  0x6d   :  { %p2299_p10 = scmp.ne.s32.totalorder %s2297_s23, %s2298_s28  ;;  %p2301_p11 = scmp.lt.s32.totalorder %s2297_s23, %s3225_s8 }
  0x6e   :  { %p2302_p12 = scmp.lt.s32.totalorder %s2300_s1, %s2298_s28 }
  0x70   :  { %p2303_p13 = por %p2302_p12, %p2301_p11 }
  0x72   :  { %p2304_p0 = pnand %p2303_p13, %p2299_p10 }
  0x74   :  { %2307 = shalt.err (!%p2304_p0)
}
  0x75   :  { %174 = dma.hbm_to_vmem [thread:$0]  %s170_s11, 16, %s172_s22, [#allocation11]  }
  0x76   :  { %s3142_s29 = smov [#allocation13]   ;;  %s217_s2 = sshll.u32 %s3250_s6, 4  ;;  %s218_s2 = int_to_ptr.hbm [resolvable:$true] %s217_s2 }
  0x77   :  { %s193_s26 = sshll.u32 %s3142_s29, 4  ;;  %s2320_s7 = sshra.s32 %s192_s21, 4  ;;  %s194_s26 = int_to_ptr.vmem [resolvable:$true] %s193_s26  ;;  %s2321_s7 = int_to_ptr.hbm [resolvable:$true] %s2320_s7 }
  0x78   :  { %s2322_s10 = scalar_lea.hbm %s2321_s7, 1  ;;  %s2324_s15 = scalar_lea.hbm %s3235_s19, 1 }
  0x79   :  { %p2323_p1 = scmp.ne.s32.totalorder %s2321_s7, %s2322_s10  ;;  %p2325_p2 = scmp.lt.s32.totalorder %s2321_s7, %s3235_s19 }
  0x7a   :  { %p2326_p3 = scmp.lt.s32.totalorder %s2324_s15, %s2322_s10 }
  0x7c   :  { %p2327_p4 = por %p2326_p3, %p2325_p2 }
  0x7e   :  { %p2328_p5 = pnand %p2327_p4, %p2323_p1 }
  0x80   :  { %2331 = shalt.err (!%p2328_p5)
}
  0x81   :  { %196 = dma.hbm_to_vmem [thread:$0]  %s192_s21, 16, %s194_s26, [#allocation14]  }
  0x82   :  { %s239_s8 = sshll.u32 %s3260_s20, 4  ;;  %s3143_s11 = smov [#allocation16]   ;;  %s240_s8 = int_to_ptr.hbm [resolvable:$true] %s239_s8 }
  0x83   :  { %s219_s16 = sshll.u32 %s3143_s11, 4  ;;  %s2344_s18 = sshra.s32 %s218_s2, 4  ;;  %s220_s16 = int_to_ptr.vmem [resolvable:$true] %s219_s16  ;;  %s2345_s18 = int_to_ptr.hbm [resolvable:$true] %s2344_s18 }
  0x84   :  { %s2346_s0 = scalar_lea.hbm %s2345_s18, 1  ;;  %s2348_s22 = scalar_lea.hbm %s3250_s6, 1 }
  0x85   :  { %p2347_p6 = scmp.ne.s32.totalorder %s2345_s18, %s2346_s0  ;;  %p2349_p7 = scmp.lt.s32.totalorder %s2345_s18, %s3250_s6 }
  0x86   :  { %p2350_p8 = scmp.lt.s32.totalorder %s2348_s22, %s2346_s0 }
  0x88   :  { %p2351_p9 = por %p2350_p8, %p2349_p7 }
  0x8a   :  { %p2352_p10 = pnand %p2351_p9, %p2347_p6 }
  0x8c   :  { %2355 = shalt.err (!%p2352_p10)
}
  0x8d   :  { %222 = dma.hbm_to_vmem [thread:$0]  %s218_s2, 16, %s220_s16, [#allocation17]  }
  0x8e   :  { %s3144_s19 = smov [#allocation19]   ;;  %s2368_s23 = sshra.s32 %s240_s8, 4  ;;  %s2369_s23 = int_to_ptr.hbm [resolvable:$true] %s2368_s23 }
  0x8f   :  { %s241_s21 = sshll.u32 %s3144_s19, 4  ;;  %s2370_s28 = scalar_lea.hbm %s2369_s23, 1  ;;  %s242_s21 = int_to_ptr.vmem [resolvable:$true] %s241_s21 }
  0x90   :  { %p2371_p11 = scmp.ne.s32.totalorder %s2369_s23, %s2370_s28  ;;  %s2372_s1 = scalar_lea.hbm %s3260_s20, 1 }
  0x91   :  { %p2373_p12 = scmp.lt.s32.totalorder %s2369_s23, %s3260_s20  ;;  %p2374_p13 = scmp.lt.s32.totalorder %s2372_s1, %s2370_s28 }
  0x93   :  { %p2375_p0 = por %p2374_p13, %p2373_p12 }
  0x95   :  { %p2376_p1 = pnand %p2375_p0, %p2371_p11 }
  0x97   :  { %2379 = shalt.err (!%p2376_p1)
}
  0x98   :  { %244 = dma.hbm_to_vmem [thread:$0]  %s240_s8, 16, %s242_s21, [#allocation20]  }
  0x99   :  { %s262_s6 = sshll.u32 %s3270_s4, 4  ;;  %s3145_s29 = smov [#allocation22]   ;;  %s263_s6 = int_to_ptr.hbm [resolvable:$true] %s262_s6 }
  0x9a   :  { %s264_s26 = sshll.u32 %s3145_s29, 4  ;;  %s289_s2 = sshll.u32 %s3280_s5, 4  ;;  %s265_s26 = int_to_ptr.vmem [resolvable:$true] %s264_s26  ;;  %s290_s2 = int_to_ptr.hbm [resolvable:$true] %s289_s2 }
  0x9b   :  { %s2392_s7 = sshra.s32 %s263_s6, 4  ;;  %s2396_s20 = scalar_lea.hbm %s3270_s4, 128  ;;  %s2393_s7 = int_to_ptr.hbm [resolvable:$true] %s2392_s7 }
  0x9c   :  { %s2394_s10 = scalar_lea.hbm %s2393_s7, 128  ;;  %p2397_p3 = scmp.lt.s32.totalorder %s2393_s7, %s3270_s4 }
  0x9d   :  { %p2395_p2 = scmp.ne.s32.totalorder %s2393_s7, %s2394_s10  ;;  %p2398_p4 = scmp.lt.s32.totalorder %s2396_s20, %s2394_s10 }
  0x9f   :  { %p2399_p5 = por %p2398_p4, %p2397_p3 }
  0xa1   :  { %p2400_p6 = pnand %p2399_p5, %p2395_p2 }
  0xa3   :  { %2403 = shalt.err (!%p2400_p6)
}
  0xa4   :  { %s3146_s15 = smov 128   ;;  %s3147_s8 = smov 8  }
  0xa5   :  { %270 = dma.hbm_to_vmem [thread:$0]  %s263_s6, 2048, %s265_s26, [#allocation23], %s3146_s15, %s3146_s15, %s3147_s8  }
  0xa6   :  { %s3148_s11 = smov [#allocation25]   ;;  %s311_s18 = sshll.u32 %s3290_s9, 4  ;;  %s312_s18 = int_to_ptr.hbm [resolvable:$true] %s311_s18 }
  0xa7   :  { %s291_s16 = sshll.u32 %s3148_s11, 4  ;;  %s2416_s4 = sshra.s32 %s290_s2, 4  ;;  %s292_s16 = int_to_ptr.vmem [resolvable:$true] %s291_s16  ;;  %s2417_s4 = int_to_ptr.hbm [resolvable:$true] %s2416_s4 }
  0xa8   :  { %s2418_s0 = scalar_lea.hbm %s2417_s4, 1  ;;  %s2420_s22 = scalar_lea.hbm %s3280_s5, 1 }
  0xa9   :  { %p2419_p7 = scmp.ne.s32.totalorder %s2417_s4, %s2418_s0  ;;  %p2421_p8 = scmp.lt.s32.totalorder %s2417_s4, %s3280_s5 }
  0xaa   :  { %p2422_p9 = scmp.lt.s32.totalorder %s2420_s22, %s2418_s0 }
  0xac   :  { %p2423_p10 = por %p2422_p9, %p2421_p8 }
  0xae   :  { %p2424_p11 = pnand %p2423_p10, %p2419_p7 }
  0xb0   :  { %2427 = shalt.err (!%p2424_p11)
}
  0xb1   :  { %294 = dma.hbm_to_vmem [thread:$0]  %s290_s2, 16, %s292_s16, [#allocation26]  }
  0xb2   :  { %s333_s19 = sshll.u32 %s3300_s27, 4  ;;  %s3149_s21 = smov [#allocation28]   ;;  %s334_s19 = int_to_ptr.hbm [resolvable:$true] %s333_s19 }
  0xb3   :  { %s313_s23 = sshll.u32 %s3149_s21, 4  ;;  %s2440_s28 = sshra.s32 %s312_s18, 4  ;;  %s314_s23 = int_to_ptr.vmem [resolvable:$true] %s313_s23  ;;  %s2441_s28 = int_to_ptr.hbm [resolvable:$true] %s2440_s28 }
  0xb4   :  { %s2442_s1 = scalar_lea.hbm %s2441_s28, 1  ;;  %s2444_s6 = scalar_lea.hbm %s3290_s9, 1 }
  0xb5   :  { %p2443_p12 = scmp.ne.s32.totalorder %s2441_s28, %s2442_s1  ;;  %p2445_p13 = scmp.lt.s32.totalorder %s2441_s28, %s3290_s9 }
  0xb6   :  { %p2446_p0 = scmp.lt.s32.totalorder %s2444_s6, %s2442_s1 }
  0xb8   :  { %p2447_p1 = por %p2446_p0, %p2445_p13 }
  0xba   :  { %p2448_p2 = pnand %p2447_p1, %p2443_p12 }
  0xbc   :  { %2451 = shalt.err (!%p2448_p2)
}
  0xbd   :  { %316 = dma.hbm_to_vmem [thread:$0]  %s312_s18, 16, %s314_s23, [#allocation29]  }
  0xbe   :  { %s3150_s5 = smov [#allocation31]   ;;  %s354_s26 = sshll.u32 %s3310_s12, 4  ;;  %s3414_s26 = int_to_ptr.hbm [resolvable:$true] %s354_s26 }
  0xbf   :  { %s335_s29 = sshll.u32 %s3150_s5, 4  ;;  %s2464_s2 = sshra.s32 %s334_s19, 4  ;;  %s336_s29 = int_to_ptr.vmem [resolvable:$true] %s335_s29  ;;  %s2465_s2 = int_to_ptr.hbm [resolvable:$true] %s2464_s2 }
  0xc0   :  { %s2466_s7 = scalar_lea.hbm %s2465_s2, 1  ;;  %s2468_s10 = scalar_lea.hbm %s3300_s27, 1 }
  0xc1   :  { %p2467_p3 = scmp.ne.s32.totalorder %s2465_s2, %s2466_s7  ;;  %p2469_p4 = scmp.lt.s32.totalorder %s2465_s2, %s3300_s27 }
  0xc2   :  { %p2470_p5 = scmp.lt.s32.totalorder %s2468_s10, %s2466_s7 }
  0xc4   :  { %p2471_p6 = por %p2470_p5, %p2469_p4 }
  0xc6   :  { %p2472_p7 = pnand %p2471_p6, %p2467_p3 }
  0xc8   :  { %2475 = shalt.err (!%p2472_p7)
}
  0xc9   :  { %338 = dma.hbm_to_vmem [thread:$0]  %s334_s19, 16, %s336_s29, [#allocation32]  }
  0xca   :  { %s381_s9 = sshll.u32 %s3320_s30, 4  ;;  %s3151_s20 = smov [#allocation34]   ;;  %s382_s9 = int_to_ptr.hbm [resolvable:$true] %s381_s9 }
  0xcb   :  { %s356_s11 = sshll.u32 %s3151_s20, 4  ;;  %s2488_s16 = sshra.s32 %s3414_s26, 4  ;;  %s357_s11 = int_to_ptr.vmem [resolvable:$true] %s356_s11  ;;  %s2489_s16 = int_to_ptr.hbm [resolvable:$true] %s2488_s16 }
  0xcc   :  { %s2490_s18 = scalar_lea.hbm %s2489_s16, 128  ;;  %s2492_s4 = scalar_lea.hbm %s3310_s12, 128 }
  0xcd   :  { %p2491_p8 = scmp.ne.s32.totalorder %s2489_s16, %s2490_s18  ;;  %p2493_p9 = scmp.lt.s32.totalorder %s2489_s16, %s3310_s12 }
  0xce   :  { %p2494_p10 = scmp.lt.s32.totalorder %s2492_s4, %s2490_s18 }
  0xd0   :  { %p2495_p11 = por %p2494_p10, %p2493_p9 }
  0xd2   :  { %p2496_p12 = pnand %p2495_p11, %p2491_p8 }
  0xd4   :  { %2499 = shalt.err (!%p2496_p12)
}
  0xd5   :  { %362 = dma.hbm_to_vmem [thread:$0]  %s3414_s26, 2048, %s357_s11, [#allocation35], %s3146_s15, %s3146_s15, %s3147_s8  }
  0xd6   :  { %s3152_s27 = smov [#allocation37]   ;;  %s403_s22 = sshll.u32 %s3330_s14, 4  ;;  %s404_s22 = int_to_ptr.hbm [resolvable:$true] %s403_s22 }
  0xd7   :  { %s383_s0 = sshll.u32 %s3152_s27, 4  ;;  %s2512_s19 = sshra.s32 %s382_s9, 4  ;;  %s384_s0 = int_to_ptr.vmem [resolvable:$true] %s383_s0  ;;  %s2513_s19 = int_to_ptr.hbm [resolvable:$true] %s2512_s19 }
  0xd8   :  { %s2514_s12 = scalar_lea.hbm %s2513_s19, 1  ;;  %s2516_s21 = scalar_lea.hbm %s3320_s30, 1 }
  0xd9   :  { %p2515_p13 = scmp.ne.s32.totalorder %s2513_s19, %s2514_s12  ;;  %p2517_p0 = scmp.lt.s32.totalorder %s2513_s19, %s3320_s30 }
  0xda   :  { %p2518_p1 = scmp.lt.s32.totalorder %s2516_s21, %s2514_s12 }
  0xdc   :  { %p2519_p2 = por %p2518_p1, %p2517_p0 }
  0xde   :  { %p2520_p3 = pnand %p2519_p2, %p2515_p13 }
  0xe0   :  { %2523 = shalt.err (!%p2520_p3)
}
  0xe1   :  { %386 = dma.hbm_to_vmem [thread:$0]  %s382_s9, 16, %s384_s0, [#allocation38]  }
  0xe2   :  { %s426_s23 = sshll.u32 %s3340_s3, 4  ;;  %s3153_s28 = smov [#allocation40]   ;;  %s3430_s23 = int_to_ptr.hbm [resolvable:$true] %s426_s23 }
  0xe3   :  { %s405_s1 = sshll.u32 %s3153_s28, 4  ;;  %s2536_s6 = sshra.s32 %s404_s22, 4  ;;  %s406_s1 = int_to_ptr.vmem [resolvable:$true] %s405_s1  ;;  %s2537_s6 = int_to_ptr.hbm [resolvable:$true] %s2536_s6 }
  0xe4   :  { %s2538_s5 = scalar_lea.hbm %s2537_s6, 1  ;;  %s2540_s29 = scalar_lea.hbm %s3330_s14, 1 }
  0xe5   :  { %p2539_p4 = scmp.ne.s32.totalorder %s2537_s6, %s2538_s5  ;;  %p2541_p5 = scmp.lt.s32.totalorder %s2537_s6, %s3330_s14 }
  0xe6   :  { %p2542_p6 = scmp.lt.s32.totalorder %s2540_s29, %s2538_s5 }
  0xe8   :  { %p2543_p7 = por %p2542_p6, %p2541_p5 }
  0xea   :  { %p2544_p8 = pnand %p2543_p7, %p2539_p4 }
  0xec   :  { %2547 = shalt.err (!%p2544_p8)
}
  0xed   :  { %408 = dma.hbm_to_vmem [thread:$0]  %s404_s22, 16, %s406_s1, [#allocation41]  }
  0xee   :  { %s3755_s30 = sld [smem:[#allocation91_spill]]  ;;  %s3154_s26 = smov [#allocation43]  }
  0xef   :  { %s428_s2 = sshll.u32 %s3154_s26, 4  ;;  %s2560_s10 = sshra.s32 %s3430_s23, 4  ;;  %s429_s2 = int_to_ptr.vmem [resolvable:$true] %s428_s2  ;;  %s2561_s10 = int_to_ptr.hbm [resolvable:$true] %s2560_s10 }
  0xf0   :  { %s2562_s9 = scalar_lea.hbm %s2561_s10, 128  ;;  %s2564_s20 = scalar_lea.hbm %s3340_s3, 128 }
  0xf1   :  { %p2563_p9 = scmp.ne.s32.totalorder %s2561_s10, %s2562_s9  ;;  %p2565_p10 = scmp.lt.s32.totalorder %s2561_s10, %s3340_s3 }
  0xf2   :  { %p2566_p11 = scmp.lt.s32.totalorder %s2564_s20, %s2562_s9 }
  0xf4   :  { %s453_s7 = sshll.u32 %s3755_s30, 4  ;;  %p2567_p12 = por %p2566_p11, %p2565_p10  ;;  %s454_s7 = int_to_ptr.hbm [resolvable:$true] %s453_s7 }
  0xf6   :  { %p2568_p13 = pnand %p2567_p12, %p2563_p9 }
  0xf8   :  { %2571 = shalt.err (!%p2568_p13)
}
  0xf9   :  { %s3756_s14 = sld [smem:[#allocation93_spill]]  ;;  %s3155_s16 = smov [#allocation46]  }
  0xfa   :  { %434 = dma.hbm_to_vmem [thread:$0]  %s3430_s23, 2048, %s429_s2, [#allocation44], %s3146_s15, %s3146_s15, %s3147_s8  }
  0xfb   :  { %s455_s18 = sshll.u32 %s3155_s16, 4  ;;  %s2584_s4 = sshra.s32 %s454_s7, 4  ;;  %s456_s18 = int_to_ptr.vmem [resolvable:$true] %s455_s18  ;;  %s2585_s4 = int_to_ptr.hbm [resolvable:$true] %s2584_s4 }
  0xfc   :  { %s2586_s3 = scalar_lea.hbm %s2585_s4, 1  ;;  %s2588_s27 = scalar_lea.hbm %s3755_s30, 1 }
  0xfd   :  { %p2587_p0 = scmp.ne.s32.totalorder %s2585_s4, %s2586_s3  ;;  %p2589_p1 = scmp.lt.s32.totalorder %s2585_s4, %s3755_s30 }
  0xfe   :  { %p2590_p2 = scmp.lt.s32.totalorder %s2588_s27, %s2586_s3 }
  0xff   :  { %s474_s11 = sshll.u32 %s3756_s14, 4  ;;  %s3443_s11 = int_to_ptr.hbm [resolvable:$true] %s474_s11 }
 0x100   :  { %p2591_p3 = por %p2590_p2, %p2589_p1 }
 0x102   :  { %p2592_p4 = pnand %p2591_p3, %p2587_p0 }
 0x104   :  { %2595 = shalt.err (!%p2592_p4)
}
 0x105   :  { %458 = dma.hbm_to_vmem [thread:$0]  %s454_s7, 16, %s456_s18, [#allocation47]  }
 0x106   :  { %s3757_s0 = sld [smem:[#allocation75_spill]]  ;;  %s3156_s22 = smov [#allocation49]  }
 0x107   :  { %s476_s19 = sshll.u32 %s3156_s22, 4  ;;  %s2608_s21 = sshra.s32 %s3443_s11, 4  ;;  %s477_s19 = int_to_ptr.vmem [resolvable:$true] %s476_s19  ;;  %s2609_s21 = int_to_ptr.hbm [resolvable:$true] %s2608_s21 }
 0x108   :  { %s2610_s23 = scalar_lea.hbm %s2609_s21, 128  ;;  %s2612_s28 = scalar_lea.hbm %s3756_s14, 128 }
 0x109   :  { %p2611_p5 = scmp.ne.s32.totalorder %s2609_s21, %s2610_s23  ;;  %p2613_p6 = scmp.lt.s32.totalorder %s2609_s21, %s3756_s14 }
 0x10a   :  { %p2614_p7 = scmp.lt.s32.totalorder %s2612_s28, %s2610_s23 }
 0x10c   :  { %s114_s12 = sshll.u32 %s3757_s0, 4  ;;  %p2615_p8 = por %p2614_p7, %p2613_p6  ;;  %s115_s12 = int_to_ptr.hbm [resolvable:$true] %s114_s12 }
 0x10e   :  { %p2616_p9 = pnand %p2615_p8, %p2611_p5 }
 0x110   :  { %2619 = shalt.err (!%p2616_p9)
}
 0x111   :  { %s3758_s1 = sld [smem:[#allocation76_spill]]  ;;  %s3157_s5 = smov [#allocation2]  }
 0x112   :  { %482 = dma.hbm_to_vmem [thread:$0]  %s3443_s11, 2048, %s477_s19, [#allocation50], %s3146_s15, %s3146_s15, %s3147_s8  }
 0x113   :  { %s116_s29 = sshll.u32 %s3157_s5, 4  ;;  %s2632_s30 = sshra.s32 %s115_s12, 4  ;;  %s117_s29 = int_to_ptr.vmem [resolvable:$true] %s116_s29  ;;  %s2633_s30 = int_to_ptr.hbm [resolvable:$true] %s2632_s30 }
 0x114   :  { %s2634_s26 = scalar_lea.hbm %s2633_s30, 16  ;;  %s2636_s2 = scalar_lea.hbm %s3757_s0, 16 }
 0x115   :  { %p2635_p10 = scmp.ne.s32.totalorder %s2633_s30, %s2634_s26  ;;  %p2637_p11 = scmp.lt.s32.totalorder %s2633_s30, %s3757_s0 }
 0x116   :  { %p2638_p12 = scmp.lt.s32.totalorder %s2636_s2, %s2634_s26 }
 0x117   :  { %s136_s6 = sshll.u32 %s3758_s1, 4  ;;  %s137_s6 = int_to_ptr.hbm [resolvable:$true] %s136_s6 }
 0x118   :  { %p2639_p13 = por %p2638_p12, %p2637_p11 }
 0x11a   :  { %p2640_p0 = pnand %p2639_p13, %p2635_p10 }
 0x11c   :  { %2643 = shalt.err (!%p2640_p0)
}
 0x11d   :  { %119 = dma.hbm_to_vmem [thread:$0]  %s115_s12, 256, %s117_s29, [#allocation3]  }
 0x11e   :  { %s3759_s7 = sld [smem:[#allocation77_spill]]  ;;  %s3158_s10 = smov [#allocation6]  }
 0x11f   :  { %s138_s9 = sshll.u32 %s3158_s10, 4  ;;  %s2656_s14 = sshra.s32 %s137_s6, 4  ;;  %s139_s9 = int_to_ptr.vmem [resolvable:$true] %s138_s9  ;;  %s2657_s14 = int_to_ptr.hbm [resolvable:$true] %s2656_s14 }
 0x120   :  { %s2658_s11 = scalar_lea.hbm %s2657_s14, 1  ;;  %s2660_s16 = scalar_lea.hbm %s3758_s1, 1 }
 0x121   :  { %p2659_p1 = scmp.ne.s32.totalorder %s2657_s14, %s2658_s11  ;;  %p2661_p2 = scmp.lt.s32.totalorder %s2657_s14, %s3758_s1 }
 0x122   :  { %p2662_p3 = scmp.lt.s32.totalorder %s2660_s16, %s2658_s11 }
 0x124   :  { %s158_s20 = sshll.u32 %s3759_s7, 4  ;;  %p2663_p4 = por %p2662_p3, %p2661_p2  ;;  %s159_s20 = int_to_ptr.hbm [resolvable:$true] %s158_s20 }
 0x126   :  { %p2664_p5 = pnand %p2663_p4, %p2659_p1 }
 0x128   :  { %2667 = shalt.err (!%p2664_p5)
}
 0x129   :  { %141 = dma.hbm_to_vmem [thread:$0]  %s137_s6, 16, %s139_s9, [#allocation5]  }
 0x12a   :  { %s3760_s18 = sld [smem:[#allocation78_spill]]  ;;  %s3159_s3 = smov [#allocation9]  }
 0x12b   :  { %s160_s27 = sshll.u32 %s3159_s3, 4  ;;  %s2680_s0 = sshra.s32 %s159_s20, 4  ;;  %s161_s27 = int_to_ptr.vmem [resolvable:$true] %s160_s27  ;;  %s2681_s0 = int_to_ptr.hbm [resolvable:$true] %s2680_s0 }
 0x12c   :  { %s2682_s22 = scalar_lea.hbm %s2681_s0, 1  ;;  %s2684_s19 = scalar_lea.hbm %s3759_s7, 1 }
 0x12d   :  { %p2683_p6 = scmp.ne.s32.totalorder %s2681_s0, %s2682_s22  ;;  %p2685_p7 = scmp.lt.s32.totalorder %s2681_s0, %s3759_s7 }
 0x12e   :  { %p2686_p8 = scmp.lt.s32.totalorder %s2684_s19, %s2682_s22 }
 0x130   :  { %s180_s4 = sshll.u32 %s3760_s18, 4  ;;  %p2687_p9 = por %p2686_p8, %p2685_p7  ;;  %s181_s4 = int_to_ptr.hbm [resolvable:$true] %s180_s4 }
 0x132   :  { %p2688_p10 = pnand %p2687_p9, %p2683_p6 }
 0x134   :  { %2691 = shalt.err (!%p2688_p10)
}
 0x135   :  { %163 = dma.hbm_to_vmem [thread:$0]  %s159_s20, 16, %s161_s27, [#allocation8]  }
 0x136   :  { %s3761_s12 = sld [smem:[#allocation80_spill]]  ;;  %s3160_s21 = smov [#allocation12]  }
 0x137   :  { %s182_s23 = sshll.u32 %s3160_s21, 4  ;;  %s2704_s1 = sshra.s32 %s181_s4, 4  ;;  %s183_s23 = int_to_ptr.vmem [resolvable:$true] %s182_s23  ;;  %s2705_s1 = int_to_ptr.hbm [resolvable:$true] %s2704_s1 }
 0x138   :  { %s2706_s6 = scalar_lea.hbm %s2705_s1, 1  ;;  %s2708_s5 = scalar_lea.hbm %s3760_s18, 1 }
 0x139   :  { %p2707_p11 = scmp.ne.s32.totalorder %s2705_s1, %s2706_s6  ;;  %p2709_p12 = scmp.lt.s32.totalorder %s2705_s1, %s3760_s18 }
 0x13a   :  { %p2710_p13 = scmp.lt.s32.totalorder %s2708_s5, %s2706_s6 }
 0x13c   :  { %s203_s28 = sshll.u32 %s3761_s12, 4  ;;  %p2711_p0 = por %p2710_p13, %p2709_p12  ;;  %s3465_s28 = int_to_ptr.hbm [resolvable:$true] %s203_s28 }
 0x13e   :  { %p2712_p1 = pnand %p2711_p0, %p2707_p11 }
 0x140   :  { %2715 = shalt.err (!%p2712_p1)
}
 0x141   :  { %185 = dma.hbm_to_vmem [thread:$0]  %s181_s4, 16, %s183_s23, [#allocation11]  }
 0x142   :  { %s3762_s29 = sld [smem:[#allocation81_spill]]  ;;  %s3161_s26 = smov [#allocation15]  }
 0x143   :  { %s205_s2 = sshll.u32 %s3161_s26, 4  ;;  %s2728_s7 = sshra.s32 %s3465_s28, 4  ;;  %s206_s2 = int_to_ptr.vmem [resolvable:$true] %s205_s2  ;;  %s2729_s7 = int_to_ptr.hbm [resolvable:$true] %s2728_s7 }
 0x144   :  { %s2730_s10 = scalar_lea.hbm %s2729_s7, 128  ;;  %s2732_s9 = scalar_lea.hbm %s3761_s12, 128 }
 0x145   :  { %p2731_p2 = scmp.ne.s32.totalorder %s2729_s7, %s2730_s10  ;;  %p2733_p3 = scmp.lt.s32.totalorder %s2729_s7, %s3761_s12 }
 0x146   :  { %p2734_p4 = scmp.lt.s32.totalorder %s2732_s9, %s2730_s10 }
 0x148   :  { %s228_s30 = sshll.u32 %s3762_s29, 4  ;;  %p2735_p5 = por %p2734_p4, %p2733_p3  ;;  %s229_s30 = int_to_ptr.hbm [resolvable:$true] %s228_s30 }
 0x14a   :  { %p2736_p6 = pnand %p2735_p5, %p2731_p2 }
 0x14c   :  { %2739 = shalt.err (!%p2736_p6)
}
 0x14d   :  { %s3763_s20 = sld [smem:[#allocation82_spill]]  ;;  %s3162_s14 = smov [#allocation18]  }
 0x14e   :  { %211 = dma.hbm_to_vmem [thread:$0]  %s3465_s28, 2048, %s206_s2, [#allocation14], %s3146_s15, %s3146_s15, %s3147_s8  }
 0x14f   :  { %s230_s11 = sshll.u32 %s3162_s14, 4  ;;  %s2752_s18 = sshra.s32 %s229_s30, 4  ;;  %s231_s11 = int_to_ptr.vmem [resolvable:$true] %s230_s11  ;;  %s2753_s18 = int_to_ptr.hbm [resolvable:$true] %s2752_s18 }
 0x150   :  { %s2754_s4 = scalar_lea.hbm %s2753_s18, 1  ;;  %s2756_s3 = scalar_lea.hbm %s3762_s29, 1 }
 0x151   :  { %p2755_p7 = scmp.ne.s32.totalorder %s2753_s18, %s2754_s4  ;;  %p2757_p8 = scmp.lt.s32.totalorder %s2753_s18, %s3762_s29 }
 0x152   :  { %p2758_p9 = scmp.lt.s32.totalorder %s2756_s3, %s2754_s4 }
 0x153   :  { %s249_s16 = sshll.u32 %s3763_s20, 4  ;;  %s3478_s16 = int_to_ptr.hbm [resolvable:$true] %s249_s16 }
 0x154   :  { %p2759_p10 = por %p2758_p9, %p2757_p8 }
 0x156   :  { %p2760_p11 = pnand %p2759_p10, %p2755_p7 }
 0x158   :  { %2763 = shalt.err (!%p2760_p11)
}
 0x159   :  { %233 = dma.hbm_to_vmem [thread:$0]  %s229_s30, 16, %s231_s11, [#allocation17]  }
 0x15a   :  { %s3764_s27 = sld [smem:[#allocation83_spill]]  ;;  %s3163_s0 = smov [#allocation21]  }
 0x15b   :  { %s251_s22 = sshll.u32 %s3163_s0, 4  ;;  %s2776_s12 = sshra.s32 %s3478_s16, 4  ;;  %s252_s22 = int_to_ptr.vmem [resolvable:$true] %s251_s22  ;;  %s2777_s12 = int_to_ptr.hbm [resolvable:$true] %s2776_s12 }
 0x15c   :  { %s2778_s21 = scalar_lea.hbm %s2777_s12, 256  ;;  %s2780_s23 = scalar_lea.hbm %s3763_s20, 256 }
 0x15d   :  { %p2779_p12 = scmp.ne.s32.totalorder %s2777_s12, %s2778_s21  ;;  %p2781_p13 = scmp.lt.s32.totalorder %s2777_s12, %s3763_s20 }
 0x15e   :  { %p2782_p0 = scmp.lt.s32.totalorder %s2780_s23, %s2778_s21 }
 0x160   :  { %s275_s19 = sshll.u32 %s3764_s27, 4  ;;  %p2783_p1 = por %p2782_p0, %p2781_p13  ;;  %s276_s19 = int_to_ptr.hbm [resolvable:$true] %s275_s19 }
 0x162   :  { %p2784_p2 = pnand %p2783_p1, %p2779_p12 }
 0x164   :  { %2787 = shalt.err (!%p2784_p2)
}
 0x165   :  { %s3164_s28 = smov 256   ;;  %s3765_s1 = sld [smem:[#allocation84_spill]] }
 0x166   :  { %s3165_s6 = smov 16   ;;  %s3166_s5 = smov [#allocation24]  }
 0x167   :  { %257 = dma.hbm_to_vmem [thread:$0]  %s3478_s16, 4096, %s252_s22, [#allocation20], %s3164_s28, %s3164_s28, %s3165_s6  }
 0x168   :  { %s277_s29 = sshll.u32 %s3166_s5, 4  ;;  %s2800_s26 = sshra.s32 %s276_s19, 4  ;;  %s278_s29 = int_to_ptr.vmem [resolvable:$true] %s277_s29  ;;  %s2801_s26 = int_to_ptr.hbm [resolvable:$true] %s2800_s26 }
 0x169   :  { %s2802_s2 = scalar_lea.hbm %s2801_s26, 128  ;;  %s2804_s7 = scalar_lea.hbm %s3764_s27, 128 }
 0x16a   :  { %p2803_p3 = scmp.ne.s32.totalorder %s2801_s26, %s2802_s2  ;;  %p2805_p4 = scmp.lt.s32.totalorder %s2801_s26, %s3764_s27 }
 0x16b   :  { %s300_s30 = sshll.u32 %s3765_s1, 4  ;;  %p2806_p5 = scmp.lt.s32.totalorder %s2804_s7, %s2802_s2  ;;  %s301_s30 = int_to_ptr.hbm [resolvable:$true] %s300_s30 }
 0x16d   :  { %p2807_p6 = por %p2806_p5, %p2805_p4 }
 0x16f   :  { %p2808_p7 = pnand %p2807_p6, %p2803_p3 }
 0x171   :  { %2811 = shalt.err (!%p2808_p7)
}
 0x172   :  { %s3766_s10 = sld [smem:[#allocation85_spill]]  ;;  %s3167_s20 = smov [#allocation27]  }
 0x173   :  { %283 = dma.hbm_to_vmem [thread:$0]  %s276_s19, 2048, %s278_s29, [#allocation23], %s3146_s15, %s3146_s15, %s3147_s8  }
 0x174   :  { %s302_s14 = sshll.u32 %s3167_s20, 4  ;;  %s2824_s11 = sshra.s32 %s301_s30, 4  ;;  %s303_s14 = int_to_ptr.vmem [resolvable:$true] %s302_s14  ;;  %s2825_s11 = int_to_ptr.hbm [resolvable:$true] %s2824_s11 }
 0x175   :  { %s2826_s16 = scalar_lea.hbm %s2825_s11, 1  ;;  %s2828_s18 = scalar_lea.hbm %s3765_s1, 1 }
 0x176   :  { %p2827_p8 = scmp.ne.s32.totalorder %s2825_s11, %s2826_s16  ;;  %p2829_p9 = scmp.lt.s32.totalorder %s2825_s11, %s3765_s1 }
 0x177   :  { %p2830_p10 = scmp.lt.s32.totalorder %s2828_s18, %s2826_s16 }
 0x178   :  { %s322_s9 = sshll.u32 %s3766_s10, 4  ;;  %s323_s9 = int_to_ptr.hbm [resolvable:$true] %s322_s9 }
 0x179   :  { %p2831_p11 = por %p2830_p10, %p2829_p9 }
 0x17b   :  { %p2832_p12 = pnand %p2831_p11, %p2827_p8 }
 0x17d   :  { %2835 = shalt.err (!%p2832_p12)
}
 0x17e   :  { %305 = dma.hbm_to_vmem [thread:$0]  %s301_s30, 16, %s303_s14, [#allocation26]  }
 0x17f   :  { %s3767_s4 = sld [smem:[#allocation86_spill]]  ;;  %s3168_s3 = smov [#allocation30]  }
 0x180   :  { %s324_s27 = sshll.u32 %s3168_s3, 4  ;;  %s2848_s22 = sshra.s32 %s323_s9, 4  ;;  %s325_s27 = int_to_ptr.vmem [resolvable:$true] %s324_s27  ;;  %s2849_s22 = int_to_ptr.hbm [resolvable:$true] %s2848_s22 }
 0x181   :  { %s2850_s19 = scalar_lea.hbm %s2849_s22, 1  ;;  %s2852_s12 = scalar_lea.hbm %s3766_s10, 1 }
 0x182   :  { %p2851_p13 = scmp.ne.s32.totalorder %s2849_s22, %s2850_s19  ;;  %p2853_p0 = scmp.lt.s32.totalorder %s2849_s22, %s3766_s10 }
 0x183   :  { %p2854_p1 = scmp.lt.s32.totalorder %s2852_s12, %s2850_s19 }
 0x185   :  { %s344_s0 = sshll.u32 %s3767_s4, 4  ;;  %p2855_p2 = por %p2854_p1, %p2853_p0  ;;  %s345_s0 = int_to_ptr.hbm [resolvable:$true] %s344_s0 }
 0x187   :  { %p2856_p3 = pnand %p2855_p2, %p2851_p13 }
 0x189   :  { %2859 = shalt.err (!%p2856_p3)
}
 0x18a   :  { %327 = dma.hbm_to_vmem [thread:$0]  %s323_s9, 16, %s325_s27, [#allocation29]  }
 0x18b   :  { %s3768_s21 = sld [smem:[#allocation87_spill]]  ;;  %s3169_s1 = smov [#allocation33]  }
 0x18c   :  { %s346_s5 = sshll.u32 %s3169_s1, 4  ;;  %s2872_s29 = sshra.s32 %s345_s0, 4  ;;  %s347_s5 = int_to_ptr.vmem [resolvable:$true] %s346_s5  ;;  %s2873_s29 = int_to_ptr.hbm [resolvable:$true] %s2872_s29 }
 0x18d   :  { %s2874_s30 = scalar_lea.hbm %s2873_s29, 1  ;;  %s2876_s26 = scalar_lea.hbm %s3767_s4, 1 }
 0x18e   :  { %p2875_p4 = scmp.ne.s32.totalorder %s2873_s29, %s2874_s30  ;;  %p2877_p5 = scmp.lt.s32.totalorder %s2873_s29, %s3767_s4 }
 0x18f   :  { %p2878_p6 = scmp.lt.s32.totalorder %s2876_s26, %s2874_s30 }
 0x191   :  { %s367_s23 = sshll.u32 %s3768_s21, 4  ;;  %p2879_p7 = por %p2878_p6, %p2877_p5  ;;  %s3503_s23 = int_to_ptr.hbm [resolvable:$true] %s367_s23 }
 0x193   :  { %p2880_p8 = pnand %p2879_p7, %p2875_p4 }
 0x195   :  { %2883 = shalt.err (!%p2880_p8)
}
 0x196   :  { %349 = dma.hbm_to_vmem [thread:$0]  %s345_s0, 16, %s347_s5, [#allocation32]  }
 0x197   :  { %s3769_s2 = sld [smem:[#allocation88_spill]]  ;;  %s3170_s7 = smov [#allocation36]  }
 0x198   :  { %s369_s10 = sshll.u32 %s3170_s7, 4  ;;  %s2896_s20 = sshra.s32 %s3503_s23, 4  ;;  %s370_s10 = int_to_ptr.vmem [resolvable:$true] %s369_s10  ;;  %s2897_s20 = int_to_ptr.hbm [resolvable:$true] %s2896_s20 }
 0x199   :  { %s2898_s14 = scalar_lea.hbm %s2897_s20, 128  ;;  %s2900_s11 = scalar_lea.hbm %s3768_s21, 128 }
 0x19a   :  { %p2899_p9 = scmp.ne.s32.totalorder %s2897_s20, %s2898_s14  ;;  %p2901_p10 = scmp.lt.s32.totalorder %s2897_s20, %s3768_s21 }
 0x19b   :  { %p2902_p11 = scmp.lt.s32.totalorder %s2900_s11, %s2898_s14 }
 0x19d   :  { %s392_s9 = sshll.u32 %s3769_s2, 4  ;;  %p2903_p12 = por %p2902_p11, %p2901_p10  ;;  %s393_s9 = int_to_ptr.hbm [resolvable:$true] %s392_s9 }
 0x19f   :  { %p2904_p13 = pnand %p2903_p12, %p2899_p9 }
 0x1a1   :  { %2907 = shalt.err (!%p2904_p13)
}
 0x1a2   :  { %s3770_s16 = sld [smem:[#allocation89_spill]]  ;;  %s3171_s4 = smov [#allocation39]  }
 0x1a3   :  { %375 = dma.hbm_to_vmem [thread:$0]  %s3503_s23, 2048, %s370_s10, [#allocation35], %s3146_s15, %s3146_s15, %s3147_s8  }
 0x1a4   :  { %s394_s3 = sshll.u32 %s3171_s4, 4  ;;  %s2920_s27 = sshra.s32 %s393_s9, 4  ;;  %s395_s3 = int_to_ptr.vmem [resolvable:$true] %s394_s3  ;;  %s2921_s27 = int_to_ptr.hbm [resolvable:$true] %s2920_s27 }
 0x1a5   :  { %s2922_s0 = scalar_lea.hbm %s2921_s27, 1  ;;  %s2924_s22 = scalar_lea.hbm %s3769_s2, 1 }
 0x1a6   :  { %p2923_p0 = scmp.ne.s32.totalorder %s2921_s27, %s2922_s0  ;;  %p2925_p1 = scmp.lt.s32.totalorder %s2921_s27, %s3769_s2 }
 0x1a7   :  { %p2926_p2 = scmp.lt.s32.totalorder %s2924_s22, %s2922_s0 }
 0x1a8   :  { %s413_s18 = sshll.u32 %s3770_s16, 4  ;;  %s3516_s18 = int_to_ptr.hbm [resolvable:$true] %s413_s18 }
 0x1a9   :  { %p2927_p3 = por %p2926_p2, %p2925_p1 }
 0x1ab   :  { %p2928_p4 = pnand %p2927_p3, %p2923_p0 }
 0x1ad   :  { %2931 = shalt.err (!%p2928_p4)
}
 0x1ae   :  { %397 = dma.hbm_to_vmem [thread:$0]  %s393_s9, 16, %s395_s3, [#allocation38]  }
 0x1af   :  { %s3771_s19 = sld [smem:[#allocation90_spill]]  ;;  %s3172_s12 = smov [#allocation42]  }
 0x1b0   :  { %s415_s21 = sshll.u32 %s3172_s12, 4  ;;  %s2944_s1 = sshra.s32 %s3516_s18, 4  ;;  %s416_s21 = int_to_ptr.vmem [resolvable:$true] %s415_s21  ;;  %s2945_s1 = int_to_ptr.hbm [resolvable:$true] %s2944_s1 }
 0x1b1   :  { %s2946_s5 = scalar_lea.hbm %s2945_s1, 256  ;;  %s2948_s29 = scalar_lea.hbm %s3770_s16, 256 }
 0x1b2   :  { %p2947_p5 = scmp.ne.s32.totalorder %s2945_s1, %s2946_s5  ;;  %p2949_p6 = scmp.lt.s32.totalorder %s2945_s1, %s3770_s16 }
 0x1b3   :  { %p2950_p7 = scmp.lt.s32.totalorder %s2948_s29, %s2946_s5 }
 0x1b5   :  { %s439_s23 = sshll.u32 %s3771_s19, 4  ;;  %p2951_p8 = por %p2950_p7, %p2949_p6  ;;  %s3521_s23 = int_to_ptr.hbm [resolvable:$true] %s439_s23 }
 0x1b7   :  { %p2952_p9 = pnand %p2951_p8, %p2947_p5 }
 0x1b9   :  { %2955 = shalt.err (!%p2952_p9)
}
 0x1ba   :  { %s3772_s30 = sld [smem:[#allocation92_spill]]  ;;  %s3173_s2 = smov [#allocation45]  }
 0x1bb   :  { %421 = dma.hbm_to_vmem [thread:$0]  %s3516_s18, 4096, %s416_s21, [#allocation41], %s3164_s28, %s3164_s28, %s3165_s6  }
 0x1bc   :  { %s441_s7 = sshll.u32 %s3173_s2, 4  ;;  %s2968_s10 = sshra.s32 %s3521_s23, 4  ;;  %s442_s7 = int_to_ptr.vmem [resolvable:$true] %s441_s7  ;;  %s2969_s10 = int_to_ptr.hbm [resolvable:$true] %s2968_s10 }
 0x1bd   :  { %s2970_s9 = scalar_lea.hbm %s2969_s10, 128  ;;  %s2972_s20 = scalar_lea.hbm %s3771_s19, 128 }
 0x1be   :  { %p2971_p10 = scmp.ne.s32.totalorder %s2969_s10, %s2970_s9  ;;  %p2973_p11 = scmp.lt.s32.totalorder %s2969_s10, %s3771_s19 }
 0x1bf   :  { %p2974_p12 = scmp.lt.s32.totalorder %s2972_s20, %s2970_s9 }
 0x1c0   :  { %s464_s26 = sshll.u32 %s3772_s30, 4  ;;  %s465_s26 = int_to_ptr.hbm [resolvable:$true] %s464_s26 }
 0x1c1   :  { %p2975_p13 = por %p2974_p12, %p2973_p11 }
 0x1c3   :  { %p2976_p0 = pnand %p2975_p13, %p2971_p10 }
 0x1c5   :  { %2979 = shalt.err (!%p2976_p0)
}
 0x1c6   :  { %447 = dma.hbm_to_vmem [thread:$0]  %s3521_s23, 2048, %s442_s7, [#allocation44], %s3146_s15, %s3146_s15, %s3147_s8  }
 0x1c7   :  { %s3174_s28 = smov [#allocation48]   ;;  %s487_s14 = sshll.u32 %s3365_s13, 4  ;;  %s3539_s14 = int_to_ptr.hbm [resolvable:$true] %s487_s14 }
 0x1c8   :  { %s466_s6 = sshll.u32 %s3174_s28, 4  ;;  %s2992_s11 = sshra.s32 %s465_s26, 4  ;;  %s467_s6 = int_to_ptr.vmem [resolvable:$true] %s466_s6  ;;  %s2993_s11 = int_to_ptr.hbm [resolvable:$true] %s2992_s11 }
 0x1c9   :  { %s2994_s16 = scalar_lea.hbm %s2993_s11, 1  ;;  %s2996_s18 = scalar_lea.hbm %s3772_s30, 1 }
 0x1ca   :  { %p2995_p1 = scmp.ne.s32.totalorder %s2993_s11, %s2994_s16  ;;  %p2997_p2 = scmp.lt.s32.totalorder %s2993_s11, %s3772_s30 }
 0x1cb   :  { %p2998_p3 = scmp.lt.s32.totalorder %s2996_s18, %s2994_s16 }
 0x1cd   :  { %p2999_p4 = por %p2998_p3, %p2997_p2 }
 0x1cf   :  { %p3000_p5 = pnand %p2999_p4, %p2995_p1 }
 0x1d1   :  { %3003 = shalt.err (!%p3000_p5)
}
 0x1d2   :  { %469 = dma.hbm_to_vmem [thread:$0]  %s465_s26, 16, %s467_s6, [#allocation47]  }
 0x1d3   :  { %s501_s4 = sshll.u32 %s3370_s25, 4  ;;  %s3175_s3 = smov [#allocation51]   ;;  %s502_s4 = int_to_ptr.hbm [resolvable:$true] %s501_s4 }
 0x1d4   :  { %s489_s27 = sshll.u32 %s3175_s3, 4  ;;  %s3016_s0 = sshra.s32 %s3539_s14, 4  ;;  %s490_s27 = int_to_ptr.vmem [resolvable:$true] %s489_s27  ;;  %s3017_s0 = int_to_ptr.hbm [resolvable:$true] %s3016_s0 }
 0x1d5   :  { %s3018_s22 = scalar_lea.hbm %s3017_s0, 128  ;;  %s3020_s19 = scalar_lea.hbm %s3365_s13, 128 }
 0x1d6   :  { %p3019_p6 = scmp.ne.s32.totalorder %s3017_s0, %s3018_s22  ;;  %p3021_p7 = scmp.lt.s32.totalorder %s3017_s0, %s3365_s13 }
 0x1d7   :  { %p3022_p8 = scmp.lt.s32.totalorder %s3020_s19, %s3018_s22 }
 0x1d9   :  { %p3023_p9 = por %p3022_p8, %p3021_p7 }
 0x1db   :  { %p3024_p10 = pnand %p3023_p9, %p3019_p6 }
 0x1dd   :  { %3027 = shalt.err (!%p3024_p10)
}
 0x1de   :  { %495 = dma.hbm_to_vmem [thread:$0]  %s3539_s14, 2048, %s490_s27, [#allocation50], %s3146_s15, %s3146_s15, %s3147_s8  }
 0x1df   :  { %s3176_s12 = smov [#allocation52]   ;;  %s3040_s23 = sshra.s32 %s502_s4, 4  ;;  %s3041_s23 = int_to_ptr.hbm [resolvable:$true] %s3040_s23 }
 0x1e0   :  { %s503_s21 = sshll.u32 %s3176_s12, 4  ;;  %s3042_s1 = scalar_lea.hbm %s3041_s23, 1  ;;  %s504_s21 = int_to_ptr.vmem [resolvable:$true] %s503_s21 }
 0x1e1   :  { %p3043_p11 = scmp.ne.s32.totalorder %s3041_s23, %s3042_s1  ;;  %s3044_s5 = scalar_lea.hbm %s3370_s25, 1 }
 0x1e2   :  { %p3045_p12 = scmp.lt.s32.totalorder %s3041_s23, %s3370_s25  ;;  %p3046_p13 = scmp.lt.s32.totalorder %s3044_s5, %s3042_s1 }
 0x1e4   :  { %p3047_p0 = por %p3046_p13, %p3045_p12 }
 0x1e6   :  { %p3048_p1 = pnand %p3047_p0, %p3043_p11 }
 0x1e8   :  { %3051 = shalt.err (!%p3048_p1)
}
 0x1e9   :  { %506 = dma.hbm_to_vmem [thread:$0]  %s502_s4, 16, %s504_s21, [#allocation53]  }
 0x1ea   :  { %3064 = dma.done.wait [#allocation3], 256  }
 0x1eb   :  { %3065 = vsyncadd [#allocation3], 4294967040 }
 0x1ec   :  { %3066 = dma.done.wait [#allocation5], 272  }
 0x1ed   :  { %3067 = vsyncadd [#allocation5], 4294967024 }
 0x1ee   :  { %3068 = dma.done.wait [#allocation8], 32  }
 0x1ef   :  { %3069 = vsyncadd [#allocation8], 4294967264 }
 0x1f0   :  { %3070 = dma.done.wait [#allocation11], 32  }
 0x1f1   :  { %3071 = vsyncadd [#allocation11], 4294967264 }
 0x1f2   :  { %3072 = dma.done.wait [#allocation14], 2064  }
 0x1f3   :  { %3073 = vsyncadd [#allocation14], 4294965232 }
 0x1f4   :  { %3074 = dma.done.wait [#allocation17], 32  }
 0x1f5   :  { %3075 = vsyncadd [#allocation17], 4294967264 }
 0x1f6   :  { %3076 = dma.done.wait [#allocation20], 4112  }
 0x1f7   :  { %3077 = vsyncadd [#allocation20], 4294963184 }
 0x1f8   :  { %3078 = dma.done.wait [#allocation23], 4096  }
 0x1f9   :  { %3079 = vsyncadd [#allocation23], 4294963200 }
 0x1fa   :  { %3080 = dma.done.wait [#allocation26], 32  }
 0x1fb   :  { %3081 = vsyncadd [#allocation26], 4294967264 }
 0x1fc   :  { %3082 = dma.done.wait [#allocation29], 32  }
 0x1fd   :  { %3083 = vsyncadd [#allocation29], 4294967264 }
 0x1fe   :  { %3084 = dma.done.wait [#allocation32], 32  }
 0x1ff   :  { %3085 = vsyncadd [#allocation32], 4294967264 }
 0x200   :  { %3086 = dma.done.wait [#allocation35], 4096  }
 0x201   :  { %3087 = vsyncadd [#allocation35], 4294963200 }
 0x202   :  { %3088 = dma.done.wait [#allocation38], 32  }
 0x203   :  { %3089 = vsyncadd [#allocation38], 4294967264 }
 0x204   :  { %3090 = dma.done.wait [#allocation41], 4112  }
 0x205   :  { %3091 = vsyncadd [#allocation41], 4294963184 }
 0x206   :  { %3092 = dma.done.wait [#allocation44], 4096  }
 0x207   :  { %3093 = vsyncadd [#allocation44], 4294963200 }
 0x208   :  { %3094 = dma.done.wait [#allocation47], 32  }
 0x209   :  { %3095 = vsyncadd [#allocation47], 4294967264 }
 0x20a   :  { %3096 = dma.done.wait [#allocation50], 4096  }
 0x20b   :  { %3097 = vsyncadd [#allocation50], 4294963200 }
 0x20c   :  { %3098 = dma.done.wait [#allocation53], 16  }
 0x20d   :  { %3099 = vsyncadd [#allocation53], 4294967280  ;;  %s3773_s13 = sld [smem:[#allocation73_spill]]  ;;  %vm657_vm0 = vcmask 64512   ;;  %v655_v0 = vld [vmem:[#allocation2] sm:$0xff]  ;;  %v728_v2 = vld [vmem:[#allocation4] sm:$0xff] }
 0x20e   :  { %s3774_s25 = sld [smem:[#allocation74_spill]]  ;;  %685 = vmatpush.msra.mxu0 %v655_v0  ;;  %2128 = vmatpush.msra.mxu2 %v728_v2  ;;  %v656_v6 = vld [vmem:[#allocation2 + $0x8] sm:$0xff]  ;;  %v729_v11 = vld [vmem:[#allocation4 + $0x8] sm:$0xff]  ;;  %vm800_vm1 = vcmask 130048  }
 0x20f   :  { %714 = vmatpush.msra.mxu1 %v656_v6  ;;  %s3775_s15 = sld [smem:[#allocation72_spill]]  ;;  %2129 = vmatpush.msra.mxu3 %v729_v11  ;;  %v1118_v20 = vld [vmem:[#allocation21 + $0xf8] sm:$0xff]  ;;  %v1116_v21 = vld [vmem:[#allocation21 + $0xe8] sm:$0xff]  ;;  %v1117_v26 = vld [vmem:[#allocation21 + $0xf0] sm:$0xff] }
 0x210   :  { %757 = vmatpush.msrb.mxu0 %v728_v2  ;;  %v1114_v22 = vld [vmem:[#allocation21 + $0xd8] sm:$0xff]  ;;  %v1112_v24 = vld [vmem:[#allocation21 + $0xc8] sm:$0xff]  ;;  %v1115_v28 = vld [vmem:[#allocation21 + $0xe0] sm:$0xff]  ;;  %s3776_s8 = sld [smem:[#allocation79_spill]] }
 0x211   :  { %786 = vmatpush.msrb.mxu1 %v729_v11  ;;  %v1110_v27 = vld [vmem:[#allocation21 + $0xb8] sm:$0xff]  ;;  %v1108_v29 = vld [vmem:[#allocation21 + $0xa8] sm:$0xff]  ;;  %v1113_v30 = vld [vmem:[#allocation21 + $0xd0] sm:$0xff] }
 0x212   :  { %v1106_v31 = vld [vmem:[#allocation21 + $0x98] sm:$0xff]  ;;  %v1111_v33 = vld [vmem:[#allocation21 + $0xc0] sm:$0xff]  ;;  %v1104_v34 = vld [vmem:[#allocation21 + $0x88] sm:$0xff] }
 0x213   :  { %v647_v1 = vld [vmem:[%s3773_s13] sm:$0xff]  ;;  %v648_v4 = vld [vmem:[%s3773_s13 + $0x8] sm:$0xff]  ;;  %v649_v7 = vld [vmem:[%s3773_s13 + $0x10] sm:$0xff] }
 0x214   :  { %2084 = vmatmul.msk.f32.vlgmr.msra.gmra.mxu0 %vm657_vm0, %v647_v1  ;;  %v653_v3 = vld [vmem:[%s3774_s25 + $0x10] sm:$0xff]  ;;  %v654_v5 = vld [vmem:[%s3774_s25 + $0x18] sm:$0xff]  ;;  %2088 = vmatmul.msk.f32.vlgmr.msra.gmra.mxu1 %vm657_vm0, %v647_v1  ;;  %v651_v9 = vld [vmem:[%s3774_s25] sm:$0xff] }
 0x215   :  { %2094 = vmatmul.msk.f32.vlgmr.msra.gmra.mxu2 %vm657_vm0, %v653_v3  ;;  %v650_v8 = vld [vmem:[%s3773_s13 + $0x18] sm:$0xff]  ;;  %v652_v10 = vld [vmem:[%s3774_s25 + $0x8] sm:$0xff]  ;;  %2098 = vmatmul.msk.f32.vlgmr.msra.gmra.mxu3 %vm657_vm0, %v653_v3  ;;  %v3578_v15 = vld [vmem:[%s3775_s15] sm:$0xff] }
 0x216   :  { %v3583_v18 = vld [vmem:[%s3775_s15 + $0x8] sm:$0xff]  ;;  %v3586_v19 = vld [vmem:[%s3775_s15 + $0x10] sm:$0xff]  ;;  %v3593_v25 = vld [vmem:[%s3775_s15 + $0x18] sm:$0xff] }
 0x217   :  { %v1109_v35 = vld [vmem:[#allocation21 + $0xb0] sm:$0xff]  ;;  %v1102_v36 = vld [vmem:[#allocation21 + $0x78] sm:$0xff]  ;;  %v1107_v37 = vld [vmem:[#allocation21 + $0xa0] sm:$0xff] }
 0x218   :  { %v1100_v38 = vld [vmem:[#allocation21 + $0x68] sm:$0xff]  ;;  %v1105_v39 = vld [vmem:[#allocation21 + $0x90] sm:$0xff]  ;;  %v1103_v41 = vld [vmem:[#allocation21 + $0x80] sm:$0xff] }
 0x219   :  { %v944_v42 = vld [vmem:[%s3776_s8 + $0x78] sm:$0xff]  ;;  %v1101_v43 = vld [vmem:[#allocation21 + $0x70] sm:$0xff]  ;;  %v943_v44 = vld [vmem:[%s3776_s8 + $0x70] sm:$0xff] }
 0x21a   :  { %v1099_v45 = vld [vmem:[#allocation21 + $0x60] sm:$0xff]  ;;  %v942_v46 = vld [vmem:[%s3776_s8 + $0x68] sm:$0xff]  ;;  %v941_v47 = vld [vmem:[%s3776_s8 + $0x60] sm:$0xff] }
 0x21b   :  { %v940_v48 = vld [vmem:[%s3776_s8 + $0x58] sm:$0xff]  ;;  %v939_v49 = vld [vmem:[%s3776_s8 + $0x50] sm:$0xff]  ;;  %v938_v50 = vld [vmem:[%s3776_s8 + $0x48] sm:$0xff] }
 0x21c   :  { %2085 = vmatmul.msk.f32.gmra.mxu0 %vm657_vm0, %v648_v4  ;;  %2089 = vmatmul.msk.f32.gmra.mxu1 %vm657_vm0, %v648_v4  ;;  %v937_v51 = vld [vmem:[%s3776_s8 + $0x40] sm:$0xff]  ;;  %v936_v52 = vld [vmem:[%s3776_s8 + $0x38] sm:$0xff]  ;;  %v935_v53 = vld [vmem:[%s3776_s8 + $0x30] sm:$0xff] }
 0x21d   :  { %2095 = vmatmul.msk.f32.gmra.mxu2 %vm657_vm0, %v654_v5  ;;  %2099 = vmatmul.msk.f32.gmra.mxu3 %vm657_vm0, %v654_v5  ;;  %v934_v54 = vld [vmem:[%s3776_s8 + $0x28] sm:$0xff]  ;;  %v933_v55 = vld [vmem:[%s3776_s8 + $0x20] sm:$0xff]  ;;  %v932_v56 = vld [vmem:[%s3776_s8 + $0x18] sm:$0xff] }
 0x21e   :  { %v931_v57 = vld [vmem:[%s3776_s8 + $0x10] sm:$0xff]  ;;  %v1097_v58 = vld [vmem:[#allocation21 + $0x50] sm:$0xff]  ;;  %v1096_v62 = vld [vmem:[#allocation21 + $0x48] sm:$0xff] }
 0x21f   :  { %v1098_v59 = vld [vmem:[#allocation21 + $0x58] sm:$0xff]  ;;  %v1095_v61 = vld [vmem:[#allocation21 + $0x40] sm:$0xff]  ;;  %v929_v63 = vld [vmem:[%s3776_s8] sm:$0xff] }
 0x220   :  { %v930_v60 = vld [vmem:[%s3776_s8 + $0x8] sm:$0xff]  ;;  %v1091_v4 = vld [vmem:[#allocation21 + $0x20] sm:$0xff]  ;;  %v1092_v5 = vld [vmem:[#allocation21 + $0x28] sm:$0xff] }
 0x221   :  { %v1093_v0 = vld [vmem:[#allocation21 + $0x30] sm:$0xff]  ;;  %v1094_v2 = vld [vmem:[#allocation21 + $0x38] sm:$0xff]  ;;  %v1088_v11 = vld [vmem:[#allocation21 + $0x8] sm:$0xff] }
 0x222   :  { %v960_v3 = vld [vmem:[#allocation15 + $0x78] sm:$0xff]  ;;  %v959_v6 = vld [vmem:[#allocation15 + $0x70] sm:$0xff] }
 0x224   :  { %2086 = vmatmul.msk.f32.gmra.mxu0 %vm657_vm0, %v649_v7  ;;  %2090 = vmatmul.msk.f32.gmra.mxu1 %vm657_vm0, %v649_v7  ;;  %v1089_v7 = vld [vmem:[#allocation21 + $0x10] sm:$0xff] }
 0x22c   :  { %2087 = vmatmul.msk.f32.gmra.mxu0 %vm657_vm0, %v650_v8  ;;  %2091 = vmatmul.msk.f32.gmra.mxu1 %vm657_vm0, %v650_v8  ;;  %v1090_v8 = vld [vmem:[#allocation21 + $0x18] sm:$0xff] }
 0x234   :  { %2092 = vmatmul.msk.f32.vlgmr.msrb.gmra.mxu0 %vm657_vm0, %v651_v9  ;;  %2096 = vmatmul.msk.f32.vlgmr.msrb.gmra.mxu1 %vm657_vm0, %v651_v9  ;;  %v958_v9 = vld [vmem:[#allocation15 + $0x68] sm:$0xff] }
 0x23c   :  { %2093 = vmatmul.msk.f32.gmra.mxu0 %vm657_vm0, %v652_v10  ;;  %2097 = vmatmul.msk.f32.gmra.mxu1 %vm657_vm0, %v652_v10  ;;  %v1087_v10 = vld [vmem:[#allocation21] sm:$0xff] }
 0x291   :  { %v687_v12 = vpop.f32.mrf.mxu0  ;;  %v3621_v1 = vpop.f32.mrf.mxu1 }
 0x298   :  { %v765_v13 = vpop.f32.mrf.mxu2 }
 0x299   :  { %v690_v14 = vpop.f32.mrf.mxu0 }
 0x29a   :  { %821 = vmatpush.msra.mxu0 %v690_v14  ;;  %v956_v14 = vld [vmem:[#allocation15 + $0x58] sm:$0xff] }
 0x29c   :  { %822 = vmatpush.msra.mxu0 %v687_v12  ;;  %v957_v12 = vld [vmem:[#allocation15 + $0x60] sm:$0xff] }
 0x29d   :  { %2100 = vmatmul.msk.f32.vlgmr.msra.gmra.mxu0 %vm800_vm1, %v3578_v15 }
 0x29e   :  { %961 = vmatpush.msrb.mxu0 %v960_v3 }
 0x2a0   :  { %v768_v16 = vpop.f32.mrf.mxu2  ;;  %962 = vmatpush.msrb.mxu0 %v959_v6 }
 0x2a1   :  { %v693_v17 = vpop.f32.mrf.mxu0  ;;  %896 = vmatpush.msrb.mxu3 %v768_v16  ;;  %v1236_v16 = vld [vmem:[#allocation24 + $0x70] sm:$0xff] }
 0x2a2   :  { %963 = vmatpush.msrb.mxu0 %v958_v9 }
 0x2a3   :  { %897 = vmatpush.msrb.mxu3 %v765_v13  ;;  %v1237_v13 = vld [vmem:[#allocation24 + $0x78] sm:$0xff] }
 0x2a4   :  { %2106 = vmatmul.msk.f32.vlgmr.msrb.gmra.mxu3 %vm800_vm1, %v3586_v19  ;;  %964 = vmatpush.msrb.mxu0 %v957_v12 }
 0x2a5   :  { %2101 = vmatmul.msk.f32.gmra.mxu0 %vm800_vm1, %v3583_v18  ;;  %1148 = vmatpush.msra.mxu3 %v1118_v20  ;;  %v3623_v20 = vpop.f32.mrf.mxu1 }
 0x2a6   :  { %965 = vmatpush.msrb.mxu0 %v956_v14  ;;  %v2211_v14 = vld [vmem:[#allocation12] ss:$0 sm:$0xff] }
 0x2a7   :  { %1149 = vmatpush.msra.mxu3 %v1116_v21  ;;  %v1235_v21 = vld [vmem:[#allocation24 + $0x68] sm:$0xff] }
 0x2a9   :  { %v696_v23 = vpop.f32.mrf.mxu0  ;;  %1150 = vmatpush.msra.mxu3 %v1114_v22  ;;  %v954_v22 = vld [vmem:[#allocation15 + $0x48] sm:$0xff] }
 0x2aa   :  { %873 = vmatpush.msrb.mxu2 %v696_v23  ;;  %v1234_v23 = vld [vmem:[#allocation24 + $0x60] sm:$0xff] }
 0x2ab   :  { %1151 = vmatpush.msra.mxu3 %v1112_v24  ;;  %v953_v24 = vld [vmem:[#allocation15 + $0x40] sm:$0xff] }
 0x2ac   :  { %874 = vmatpush.msrb.mxu2 %v693_v17  ;;  %2107 = vmatmul.msk.f32.gmra.mxu3 %vm800_vm1, %v3593_v25  ;;  %v955_v17 = vld [vmem:[#allocation15 + $0x50] sm:$0xff] }
 0x2ad   :  { %2104 = vmatmul.msk.f32.vlgmr.msrb.gmra.mxu2 %vm800_vm1, %v3586_v19  ;;  %1152 = vmatpush.msra.mxu3 %v1110_v27  ;;  %v952_v27 = vld [vmem:[#allocation15 + $0x38] sm:$0xff] }
 0x2ae   :  { %1119 = vmatpush.msra.mxu2 %v1117_v26  ;;  %966 = vmatpush.msrb.mxu0 %v955_v17  ;;  %v1233_v26 = vld [vmem:[#allocation24 + $0x58] sm:$0xff] }
 0x2af   :  { %1153 = vmatpush.msra.mxu3 %v1108_v29  ;;  %v951_v29 = vld [vmem:[#allocation15 + $0x30] sm:$0xff] }
 0x2b0   :  { %1120 = vmatpush.msra.mxu2 %v1115_v28  ;;  %967 = vmatpush.msrb.mxu0 %v954_v22  ;;  %v1232_v28 = vld [vmem:[#allocation24 + $0x50] sm:$0xff] }
 0x2b1   :  { %v759_v32 = vpop.f32.mrf.mxu0  ;;  %1154 = vmatpush.msra.mxu3 %v1106_v31  ;;  %v950_v31 = vld [vmem:[#allocation15 + $0x28] sm:$0xff] }
 0x2b2   :  { %1121 = vmatpush.msra.mxu2 %v1113_v30  ;;  %968 = vmatpush.msrb.mxu0 %v953_v24  ;;  %v1231_v30 = vld [vmem:[#allocation24 + $0x48] sm:$0xff] }
 0x2b3   :  { %1155 = vmatpush.msra.mxu3 %v1104_v34  ;;  %v949_v34 = vld [vmem:[#allocation15 + $0x20] sm:$0xff] }
 0x2b4   :  { %1122 = vmatpush.msra.mxu2 %v1111_v33  ;;  %969 = vmatpush.msrb.mxu0 %v952_v27  ;;  %v1230_v33 = vld [vmem:[#allocation24 + $0x40] sm:$0xff] }
 0x2b5   :  { %2105 = vmatmul.msk.f32.gmra.mxu2 %vm800_vm1, %v3593_v25  ;;  %1156 = vmatpush.msra.mxu3 %v1102_v36  ;;  %v948_v36 = vld [vmem:[#allocation15 + $0x18] sm:$0xff] }
 0x2b6   :  { %1123 = vmatpush.msra.mxu2 %v1109_v35  ;;  %970 = vmatpush.msrb.mxu0 %v951_v29  ;;  %v1229_v35 = vld [vmem:[#allocation24 + $0x38] sm:$0xff] }
 0x2b7   :  { %1157 = vmatpush.msra.mxu3 %v1100_v38  ;;  %v2207_v38 = vld [vmem:[#allocation6] ss:$0 sm:$0xff] }
 0x2b8   :  { %1124 = vmatpush.msra.mxu2 %v1107_v37  ;;  %971 = vmatpush.msrb.mxu0 %v950_v31  ;;  %v1228_v37 = vld [vmem:[#allocation24 + $0x30] sm:$0xff] }
 0x2b9   :  { %v762_v40 = vpop.f32.mrf.mxu0  ;;  %1158 = vmatpush.msra.mxu3 %v1098_v59 }
 0x2ba   :  { %844 = vmatpush.msra.mxu1 %v762_v40  ;;  %1125 = vmatpush.msra.mxu2 %v1105_v39  ;;  %v947_v39 = vld [vmem:[#allocation15 + $0x10] sm:$0xff] }
 0x2bb   :  { %1159 = vmatpush.msra.mxu3 %v1096_v62  ;;  %972 = vmatpush.msrb.mxu0 %v949_v34  ;;  %v1227_v40 = vld [vmem:[#allocation24 + $0x28] sm:$0xff] }
 0x2bc   :  { %845 = vmatpush.msra.mxu1 %v759_v32  ;;  %1126 = vmatpush.msra.mxu2 %v1103_v41  ;;  %v722_v32 = vpop.f32.mrf.mxu1 }
 0x2bd   :  { %2102 = vmatmul.msk.f32.vlgmr.msra.gmra.mxu1 %vm800_vm1, %v3578_v15  ;;  %1160 = vmatpush.msra.mxu3 %v1094_v2 }
 0x2be   :  { %990 = vmatpush.msrb.mxu1 %v944_v42  ;;  %1127 = vmatpush.msra.mxu2 %v1101_v43  ;;  %v2208_v43 = vld [vmem:[#allocation9] ss:$0 sm:$0xff] }
 0x2bf   :  { %1161 = vmatpush.msra.mxu3 %v1092_v5  ;;  %973 = vmatpush.msrb.mxu0 %v948_v36 }
 0x2c0   :  { %991 = vmatpush.msrb.mxu1 %v943_v44  ;;  %1128 = vmatpush.msra.mxu2 %v1099_v45  ;;  %v946_v44 = vld [vmem:[#allocation15 + $0x8] sm:$0xff] }
 0x2c1   :  { %1162 = vmatpush.msra.mxu3 %v1090_v8  ;;  %974 = vmatpush.msrb.mxu0 %v947_v39  ;;  %v1226_v45 = vld [vmem:[#allocation24 + $0x20] sm:$0xff] }
 0x2c2   :  { %992 = vmatpush.msrb.mxu1 %v942_v46  ;;  %1129 = vmatpush.msra.mxu2 %v1097_v58  ;;  %v1222_v58 = vld [vmem:[#allocation24] sm:$0xff] }
 0x2c3   :  { %1163 = vmatpush.msra.mxu3 %v1088_v11  ;;  %975 = vmatpush.msrb.mxu0 %v946_v44 }
 0x2c4   :  { %993 = vmatpush.msrb.mxu1 %v941_v47  ;;  %1130 = vmatpush.msra.mxu2 %v1095_v61  ;;  %v725_v46 = vpop.f32.mrf.mxu1 }
 0x2c5   :  { %2103 = vmatmul.msk.f32.gmra.mxu1 %vm800_vm1, %v3583_v18 }
 0x2c6   :  { %994 = vmatpush.msrb.mxu1 %v940_v48  ;;  %1131 = vmatpush.msra.mxu2 %v1093_v0  ;;  %v2209_v48 = vld [vmem:[#allocation10] ss:$0 sm:$0xff] }
 0x2c8   :  { %995 = vmatpush.msrb.mxu1 %v939_v49  ;;  %1132 = vmatpush.msra.mxu2 %v1091_v4  ;;  %v945_v49 = vld [vmem:[#allocation15] sm:$0xff] }
 0x2c9   :  { %976 = vmatpush.msrb.mxu0 %v945_v49  ;;  %v1189_v49 = vld [vmem:[#allocation22 + $0x60] sm:$0xff] }
 0x2ca   :  { %996 = vmatpush.msrb.mxu1 %v938_v50  ;;  %1133 = vmatpush.msra.mxu2 %v1089_v7  ;;  %v1225_v50 = vld [vmem:[#allocation24 + $0x18] sm:$0xff] }
 0x2cc   :  { %997 = vmatpush.msrb.mxu1 %v937_v51  ;;  %1134 = vmatpush.msra.mxu2 %v1087_v10  ;;  %v2210_v10 = vld [vmem:[#allocation7] ss:$0 sm:$0xff] }
 0x2ce   :  { %998 = vmatpush.msrb.mxu1 %v936_v52  ;;  %v1224_v52 = vld [vmem:[#allocation24 + $0x10] sm:$0xff] }
 0x2d0   :  { %999 = vmatpush.msrb.mxu1 %v935_v53 }
 0x2d2   :  { %1000 = vmatpush.msrb.mxu1 %v934_v54  ;;  %v1223_v54 = vld [vmem:[#allocation24 + $0x8] sm:$0xff] }
 0x2d4   :  { %1001 = vmatpush.msrb.mxu1 %v933_v55 }
 0x2d6   :  { %1002 = vmatpush.msrb.mxu1 %v932_v56 }
 0x2d8   :  { %1003 = vmatpush.msrb.mxu1 %v931_v57 }
 0x2da   :  { %1004 = vmatpush.msrb.mxu1 %v930_v60  ;;  %v788_v60 = vpop.f32.mrf.mxu1 }
 0x2dc   :  { %1005 = vmatpush.msrb.mxu1 %v929_v63  ;;  %v794_v63 = vpop.f32.mrf.mxu3 }
 0x2de   :  { %1238 = vmatpush.msra.mxu1 %v1237_v13 }
 0x2e0   :  { %1239 = vmatpush.msra.mxu1 %v1236_v16 }
 0x2e2   :  { %1240 = vmatpush.msra.mxu1 %v1235_v21  ;;  %v791_v2 = vpop.f32.mrf.mxu1 }
 0x2e4   :  { %1241 = vmatpush.msra.mxu1 %v1234_v23  ;;  %v797_v5 = vpop.f32.mrf.mxu3 }
 0x2e6   :  { %1242 = vmatpush.msra.mxu1 %v1233_v26 }
 0x2e8   :  { %1243 = vmatpush.msra.mxu1 %v1232_v28 }
 0x2ea   :  { %1244 = vmatpush.msra.mxu1 %v1231_v30 }
 0x2ec   :  { %1245 = vmatpush.msra.mxu1 %v1230_v33 }
 0x2ee   :  { %1246 = vmatpush.msra.mxu1 %v1229_v35 }
 0x2f0   :  { %1247 = vmatpush.msra.mxu1 %v1228_v37 }
 0x2f2   :  { %1248 = vmatpush.msra.mxu1 %v1227_v40 }
 0x2f4   :  { %1249 = vmatpush.msra.mxu1 %v1226_v45 }
 0x2f6   :  { %1250 = vmatpush.msra.mxu1 %v1225_v50  ;;  %v1188_v50 = vld [vmem:[#allocation22 + $0x58] sm:$0xff] }
 0x2f8   :  { %1251 = vmatpush.msra.mxu1 %v1224_v52  ;;  %v1186_v52 = vld [vmem:[#allocation22 + $0x48] sm:$0xff] }
 0x2fa   :  { %1252 = vmatpush.msra.mxu1 %v1223_v54  ;;  %v1184_v54 = vld [vmem:[#allocation22 + $0x38] sm:$0xff] }
 0x2fc   :  { %1253 = vmatpush.msra.mxu1 %v1222_v58  ;;  %v1180_v58 = vld [vmem:[#allocation22 + $0x18] sm:$0xff] }
 0x31a   :  { %v824_v41 = vpop.f32.mrf.mxu0 }
 0x31b   :  { %v905_v42 = vadd.f32 %v824_v41, %v3621_v1 }
 0x31d   :  { %v913_v47 = vadd.f32 %v2207_v38, %v905_v42 }
 0x31f   :  { %v1051_v51 = vmul.f32 %v2208_v43, %v913_v47  ;;  %1006 = vmatmul.f32.vlgmr.msrb.gmra.mxu1 %v913_v47  ;;  %v1191_v47 = vld [vmem:[#allocation22 + $0x70] sm:$0xff] }
 0x321   :  { %v1059_v53 = vadd.f32 %v2209_v48, %v1051_v51  ;;  %v1187_v51 = vld [vmem:[#allocation22 + $0x50] sm:$0xff] }
 0x322   :  { %v827_v55 = vpop.f32.mrf.mxu0 }
 0x323   :  { %v1063_v56 = vmax.f32 %v1059_v53, 0.0  ;;  %v906_v57 = vadd.f32 %v827_v55, %v3623_v20  ;;  %v2212_v20 = vld [vmem:[#allocation13] ss:$0 sm:$0xff]  ;;  %v1185_v53 = vld [vmem:[#allocation22 + $0x40] sm:$0xff]  ;;  %v1183_v55 = vld [vmem:[#allocation22 + $0x30] sm:$0xff] }
 0x325   :  { %1135 = vmatmul.f32.vlgmr.msra.gmra.mxu2 %v1063_v56  ;;  %1164 = vmatmul.f32.vlgmr.msra.gmra.mxu3 %v1063_v56  ;;  %v914_v59 = vadd.f32 %v2207_v38, %v906_v57  ;;  %v1182_v56 = vld [vmem:[#allocation22 + $0x28] sm:$0xff]  ;;  %v1181_v57 = vld [vmem:[#allocation22 + $0x20] sm:$0xff] }
 0x327   :  { %1009 = vmatmul.f32.gmra.mxu1 %v914_v59  ;;  %v1052_v61 = vmul.f32 %v2208_v43, %v914_v59  ;;  %v899_v22 = vpop.f32.mrf.mxu3  ;;  %v1179_v59 = vld [vmem:[#allocation22 + $0x10] sm:$0xff] }
 0x328   :  { %v919_v30 = vadd.f32 %v899_v22, %v794_v63 }
 0x329   :  { %v1060_v62 = vadd.f32 %v2209_v48, %v1052_v61  ;;  %v1177_v61 = vld [vmem:[#allocation22] sm:$0xff] }
 0x32a   :  { %v927_v34 = vadd.f32 %v2210_v10, %v919_v30  ;;  %v1569_v30 = vld [vmem:[#allocation42 + $0xe0] sm:$0xff] }
 0x32b   :  { %v1064_v0 = vmax.f32 %v1060_v62, 0.0 }
 0x32c   :  { %v1073_v39 = vmul.f32 %v2211_v14, %v927_v34 }
 0x32d   :  { %1138 = vmatmul.f32.gmra.mxu2 %v1064_v0  ;;  %1167 = vmatmul.f32.gmra.mxu3 %v1064_v0 }
 0x32e   :  { %v1081_v40 = vadd.f32 %v2212_v20, %v1073_v39 }
 0x32f   :  { %v902_v35 = vpop.f32.mrf.mxu3 }
 0x330   :  { %v876_v1 = vpop.f32.mrf.mxu2  ;;  %v920_v37 = vadd.f32 %v902_v35, %v797_v5  ;;  %v1085_v42 = vmax.f32 %v1081_v40, 0.0  ;;  %v1389_v40 = vld [vmem:[#allocation34 + $0x30] sm:$0xff] }
 0x331   :  { %v907_v3 = vadd.f32 %v876_v1, %v722_v32  ;;  %v3629_v1 = vld [vmem:[#allocation16] ss:$0 sm:$0xff] }
 0x332   :  { %v928_v41 = vadd.f32 %v2210_v10, %v920_v37  ;;  %v1390_v37 = vld [vmem:[#allocation34 + $0x38] sm:$0xff] }
 0x333   :  { %v915_v4 = vadd.f32 %v2207_v38, %v907_v3 }
 0x335   :  { %1012 = vmatmul.f32.gmra.mxu1 %v915_v4  ;;  %v1053_v6 = vmul.f32 %v2208_v43, %v915_v4  ;;  %v3633_v4 = vld [vmem:[#allocation18] ss:$0 sm:$0xff] }
 0x337   :  { %v1061_v7 = vadd.f32 %v2209_v48, %v1053_v6 }
 0x338   :  { %v879_v8 = vpop.f32.mrf.mxu2 }
 0x339   :  { %v908_v9 = vadd.f32 %v879_v8, %v725_v46  ;;  %v1065_v11 = vmax.f32 %v1061_v7, 0.0  ;;  %v1192_v46 = vld [vmem:[#allocation22 + $0x78] sm:$0xff]  ;;  %v1398_v8 = vld [vmem:[#allocation34 + $0x78] sm:$0xff] }
 0x33a   :  { %v847_v12 = vpop.f32.mrf.mxu1  ;;  %1193 = vmatpush.msra.mxu0 %v1192_v46  ;;  %v3636_v7 = vld [vmem:[#allocation19] ss:$0 sm:$0xff]  ;;  %1444 = vmatpush.msrb.mxu1 %v1398_v8  ;;  %v1387_v46 = vld [vmem:[#allocation34 + $0x20] sm:$0xff] }
 0x33b   :  { %v917_v13 = vadd.f32 %v847_v12, %v788_v60  ;;  %1141 = vmatmul.f32.gmra.mxu2 %v1065_v11  ;;  %1170 = vmatmul.f32.gmra.mxu3 %v1065_v11  ;;  %v916_v16 = vadd.f32 %v2207_v38, %v908_v9  ;;  %v1178_v60 = vld [vmem:[#allocation22 + $0x8] sm:$0xff]  ;;  %v1397_v9 = vld [vmem:[#allocation34 + $0x70] sm:$0xff]  ;;  %v1396_v11 = vld [vmem:[#allocation34 + $0x68] sm:$0xff] }
 0x33c   :  { %1194 = vmatpush.msra.mxu0 %v1191_v47  ;;  %1445 = vmatpush.msrb.mxu1 %v1397_v9  ;;  %v2217_v9 = vld [vmem:[#allocation28] ss:$0 sm:$0xff] }
 0x33d   :  { %v925_v17 = vadd.f32 %v2210_v10, %v917_v13  ;;  %1015 = vmatmul.f32.gmra.mxu1 %v916_v16  ;;  %v1054_v21 = vmul.f32 %v2208_v43, %v916_v16  ;;  %v1074_v43 = vmul.f32 %v2211_v14, %v928_v41 }
 0x33e   :  { %1446 = vmatpush.msrb.mxu1 %v1396_v11  ;;  %v2218_v11 = vld [vmem:[#allocation30] ss:$0 sm:$0xff] }
 0x33f   :  { %v1071_v23 = vmul.f32 %v2211_v14, %v925_v17  ;;  %977 = vmatmul.f32.vlgmr.msrb.gmra.mxu0 %v925_v17  ;;  %v1062_v24 = vadd.f32 %v2209_v48, %v1054_v21  ;;  %v1082_v44 = vadd.f32 %v2212_v20, %v1074_v43  ;;  %v1190_v48 = vld [vmem:[#allocation22 + $0x68] sm:$0xff]  ;;  %v1388_v43 = vld [vmem:[#allocation34 + $0x28] sm:$0xff] }
 0x340   :  { %1195 = vmatpush.msra.mxu0 %v1190_v48  ;;  %v1394_v21 = vld [vmem:[#allocation34 + $0x58] sm:$0xff] }
 0x341   :  { %v1079_v26 = vadd.f32 %v2212_v20, %v1071_v23  ;;  %v1066_v27 = vmax.f32 %v1062_v24, 0.0  ;;  %v1086_v45 = vmax.f32 %v1082_v44, 0.0  ;;  %v1393_v24 = vld [vmem:[#allocation34 + $0x50] sm:$0xff]  ;;  %v1561_v44 = vld [vmem:[#allocation42 + $0xa0] sm:$0xff] }
 0x342   :  { %v850_v28 = vpop.f32.mrf.mxu1  ;;  %1196 = vmatpush.msra.mxu0 %v1189_v49  ;;  %v1559_v49 = vld [vmem:[#allocation42 + $0x90] sm:$0xff] }
 0x343   :  { %v1083_v29 = vmax.f32 %v1079_v26, 0.0  ;;  %v918_v31 = vadd.f32 %v850_v28, %v791_v2  ;;  %1144 = vmatmul.f32.gmra.mxu2 %v1066_v27  ;;  %1173 = vmatmul.f32.gmra.mxu3 %v1066_v27  ;;  %v1571_v26 = vld [vmem:[#allocation42 + $0xf0] sm:$0xff]  ;;  %v1392_v28 = vld [vmem:[#allocation34 + $0x48] sm:$0xff] }
 0x344   :  { %1197 = vmatpush.msra.mxu0 %v1188_v50 }
 0x345   :  { %1254 = vmatmul.f32.vlgmr.msra.gmra.mxu1 %v1083_v29  ;;  %v926_v32 = vadd.f32 %v2210_v10, %v918_v31 }
 0x346   :  { %1198 = vmatpush.msra.mxu0 %v1187_v51 }
 0x347   :  { %980 = vmatmul.f32.gmra.mxu0 %v926_v32  ;;  %v1072_v33 = vmul.f32 %v2211_v14, %v926_v32  ;;  %v1395_v14 = vld [vmem:[#allocation34 + $0x60] sm:$0xff] }
 0x348   :  { %1199 = vmatpush.msra.mxu0 %v1186_v52  ;;  %1447 = vmatpush.msrb.mxu1 %v1395_v14  ;;  %v1391_v32 = vld [vmem:[#allocation34 + $0x40] sm:$0xff]  ;;  %v1386_v52 = vld [vmem:[#allocation34 + $0x18] sm:$0xff] }
 0x349   :  { %v1080_v36 = vadd.f32 %v2212_v20, %v1072_v33 }
 0x34a   :  { %1200 = vmatpush.msra.mxu0 %v1185_v53  ;;  %1448 = vmatpush.msrb.mxu1 %v1394_v21  ;;  %v1557_v53 = vld [vmem:[#allocation42 + $0x80] sm:$0xff] }
 0x34b   :  { %v1084_v38 = vmax.f32 %v1080_v36, 0.0 }
 0x34c   :  { %1201 = vmatpush.msra.mxu0 %v1184_v54  ;;  %1449 = vmatpush.msrb.mxu1 %v1393_v24 }
 0x34d   :  { %1257 = vmatmul.f32.gmra.mxu1 %v1084_v38  ;;  %v1565_v38 = vld [vmem:[#allocation42 + $0xc0] sm:$0xff] }
 0x34e   :  { %1202 = vmatpush.msra.mxu0 %v1183_v55  ;;  %1450 = vmatpush.msrb.mxu1 %v1392_v28  ;;  %v1555_v55 = vld [vmem:[#allocation42 + $0x70] sm:$0xff] }
 0x34f   :  { %983 = vmatmul.f32.gmra.mxu0 %v927_v34  ;;  %v1567_v34 = vld [vmem:[#allocation42 + $0xd0] sm:$0xff] }
 0x350   :  { %1203 = vmatpush.msra.mxu0 %v1182_v56  ;;  %1451 = vmatpush.msrb.mxu1 %v1391_v32 }
 0x352   :  { %1204 = vmatpush.msra.mxu0 %v1181_v57  ;;  %1452 = vmatpush.msrb.mxu1 %v1390_v37  ;;  %v1553_v57 = vld [vmem:[#allocation42 + $0x60] sm:$0xff] }
 0x354   :  { %1205 = vmatpush.msra.mxu0 %v1180_v58  ;;  %1453 = vmatpush.msrb.mxu1 %v1389_v40 }
 0x355   :  { %1260 = vmatmul.f32.gmra.mxu1 %v1085_v42 }
 0x356   :  { %1206 = vmatpush.msra.mxu0 %v1179_v59  ;;  %1454 = vmatpush.msrb.mxu1 %v1388_v43  ;;  %v1572_v43 = vld [vmem:[#allocation42 + $0xf8] sm:$0xff] }
 0x357   :  { %986 = vmatmul.f32.gmra.mxu0 %v928_v41  ;;  %v1563_v41 = vld [vmem:[#allocation42 + $0xb0] sm:$0xff] }
 0x358   :  { %1207 = vmatpush.msra.mxu0 %v1178_v60  ;;  %1455 = vmatpush.msrb.mxu1 %v1387_v46  ;;  %v1385_v60 = vld [vmem:[#allocation34 + $0x10] sm:$0xff]  ;;  %v1564_v46 = vld [vmem:[#allocation42 + $0xb8] sm:$0xff] }
 0x35a   :  { %1208 = vmatpush.msra.mxu0 %v1177_v61  ;;  %1456 = vmatpush.msrb.mxu1 %v1386_v52  ;;  %v1551_v61 = vld [vmem:[#allocation42 + $0x50] sm:$0xff]  ;;  %v1550_v52 = vld [vmem:[#allocation42 + $0x48] sm:$0xff] }
 0x35c   :  { %1457 = vmatpush.msrb.mxu1 %v1385_v60  ;;  %v1410_v60 = vld [vmem:[#allocation36 + $0x58] sm:$0xff] }
 0x35d   :  { %1263 = vmatmul.f32.gmra.mxu1 %v1086_v45 }
 0x39c   :  { %v1007_v0 = vpop.f32.mrf.mxu1 }
 0x3a4   :  { %v1010_v12 = vpop.f32.mrf.mxu1 }
 0x3a8   :  { %v1136_v62 = vpop.f32.mrf.mxu2 }
 0x3b0   :  { %v1139_v63 = vpop.f32.mrf.mxu2 }
 0x3b1   :  { %1281 = vmatpush.msrb.mxu2 %v1139_v63  ;;  %v1549_v63 = vld [vmem:[#allocation42 + $0x40] sm:$0xff] }
 0x3b2   :  { %v1013_v29 = vpop.f32.mrf.mxu1 }
 0x3b3   :  { %1282 = vmatpush.msrb.mxu2 %v1136_v62  ;;  %v1384_v62 = vld [vmem:[#allocation34 + $0x8] sm:$0xff] }
 0x3b4   :  { %2108 = vmatmul.msk.f32.vlgmr.msrb.gmra.mxu2 %vm800_vm1, %v3578_v15  ;;  %1458 = vmatpush.msrb.mxu1 %v1384_v62  ;;  %v1408_v62 = vld [vmem:[#allocation36 + $0x48] sm:$0xff] }
 0x3ba   :  { %v1016_v47 = vpop.f32.mrf.mxu1 }
 0x3bc   :  { %v978_v2 = vpop.f32.mrf.mxu0  ;;  %2109 = vmatmul.msk.f32.gmra.mxu2 %vm800_vm1, %v3583_v18 }
 0x3bd   :  { %v1008_v3 = vadd.f32 %v1007_v0, %v978_v2  ;;  %v1383_v0 = vld [vmem:[#allocation34] sm:$0xff] }
 0x3be   :  { %v1142_v5 = vpop.f32.mrf.mxu2  ;;  %1459 = vmatpush.msrb.mxu1 %v1383_v0  ;;  %v1545_v2 = vld [vmem:[#allocation42 + $0x20] sm:$0xff]  ;;  %v1406_v0 = vld [vmem:[#allocation36 + $0x38] sm:$0xff] }
 0x3bf   :  { %v1023_v6 = vadd.f32 %v3629_v1, %v1008_v3  ;;  %v1543_v3 = vld [vmem:[#allocation42 + $0x10] sm:$0xff] }
 0x3c1   :  { %v1031_v10 = vmul.f32 %v3633_v4, %v1023_v6  ;;  %v2216_v6 = vld [vmem:[#allocation25] ss:$0 sm:$0xff] }
 0x3c3   :  { %v1039_v13 = vadd.f32 %v3636_v7, %v1031_v10 }
 0x3c4   :  { %v981_v16 = vpop.f32.mrf.mxu0 }
 0x3c5   :  { %v1043_v17 = vmax.f32 %v1039_v13, 0.0  ;;  %v1011_v20 = vadd.f32 %v1010_v12, %v981_v16 }
 0x3c6   :  { %v1145_v22 = vpop.f32.mrf.mxu2 }
 0x3c7   :  { %v1024_v23 = vadd.f32 %v3629_v1, %v1011_v20  ;;  %1209 = vmatmul.f32.vlgmr.msra.gmra.mxu0 %v1043_v17  ;;  %1327 = vmatpush.msra.mxu2 %v1145_v22 }
 0x3c9   :  { %1328 = vmatpush.msra.mxu2 %v1142_v5  ;;  %v1032_v27 = vmul.f32 %v3633_v4, %v1024_v23  ;;  %v1165_v5 = vpop.f32.mrf.mxu3 }
 0x3ca   :  { %2112 = vmatmul.msk.f32.vlgmr.msra.gmra.mxu2 %vm800_vm1, %v3586_v19 }
 0x3cb   :  { %v1040_v31 = vadd.f32 %v3636_v7, %v1032_v27  ;;  %1573 = vmatpush.msrb.mxu2 %v1571_v26 }
 0x3cc   :  { %v984_v33 = vpop.f32.mrf.mxu0 }
 0x3cd   :  { %v1014_v35 = vadd.f32 %v1013_v29, %v984_v33  ;;  %v1044_v36 = vmax.f32 %v1040_v31, 0.0  ;;  %1574 = vmatpush.msrb.mxu2 %v1569_v30 }
 0x3cf   :  { %v1025_v39 = vadd.f32 %v3629_v1, %v1014_v35  ;;  %1212 = vmatmul.f32.gmra.mxu0 %v1044_v36  ;;  %1575 = vmatpush.msrb.mxu2 %v1567_v34 }
 0x3d1   :  { %v1033_v42 = vmul.f32 %v3633_v4, %v1025_v39  ;;  %1576 = vmatpush.msrb.mxu2 %v1565_v38  ;;  %v1168_v14 = vpop.f32.mrf.mxu3 }
 0x3d2   :  { %2113 = vmatmul.msk.f32.gmra.mxu2 %vm800_vm1, %v3593_v25 }
 0x3d3   :  { %v1041_v45 = vadd.f32 %v3636_v7, %v1033_v42  ;;  %1577 = vmatpush.msrb.mxu2 %v1563_v41 }
 0x3d4   :  { %v987_v48 = vpop.f32.mrf.mxu0 }
 0x3d5   :  { %v1017_v50 = vadd.f32 %v1016_v47, %v987_v48  ;;  %v1045_v51 = vmax.f32 %v1041_v45, 0.0  ;;  %1578 = vmatpush.msrb.mxu2 %v1561_v44  ;;  %v1570_v44 = vld [vmem:[#allocation42 + $0xe8] sm:$0xff]  ;;  %v1568_v45 = vld [vmem:[#allocation42 + $0xd8] sm:$0xff] }
 0x3d6   :  { %v1562_v47 = vld [vmem:[#allocation42 + $0xa8] sm:$0xff]  ;;  %v1560_v48 = vld [vmem:[#allocation42 + $0x98] sm:$0xff] }
 0x3d7   :  { %v1026_v54 = vadd.f32 %v3629_v1, %v1017_v50  ;;  %1215 = vmatmul.f32.gmra.mxu0 %v1045_v51  ;;  %1579 = vmatpush.msrb.mxu2 %v1559_v49  ;;  %v1547_v1 = vld [vmem:[#allocation42 + $0x30] sm:$0xff]  ;;  %v1558_v49 = vld [vmem:[#allocation42 + $0x88] sm:$0xff]  ;;  %v1556_v50 = vld [vmem:[#allocation42 + $0x78] sm:$0xff] }
 0x3d8   :  { %v1552_v51 = vld [vmem:[#allocation42 + $0x58] sm:$0xff] }
 0x3d9   :  { %v1034_v56 = vmul.f32 %v3633_v4, %v1026_v54  ;;  %1580 = vmatpush.msrb.mxu2 %v1557_v53  ;;  %v1541_v4 = vld [vmem:[#allocation42] sm:$0xff]  ;;  %v1171_v27 = vpop.f32.mrf.mxu3  ;;  %v1548_v53 = vld [vmem:[#allocation42 + $0x38] sm:$0xff]  ;;  %v1546_v54 = vld [vmem:[#allocation42 + $0x28] sm:$0xff] }
 0x3db   :  { %v1042_v58 = vadd.f32 %v3636_v7, %v1034_v56  ;;  %1581 = vmatpush.msrb.mxu2 %v1555_v55  ;;  %v1414_v55 = vld [vmem:[#allocation36 + $0x78] sm:$0xff]  ;;  %v1413_v56 = vld [vmem:[#allocation36 + $0x70] sm:$0xff] }
 0x3dc   :  { %1415 = vmatpush.msrb.mxu0 %v1414_v55 }
 0x3dd   :  { %v1046_v59 = vmax.f32 %v1042_v58, 0.0  ;;  %1582 = vmatpush.msrb.mxu2 %v1553_v57  ;;  %v1412_v57 = vld [vmem:[#allocation36 + $0x68] sm:$0xff] }
 0x3de   :  { %1416 = vmatpush.msrb.mxu0 %v1413_v56  ;;  %v1542_v58 = vld [vmem:[#allocation42 + $0x8] sm:$0xff] }
 0x3df   :  { %1218 = vmatmul.f32.gmra.mxu0 %v1046_v59  ;;  %1583 = vmatpush.msrb.mxu2 %v1551_v61  ;;  %v1411_v59 = vld [vmem:[#allocation36 + $0x60] sm:$0xff]  ;;  %v1409_v61 = vld [vmem:[#allocation36 + $0x50] sm:$0xff] }
 0x3e0   :  { %1417 = vmatpush.msrb.mxu0 %v1412_v57 }
 0x3e1   :  { %1584 = vmatpush.msrb.mxu2 %v1549_v63  ;;  %v1174_v35 = vpop.f32.mrf.mxu3  ;;  %v1407_v63 = vld [vmem:[#allocation36 + $0x40] sm:$0xff] }
 0x3e2   :  { %1418 = vmatpush.msrb.mxu0 %v1411_v59 }
 0x3e3   :  { %1585 = vmatpush.msrb.mxu2 %v1547_v1  ;;  %v1405_v1 = vld [vmem:[#allocation36 + $0x30] sm:$0xff] }
 0x3e4   :  { %1419 = vmatpush.msrb.mxu0 %v1410_v60 }
 0x3e5   :  { %1586 = vmatpush.msrb.mxu2 %v1545_v2  ;;  %v1404_v2 = vld [vmem:[#allocation36 + $0x28] sm:$0xff] }
 0x3e6   :  { %1420 = vmatpush.msrb.mxu0 %v1409_v61 }
 0x3e7   :  { %1587 = vmatpush.msrb.mxu2 %v1543_v3  ;;  %v1403_v3 = vld [vmem:[#allocation36 + $0x20] sm:$0xff] }
 0x3e8   :  { %1421 = vmatpush.msrb.mxu0 %v1408_v62 }
 0x3e9   :  { %1588 = vmatpush.msrb.mxu2 %v1541_v4  ;;  %v1691_v4 = vld [vmem:[#allocation45 + $0x78] sm:$0xff] }
 0x3ea   :  { %1422 = vmatpush.msrb.mxu0 %v1407_v63  ;;  %1692 = vmatpush.msra.mxu1 %v1691_v4 }
 0x3ec   :  { %1423 = vmatpush.msrb.mxu0 %v1406_v0 }
 0x3ee   :  { %1424 = vmatpush.msrb.mxu0 %v1405_v1 }
 0x3f0   :  { %1425 = vmatpush.msrb.mxu0 %v1404_v2 }
 0x3f2   :  { %1426 = vmatpush.msrb.mxu0 %v1403_v3 }
 0x437   :  { %v1284_v7 = vpop.f32.mrf.mxu2 }
 0x438   :  { %v1359_v8 = vadd.f32 %v1284_v7, %v1165_v5  ;;  %v1402_v5 = vld [vmem:[#allocation36 + $0x18] sm:$0xff] }
 0x439   :  { %1427 = vmatpush.msrb.mxu0 %v1402_v5  ;;  %v1690_v7 = vld [vmem:[#allocation45 + $0x70] sm:$0xff] }
 0x43a   :  { %v1367_v10 = vadd.f32 %v2216_v6, %v1359_v8  ;;  %v1400_v8 = vld [vmem:[#allocation36 + $0x8] sm:$0xff]  ;;  %1693 = vmatpush.msra.mxu1 %v1690_v7 }
 0x43c   :  { %v1505_v12 = vmul.f32 %v2217_v9, %v1367_v10  ;;  %1460 = vmatmul.f32.vlgmr.msrb.gmra.mxu1 %v1367_v10  ;;  %v1399_v10 = vld [vmem:[#allocation36] sm:$0xff] }
 0x43e   :  { %v3653_v13 = vadd.f32 %v2218_v11, %v1505_v12  ;;  %v1688_v12 = vld [vmem:[#allocation45 + $0x60] sm:$0xff] }
 0x43f   :  { %v1287_v16 = vpop.f32.mrf.mxu2 }
 0x440   :  { %v1517_v17 = vmax.f32 %v3653_v13, 0.0  ;;  %v1360_v20 = vadd.f32 %v1287_v16, %v1168_v14  ;;  %v1645_v13 = vld [vmem:[#allocation43 + $0x70] sm:$0xff]  ;;  %v1687_v14 = vld [vmem:[#allocation45 + $0x58] sm:$0xff]  ;;  %v1644_v16 = vld [vmem:[#allocation43 + $0x68] sm:$0xff] }
 0x442   :  { %1589 = vmatmul.f32.vlgmr.msrb.gmra.mxu2 %v1517_v17  ;;  %v1368_v21 = vadd.f32 %v2216_v6, %v1360_v20  ;;  %v1643_v20 = vld [vmem:[#allocation43 + $0x60] sm:$0xff] }
 0x444   :  { %v1210_v22 = vpop.f32.mrf.mxu0  ;;  %1463 = vmatmul.f32.gmra.mxu1 %v1368_v21  ;;  %v1506_v23 = vmul.f32 %v2217_v9, %v1368_v21  ;;  %v1685_v21 = vld [vmem:[#allocation45 + $0x48] sm:$0xff] }
 0x446   :  { %v3658_v24 = vadd.f32 %v2218_v11, %v1506_v23  ;;  %v1684_v23 = vld [vmem:[#allocation45 + $0x40] sm:$0xff] }
 0x448   :  { %v1518_v26 = vmax.f32 %v3658_v24, 0.0  ;;  %v1641_v24 = vld [vmem:[#allocation43 + $0x50] sm:$0xff] }
 0x44a   :  { %1592 = vmatmul.f32.gmra.mxu2 %v1518_v26 }
 0x44c   :  { %v1213_v28 = vpop.f32.mrf.mxu0 }
 0x44d   :  { %1304 = vmatpush.msrb.mxu3 %v1213_v28  ;;  %v1330_v29 = vpop.f32.mrf.mxu2  ;;  %v1682_v28 = vld [vmem:[#allocation45 + $0x30] sm:$0xff] }
 0x44e   :  { %v1361_v30 = vadd.f32 %v1330_v29, %v1171_v27  ;;  %v1640_v27 = vld [vmem:[#allocation43 + $0x48] sm:$0xff]  ;;  %v1639_v29 = vld [vmem:[#allocation43 + $0x40] sm:$0xff] }
 0x44f   :  { %1305 = vmatpush.msrb.mxu3 %v1210_v22  ;;  %v1642_v22 = vld [vmem:[#allocation43 + $0x58] sm:$0xff] }
 0x450   :  { %2110 = vmatmul.msk.f32.vlgmr.msrb.gmra.mxu3 %vm800_vm1, %v3578_v15  ;;  %v1369_v31 = vadd.f32 %v2216_v6, %v1361_v30  ;;  %v1681_v30 = vld [vmem:[#allocation45 + $0x28] sm:$0xff] }
 0x452   :  { %1466 = vmatmul.f32.gmra.mxu1 %v1369_v31  ;;  %v1507_v32 = vmul.f32 %v2217_v9, %v1369_v31  ;;  %v1638_v31 = vld [vmem:[#allocation43 + $0x38] sm:$0xff] }
 0x454   :  { %v1216_v33 = vpop.f32.mrf.mxu0  ;;  %v3665_v34 = vadd.f32 %v2218_v11, %v1507_v32  ;;  %v1680_v32 = vld [vmem:[#allocation45 + $0x20] sm:$0xff] }
 0x455   :  { %v1333_v36 = vpop.f32.mrf.mxu2 }
 0x456   :  { %v1362_v37 = vadd.f32 %v1333_v36, %v1174_v35  ;;  %v1519_v38 = vmax.f32 %v3665_v34, 0.0  ;;  %v1679_v34 = vld [vmem:[#allocation45 + $0x18] sm:$0xff]  ;;  %v1636_v35 = vld [vmem:[#allocation43 + $0x28] sm:$0xff]  ;;  %v1678_v36 = vld [vmem:[#allocation45 + $0x10] sm:$0xff] }
 0x458   :  { %2111 = vmatmul.msk.f32.gmra.mxu3 %vm800_vm1, %v3583_v18  ;;  %1595 = vmatmul.f32.gmra.mxu2 %v1519_v38  ;;  %v1370_v39 = vadd.f32 %v2216_v6, %v1362_v37  ;;  %v1566_v18 = vld [vmem:[#allocation42 + $0xc8] sm:$0xff]  ;;  %v1635_v37 = vld [vmem:[#allocation43 + $0x20] sm:$0xff] }
 0x459   :  { %v1401_v6 = vld [vmem:[#allocation36 + $0x10] sm:$0xff] }
 0x45a   :  { %1469 = vmatmul.f32.gmra.mxu1 %v1370_v39  ;;  %v1508_v15 = vmul.f32 %v2217_v9, %v1370_v39  ;;  %1428 = vmatpush.msrb.mxu0 %v1401_v6  ;;  %v1689_v9 = vld [vmem:[#allocation45 + $0x68] sm:$0xff]  ;;  %v1634_v39 = vld [vmem:[#allocation43 + $0x18] sm:$0xff] }
 0x45b   :  { %1694 = vmatpush.msra.mxu1 %v1689_v9 }
 0x45c   :  { %v1219_v40 = vpop.f32.mrf.mxu0  ;;  %v1516_v41 = vadd.f32 %v2218_v11, %v1508_v15  ;;  %1429 = vmatpush.msrb.mxu0 %v1400_v8  ;;  %v1646_v11 = vld [vmem:[#allocation43 + $0x78] sm:$0xff]  ;;  %v1676_v15 = vld [vmem:[#allocation45] sm:$0xff] }
 0x45d   :  { %1350 = vmatpush.msra.mxu3 %v1219_v40  ;;  %1695 = vmatpush.msra.mxu1 %v1688_v12  ;;  %v1633_v40 = vld [vmem:[#allocation43 + $0x10] sm:$0xff] }
 0x45e   :  { %v1520_v42 = vmax.f32 %v1516_v41, 0.0  ;;  %1430 = vmatpush.msrb.mxu0 %v1399_v10  ;;  %v1632_v41 = vld [vmem:[#allocation43 + $0x8] sm:$0xff] }
 0x45f   :  { %1351 = vmatpush.msra.mxu3 %v1216_v33  ;;  %1696 = vmatpush.msra.mxu1 %v1687_v14  ;;  %v1637_v33 = vld [vmem:[#allocation43 + $0x30] sm:$0xff]  ;;  %v2223_v14 = vld [vmem:[#allocation37] ss:$0 sm:$0xff] }
 0x460   :  { %2114 = vmatmul.msk.f32.vlgmr.msra.gmra.mxu3 %vm800_vm1, %v3586_v19  ;;  %1598 = vmatmul.f32.gmra.mxu2 %v1520_v42  ;;  %v1554_v19 = vld [vmem:[#allocation42 + $0x68] sm:$0xff] }
 0x461   :  { %1602 = vmatpush.msrb.mxu3 %v1572_v43  ;;  %1647 = vmatpush.msra.mxu0 %v1646_v11 }
 0x463   :  { %1603 = vmatpush.msrb.mxu3 %v1570_v44  ;;  %1648 = vmatpush.msra.mxu0 %v1645_v13  ;;  %v1255_v44 = vpop.f32.mrf.mxu1 }
 0x465   :  { %1604 = vmatpush.msrb.mxu3 %v1568_v45  ;;  %1649 = vmatpush.msra.mxu0 %v1644_v16 }
 0x467   :  { %1605 = vmatpush.msrb.mxu3 %v1566_v18  ;;  %1650 = vmatpush.msra.mxu0 %v1643_v20  ;;  %v3683_v18 = vld [vmem:[%s3775_s15] sm:$0xff] }
 0x468   :  { %2115 = vmatmul.msk.f32.gmra.mxu3 %vm800_vm1, %v3593_v25  ;;  %v1544_v25 = vld [vmem:[#allocation42 + $0x18] sm:$0xff] }
 0x469   :  { %1606 = vmatpush.msrb.mxu3 %v1564_v46  ;;  %1651 = vmatpush.msra.mxu0 %v1642_v22  ;;  %v2219_v46 = vld [vmem:[#allocation27] ss:$0 sm:$0xff]  ;;  %v2224_v20 = vld [vmem:[#allocation39] ss:$0 sm:$0xff]  ;;  %v2225_v22 = vld [vmem:[#allocation40] ss:$0 sm:$0xff] }
 0x46b   :  { %1607 = vmatpush.msrb.mxu3 %v1562_v47  ;;  %1652 = vmatpush.msra.mxu0 %v1641_v24 }
 0x46d   :  { %1608 = vmatpush.msrb.mxu3 %v1560_v48  ;;  %1653 = vmatpush.msra.mxu0 %v1640_v27 }
 0x46f   :  { %1609 = vmatpush.msrb.mxu3 %v1558_v49  ;;  %1654 = vmatpush.msra.mxu0 %v1639_v29  ;;  %v2220_v49 = vld [vmem:[#allocation31] ss:$0 sm:$0xff] }
 0x471   :  { %1610 = vmatpush.msrb.mxu3 %v1556_v50  ;;  %1655 = vmatpush.msra.mxu0 %v1638_v31 }
 0x473   :  { %1611 = vmatpush.msrb.mxu3 %v1554_v19  ;;  %1656 = vmatpush.msra.mxu0 %v1637_v33  ;;  %v2221_v19 = vld [vmem:[#allocation33] ss:$0 sm:$0xff] }
 0x475   :  { %1612 = vmatpush.msrb.mxu3 %v1552_v51  ;;  %1657 = vmatpush.msra.mxu0 %v1636_v35  ;;  %v1258_v51 = vpop.f32.mrf.mxu1 }
 0x477   :  { %1613 = vmatpush.msrb.mxu3 %v1550_v52  ;;  %1658 = vmatpush.msra.mxu0 %v1635_v37 }
 0x479   :  { %1614 = vmatpush.msrb.mxu3 %v1548_v53  ;;  %1659 = vmatpush.msra.mxu0 %v1634_v39  ;;  %v3688_v53 = vld [vmem:[%s3775_s15 + $0x8] sm:$0xff] }
 0x47b   :  { %1615 = vmatpush.msrb.mxu3 %v1546_v54  ;;  %1660 = vmatpush.msra.mxu0 %v1633_v40 }
 0x47d   :  { %1616 = vmatpush.msrb.mxu3 %v1544_v25  ;;  %1661 = vmatpush.msra.mxu0 %v1632_v41  ;;  %v1261_v60 = vpop.f32.mrf.mxu1 }
 0x47f   :  { %1617 = vmatpush.msrb.mxu3 %v1542_v58 }
 0x480   :  { %1618 = vmatmul.f32.vlgmr.msrb.gmra.mxu3 %v1517_v17  ;;  %v1686_v17 = vld [vmem:[#allocation45 + $0x50] sm:$0xff] }
 0x481   :  { %1697 = vmatpush.msra.mxu1 %v1686_v17 }
 0x483   :  { %1698 = vmatpush.msra.mxu1 %v1685_v21 }
 0x485   :  { %1699 = vmatpush.msra.mxu1 %v1684_v23  ;;  %v1264_v5 = vpop.f32.mrf.mxu1 }
 0x488   :  { %1621 = vmatmul.f32.gmra.mxu3 %v1518_v26  ;;  %v1683_v26 = vld [vmem:[#allocation45 + $0x38] sm:$0xff] }
 0x489   :  { %1700 = vmatpush.msra.mxu1 %v1683_v26 }
 0x48b   :  { %1701 = vmatpush.msra.mxu1 %v1682_v28 }
 0x48d   :  { %1702 = vmatpush.msra.mxu1 %v1681_v30 }
 0x48f   :  { %1703 = vmatpush.msra.mxu1 %v1680_v32 }
 0x490   :  { %1624 = vmatmul.f32.gmra.mxu3 %v1519_v38  ;;  %v1677_v38 = vld [vmem:[#allocation45 + $0x8] sm:$0xff] }
 0x491   :  { %1704 = vmatpush.msra.mxu1 %v1679_v34 }
 0x493   :  { %1705 = vmatpush.msra.mxu1 %v1678_v36 }
 0x495   :  { %1706 = vmatpush.msra.mxu1 %v1677_v38 }
 0x497   :  { %1707 = vmatpush.msra.mxu1 %v1676_v15 }
 0x498   :  { %1627 = vmatmul.f32.gmra.mxu3 %v1520_v42  ;;  %v1631_v42 = vld [vmem:[#allocation43] sm:$0xff] }
 0x499   :  { %1662 = vmatpush.msra.mxu0 %v1631_v42 }
 0x4b9   :  { %v1461_v13 = vpop.f32.mrf.mxu1 }
 0x4c1   :  { %v1464_v24 = vpop.f32.mrf.mxu1 }
 0x4c5   :  { %v1590_v43 = vpop.f32.mrf.mxu2 }
 0x4cd   :  { %v1593_v45 = vpop.f32.mrf.mxu2 }
 0x4ce   :  { %1735 = vmatpush.msra.mxu2 %v1593_v45 }
 0x4cf   :  { %v1467_v32 = vpop.f32.mrf.mxu1 }
 0x4d0   :  { %1736 = vmatpush.msra.mxu2 %v1590_v43 }
 0x4d1   :  { %2116 = vmatmul.msk.f32.vlgmr.msra.gmra.mxu2 %vm800_vm1, %v3683_v18 }
 0x4d3   :  { %v1307_v47 = vpop.f32.mrf.mxu3 }
 0x4d4   :  { %v1371_v48 = vadd.f32 %v1307_v47, %v1255_v44  ;;  %v2246_v47 = vld [vmem:[%s3775_s15 + $0x10] sm:$0xff] }
 0x4d6   :  { %v1379_v50 = vadd.f32 %v2219_v46, %v1371_v48  ;;  %v2247_v48 = vld [vmem:[%s3775_s15 + $0x18] sm:$0xff] }
 0x4d7   :  { %v1470_v15 = vpop.f32.mrf.mxu1 }
 0x4d8   :  { %v1525_v52 = vmul.f32 %v2220_v49, %v1379_v50  ;;  %1431 = vmatmul.f32.vlgmr.msrb.gmra.mxu0 %v1379_v50 }
 0x4d9   :  { %2117 = vmatmul.msk.f32.gmra.mxu2 %vm800_vm1, %v3688_v53 }
 0x4da   :  { %v1533_v54 = vadd.f32 %v2221_v19, %v1525_v52  ;;  %v1850_v52 = vld [vmem:[#allocation49 + $0x68] sm:$0xff] }
 0x4db   :  { %v1310_v55 = vpop.f32.mrf.mxu3  ;;  %v1596_v56 = vpop.f32.mrf.mxu2 }
 0x4dc   :  { %v1537_v25 = vmax.f32 %v1533_v54, 0.0  ;;  %v1372_v57 = vadd.f32 %v1310_v55, %v1258_v51  ;;  %v1851_v51 = vld [vmem:[#allocation49 + $0x70] sm:$0xff]  ;;  %v1849_v55 = vld [vmem:[#allocation49 + $0x60] sm:$0xff] }
 0x4de   :  { %1708 = vmatmul.f32.vlgmr.msra.gmra.mxu1 %v1537_v25  ;;  %v1380_v58 = vadd.f32 %v2219_v46, %v1372_v57  ;;  %v1847_v25 = vld [vmem:[#allocation49 + $0x50] sm:$0xff]  ;;  %v1846_v57 = vld [vmem:[#allocation49 + $0x48] sm:$0xff] }
 0x4e0   :  { %1434 = vmatmul.f32.gmra.mxu0 %v1380_v58  ;;  %v1526_v59 = vmul.f32 %v2220_v49, %v1380_v58 }
 0x4e2   :  { %v1534_v61 = vadd.f32 %v2221_v19, %v1526_v59  ;;  %v1845_v59 = vld [vmem:[#allocation49 + $0x40] sm:$0xff] }
 0x4e3   :  { %v1353_v62 = vpop.f32.mrf.mxu3  ;;  %v1599_v63 = vpop.f32.mrf.mxu2 }
 0x4e4   :  { %v1373_v0 = vadd.f32 %v1353_v62, %v1261_v60  ;;  %1781 = vmatpush.msrb.mxu0 %v1599_v63  ;;  %v1538_v1 = vmax.f32 %v1534_v61, 0.0  ;;  %v1843_v60 = vld [vmem:[#allocation49 + $0x30] sm:$0xff]  ;;  %v1842_v61 = vld [vmem:[#allocation49 + $0x28] sm:$0xff]  ;;  %v1841_v63 = vld [vmem:[#allocation49 + $0x20] sm:$0xff] }
 0x4e6   :  { %1711 = vmatmul.f32.gmra.mxu1 %v1538_v1  ;;  %1782 = vmatpush.msrb.mxu0 %v1596_v56  ;;  %v1381_v2 = vadd.f32 %v2219_v46, %v1373_v0  ;;  %v1848_v56 = vld [vmem:[#allocation49 + $0x58] sm:$0xff]  ;;  %v1839_v1 = vld [vmem:[#allocation49 + $0x10] sm:$0xff] }
 0x4e7   :  { %v1840_v0 = vld [vmem:[#allocation49 + $0x18] sm:$0xff] }
 0x4e8   :  { %1437 = vmatmul.f32.gmra.mxu0 %v1381_v2  ;;  %v1527_v3 = vmul.f32 %v2220_v49, %v1381_v2  ;;  %v1868_v2 = vld [vmem:[#allocation51 + $0x78] sm:$0xff] }
 0x4e9   :  { %1869 = vmatpush.msrb.mxu2 %v1868_v2 }
 0x4ea   :  { %v1535_v4 = vadd.f32 %v2221_v19, %v1527_v3  ;;  %v1867_v3 = vld [vmem:[#allocation51 + $0x70] sm:$0xff] }
 0x4eb   :  { %v1356_v6 = vpop.f32.mrf.mxu3  ;;  %1870 = vmatpush.msrb.mxu2 %v1867_v3 }
 0x4ec   :  { %v1374_v7 = vadd.f32 %v1356_v6, %v1264_v5  ;;  %v1539_v8 = vmax.f32 %v1535_v4, 0.0  ;;  %v2222_v5 = vld [vmem:[#allocation46] ss:$0 sm:$0xff]  ;;  %v1838_v6 = vld [vmem:[#allocation49 + $0x8] sm:$0xff] }
 0x4ee   :  { %1714 = vmatmul.f32.gmra.mxu1 %v1539_v8  ;;  %v1382_v9 = vadd.f32 %v2219_v46, %v1374_v7  ;;  %v1866_v7 = vld [vmem:[#allocation51 + $0x68] sm:$0xff]  ;;  %v1837_v8 = vld [vmem:[#allocation49] sm:$0xff] }
 0x4ef   :  { %1871 = vmatpush.msrb.mxu2 %v1866_v7 }
 0x4f0   :  { %1440 = vmatmul.f32.gmra.mxu0 %v1382_v9  ;;  %v1528_v10 = vmul.f32 %v2220_v49, %v1382_v9  ;;  %v1865_v9 = vld [vmem:[#allocation51 + $0x60] sm:$0xff] }
 0x4f1   :  { %1872 = vmatpush.msrb.mxu2 %v1865_v9 }
 0x4f2   :  { %v1536_v11 = vadd.f32 %v2221_v19, %v1528_v10  ;;  %v1852_v19 = vld [vmem:[#allocation49 + $0x78] sm:$0xff] }
 0x4f4   :  { %v1540_v12 = vmax.f32 %v1536_v11, 0.0 }
 0x4f6   :  { %1717 = vmatmul.f32.gmra.mxu1 %v1540_v12  ;;  %v1864_v12 = vld [vmem:[#allocation51 + $0x58] sm:$0xff] }
 0x4f7   :  { %1873 = vmatpush.msrb.mxu2 %v1864_v12 }
 0x503   :  { %v1619_v62 = vpop.f32.mrf.mxu3 }
 0x50b   :  { %v1622_v10 = vpop.f32.mrf.mxu3 }
 0x555   :  { %v1432_v16 = vpop.f32.mrf.mxu0 }
 0x556   :  { %v1462_v17 = vadd.f32 %v1461_v13, %v1432_v16 }
 0x558   :  { %v1477_v21 = vadd.f32 %v2223_v14, %v1462_v17  ;;  %v1862_v17 = vld [vmem:[#allocation51 + $0x48] sm:$0xff] }
 0x55a   :  { %v1485_v23 = vmul.f32 %v2224_v20, %v1477_v21 }
 0x55c   :  { %v1493_v26 = vadd.f32 %v2225_v22, %v1485_v23  ;;  %v1860_v23 = vld [vmem:[#allocation51 + $0x38] sm:$0xff] }
 0x55d   :  { %v1435_v27 = vpop.f32.mrf.mxu0 }
 0x55e   :  { %v1497_v28 = vmax.f32 %v1493_v26, 0.0  ;;  %v1465_v29 = vadd.f32 %v1464_v24, %v1435_v27  ;;  %v1625_v24 = vpop.f32.mrf.mxu3  ;;  %v1859_v26 = vld [vmem:[#allocation51 + $0x30] sm:$0xff] }
 0x560   :  { %v1478_v30 = vadd.f32 %v2223_v14, %v1465_v29  ;;  %1663 = vmatmul.f32.vlgmr.msra.gmra.mxu0 %v1497_v28  ;;  %v1858_v28 = vld [vmem:[#allocation51 + $0x28] sm:$0xff]  ;;  %v1857_v29 = vld [vmem:[#allocation51 + $0x20] sm:$0xff] }
 0x562   :  { %v1486_v31 = vmul.f32 %v2224_v20, %v1478_v30 }
 0x564   :  { %v1494_v33 = vadd.f32 %v2225_v22, %v1486_v31  ;;  %v1856_v31 = vld [vmem:[#allocation51 + $0x18] sm:$0xff] }
 0x565   :  { %v1438_v34 = vpop.f32.mrf.mxu0 }
 0x566   :  { %v1468_v35 = vadd.f32 %v1467_v32, %v1438_v34  ;;  %v1498_v36 = vmax.f32 %v1494_v33, 0.0  ;;  %v1628_v33 = vpop.f32.mrf.mxu3 }
 0x568   :  { %v1479_v37 = vadd.f32 %v2223_v14, %v1468_v35  ;;  %1666 = vmatmul.f32.gmra.mxu0 %v1498_v36  ;;  %v1855_v36 = vld [vmem:[#allocation51 + $0x10] sm:$0xff] }
 0x56a   :  { %v1487_v38 = vmul.f32 %v2224_v20, %v1479_v37  ;;  %v1854_v37 = vld [vmem:[#allocation51 + $0x8] sm:$0xff] }
 0x56c   :  { %v1495_v39 = vadd.f32 %v2225_v22, %v1487_v38  ;;  %v1853_v38 = vld [vmem:[#allocation51] sm:$0xff] }
 0x56d   :  { %v1441_v40 = vpop.f32.mrf.mxu0 }
 0x56e   :  { %v1471_v41 = vadd.f32 %v1470_v15, %v1441_v40  ;;  %v1499_v42 = vmax.f32 %v1495_v39, 0.0  ;;  %v1709_v39 = vpop.f32.mrf.mxu1 }
 0x570   :  { %v1480_v43 = vadd.f32 %v2223_v14, %v1471_v41  ;;  %1669 = vmatmul.f32.gmra.mxu0 %v1499_v42  ;;  %v1863_v14 = vld [vmem:[#allocation51 + $0x50] sm:$0xff]  ;;  %v2226_v41 = vld [vmem:[#allocation48] ss:$0 sm:$0xff] }
 0x571   :  { %1874 = vmatpush.msrb.mxu2 %v1863_v14 }
 0x572   :  { %v1488_v44 = vmul.f32 %v2224_v20, %v1480_v43  ;;  %v1861_v20 = vld [vmem:[#allocation51 + $0x40] sm:$0xff] }
 0x573   :  { %1875 = vmatpush.msrb.mxu2 %v1862_v17 }
 0x574   :  { %v1496_v45 = vadd.f32 %v2225_v22, %v1488_v44 }
 0x575   :  { %1876 = vmatpush.msrb.mxu2 %v1861_v20 }
 0x576   :  { %v1500_v46 = vmax.f32 %v1496_v45, 0.0  ;;  %v1712_v15 = vpop.f32.mrf.mxu1 }
 0x577   :  { %1877 = vmatpush.msrb.mxu2 %v1860_v23 }
 0x578   :  { %1672 = vmatmul.f32.gmra.mxu0 %v1500_v46 }
 0x579   :  { %1878 = vmatpush.msrb.mxu2 %v1859_v26 }
 0x57b   :  { %1879 = vmatpush.msrb.mxu2 %v1858_v28 }
 0x57d   :  { %1880 = vmatpush.msrb.mxu2 %v1857_v29 }
 0x57e   :  { %v1715_v40 = vpop.f32.mrf.mxu1 }
 0x57f   :  { %1881 = vmatpush.msrb.mxu2 %v1856_v31 }
 0x580   :  { %2120 = vmatmul.msk.f32.vlgmr.msrb.gmra.mxu0 %vm800_vm1, %v2246_v47 }
 0x581   :  { %1882 = vmatpush.msrb.mxu2 %v1855_v36 }
 0x583   :  { %1883 = vmatpush.msrb.mxu2 %v1854_v37 }
 0x585   :  { %1884 = vmatpush.msrb.mxu2 %v1853_v38 }
 0x586   :  { %v1718_v44 = vpop.f32.mrf.mxu1 }
 0x588   :  { %2121 = vmatmul.msk.f32.gmra.mxu0 %vm800_vm1, %v2247_v48 }
 0x5dd   :  { %v1664_v49 = vpop.f32.mrf.mxu0 }
 0x5e5   :  { %v1667_v50 = vpop.f32.mrf.mxu0 }
 0x5e6   :  { %1758 = vmatpush.msra.mxu3 %v1667_v50 }
 0x5e8   :  { %1759 = vmatpush.msra.mxu3 %v1664_v49 }
 0x5e9   :  { %2118 = vmatmul.msk.f32.vlgmr.msra.gmra.mxu3 %vm800_vm1, %v3683_v18  ;;  %v1844_v18 = vld [vmem:[#allocation49 + $0x38] sm:$0xff] }
 0x5ea   :  { %1898 = vmatpush.msrb.mxu3 %v1852_v19 }
 0x5ec   :  { %1899 = vmatpush.msrb.mxu3 %v1851_v51 }
 0x5ed   :  { %v1670_v54 = vpop.f32.mrf.mxu0 }
 0x5ee   :  { %1900 = vmatpush.msrb.mxu3 %v1850_v52 }
 0x5f0   :  { %1901 = vmatpush.msrb.mxu3 %v1849_v55 }
 0x5f1   :  { %2119 = vmatmul.msk.f32.gmra.mxu3 %vm800_vm1, %v3688_v53  ;;  %v1738_v53 = vpop.f32.mrf.mxu2 }
 0x5f2   :  { %1902 = vmatpush.msrb.mxu3 %v1848_v56  ;;  %v1813_v4 = vadd.f32 %v1738_v53, %v1619_v62  ;;  %v2227_v56 = vld [vmem:[#allocation52] ss:$0 sm:$0xff] }
 0x5f4   :  { %1903 = vmatpush.msrb.mxu3 %v1847_v25  ;;  %v1821_v11 = vadd.f32 %v2222_v5, %v1813_v4 }
 0x5f5   :  { %v1673_v58 = vpop.f32.mrf.mxu0 }
 0x5f6   :  { %1904 = vmatpush.msrb.mxu3 %v1846_v57  ;;  %1804 = vmatpush.msrb.mxu1 %v1673_v58 }
 0x5f8   :  { %1905 = vmatpush.msrb.mxu3 %v1845_v59  ;;  %1805 = vmatpush.msrb.mxu1 %v1670_v54 }
 0x5f9   :  { %2122 = vmatmul.msk.f32.vlgmr.msrb.gmra.mxu1 %vm800_vm1, %v2246_v47  ;;  %v1741_v13 = vpop.f32.mrf.mxu2 }
 0x5fa   :  { %1906 = vmatpush.msrb.mxu3 %v1844_v18  ;;  %v1814_v16 = vadd.f32 %v1741_v13, %v1622_v10 }
 0x5fc   :  { %1907 = vmatpush.msrb.mxu3 %v1843_v60  ;;  %v1822_v22 = vadd.f32 %v2222_v5, %v1814_v16 }
 0x5fd   :  { %v1784_v21 = vpop.f32.mrf.mxu0 }
 0x5fe   :  { %1908 = vmatpush.msrb.mxu3 %v1842_v61  ;;  %v1815_v27 = vadd.f32 %v1784_v21, %v1625_v24 }
 0x600   :  { %1909 = vmatpush.msrb.mxu3 %v1841_v63  ;;  %v1823_v30 = vadd.f32 %v2222_v5, %v1815_v27 }
 0x601   :  { %2123 = vmatmul.msk.f32.gmra.mxu1 %vm800_vm1, %v2247_v48 }
 0x602   :  { %1910 = vmatpush.msrb.mxu3 %v1840_v0 }
 0x604   :  { %1911 = vmatpush.msrb.mxu3 %v1839_v1 }
 0x605   :  { %v1787_v32 = vpop.f32.mrf.mxu0 }
 0x606   :  { %1912 = vmatpush.msrb.mxu3 %v1838_v6  ;;  %v1816_v34 = vadd.f32 %v1787_v32, %v1628_v33 }
 0x608   :  { %1913 = vmatpush.msrb.mxu3 %v1837_v8  ;;  %v1824_v35 = vadd.f32 %v2222_v5, %v1816_v34 }
 0x609   :  { %1914 = vmatmul.f32.vlgmr.msrb.gmra.mxu3 %v1821_v11 }
 0x611   :  { %1917 = vmatmul.f32.gmra.mxu3 %v1822_v22 }
 0x619   :  { %1920 = vmatmul.f32.gmra.mxu3 %v1823_v30 }
 0x621   :  { %1923 = vmatmul.f32.gmra.mxu3 %v1824_v35 }
 0x66c   :  { %v1761_v42 = vpop.f32.mrf.mxu3 }
 0x66d   :  { %v1825_v43 = vadd.f32 %v1761_v42, %v1709_v39 }
 0x66f   :  { %v1833_v45 = vadd.f32 %v2226_v41, %v1825_v43 }
 0x671   :  { %1885 = vmatmul.f32.vlgmr.msrb.gmra.mxu2 %v1833_v45 }
 0x674   :  { %v1764_v46 = vpop.f32.mrf.mxu3 }
 0x675   :  { %v1826_v47 = vadd.f32 %v1764_v46, %v1712_v15 }
 0x676   :  { %v1807_v48 = vpop.f32.mrf.mxu1 }
 0x677   :  { %v1834_v49 = vadd.f32 %v2226_v41, %v1826_v47  ;;  %v1827_v50 = vadd.f32 %v1807_v48, %v1715_v40 }
 0x679   :  { %1888 = vmatmul.f32.gmra.mxu2 %v1834_v49  ;;  %v1835_v19 = vadd.f32 %v2226_v41, %v1827_v50 }
 0x67e   :  { %v1810_v51 = vpop.f32.mrf.mxu1 }
 0x67f   :  { %v1828_v52 = vadd.f32 %v1810_v51, %v1718_v44 }
 0x681   :  { %1891 = vmatmul.f32.gmra.mxu2 %v1835_v19  ;;  %v1836_v54 = vadd.f32 %v2226_v41, %v1828_v52 }
 0x689   :  { %1894 = vmatmul.f32.gmra.mxu2 %v1836_v54 }
 0x68c   :  { %v1915_v55 = vpop.f32.mrf.mxu3 }
 0x694   :  { %v1918_v59 = vpop.f32.mrf.mxu3 }
 0x69c   :  { %v1921_v0 = vpop.f32.mrf.mxu3 }
 0x6a4   :  { %v1924_v10 = vpop.f32.mrf.mxu3 }
 0x6f4   :  { %v1886_v25 = vpop.f32.mrf.mxu2 }
 0x6f5   :  { %v1916_v57 = vadd.f32 %v1915_v55, %v1886_v25 }
 0x6f7   :  { %v1931_v58 = vadd.f32 %v2227_v56, %v1916_v57 }
 0x6f9   :  { %1935 = vst [vmem:[%s3380_s17] sm:$0xff] %v1931_v58  ;;  %v2124_v18 = vmul.f32 -1.442695, %v1931_v58 }
 0x6fb   :  { %2228 = vpow2.f32 %v2124_v18 }
 0x6fc   :  { %v1889_v60 = vpop.f32.mrf.mxu2 }
 0x6fd   :  { %v1919_v61 = vadd.f32 %v1918_v59, %v1889_v60 }
 0x6ff   :  { %v1932_v62 = vadd.f32 %v2227_v56, %v1919_v61 }
 0x701   :  { %v2229_v63 = vpop.eup %2228  ;;  %1936 = vst [vmem:[%s3380_s17 + $0x8] sm:$0xff] %v1932_v62  ;;  %v2125_v53 = vmul.f32 -1.442695, %v1932_v62 }
 0x702   :  { %v1951_v1 = vadd.f32 1.0, %v2229_v63 }
 0x703   :  { %2230 = vpow2.f32 %v2125_v53 }
 0x704   :  { %2232 = vrcp.f32 %v1951_v1  ;;  %v1892_v2 = vpop.f32.mrf.mxu2  ;;  %v1966_v14 = vand.u32 2147483648, %v1951_v1  ;;  %v1964_v17 = vand.u32 2147483647, %v1951_v1  ;;  %vm1960_vm3 = vweird.f32 %v1951_v1 }
 0x705   :  { %v1922_v3 = vadd.f32 %v1921_v0, %v1892_v2 }
 0x706   :  { %v1967_v26 = vor.u32 1.1754944e-38, %v1966_v14  ;;  %vm1965_vm5 = vcmp.eq.f32.partialorder %v1964_v17, 8.507059e+37 }
 0x707   :  { %v1933_v4 = vadd.f32 %v2227_v56, %v1922_v3 }
 0x709   :  { %v2231_v5 = vpop.eup %2230  ;;  %1937 = vst [vmem:[%s3380_s17 + $0x10] sm:$0xff] %v1933_v4  ;;  %v2126_v6 = vmul.f32 -1.442695, %v1933_v4 }
 0x70a   :  { %v2233_v7 = vpop.eup %2232  ;;  %v1952_v8 = vadd.f32 1.0, %v2231_v5 }
 0x70b   :  { %v1956_v9 = vmul.f32 %v2233_v7, %v1951_v1  ;;  %2234 = vpow2.f32 %v2126_v6  ;;  %vm1961_vm2 = vweird.f32 %v2233_v7 }
 0x70c   :  { %2236 = vrcp.f32 %v1952_v8  ;;  %v1895_v11 = vpop.f32.mrf.mxu2  ;;  %vm1962_vm4 = vmor %vm1960_vm3, %vm1961_vm2  ;;  %v1981_v32 = vand.u32 2147483648, %v1952_v8  ;;  %v1979_v34 = vand.u32 2147483647, %v1952_v8  ;;  %vm1975_vm7 = vweird.f32 %v1952_v8 }
 0x70d   :  { %v1957_v12 = vsub.f32 1.0, %v1956_v9  ;;  %v1925_v13 = vadd.f32 %v1924_v10, %v1895_v11 }
 0x70e   :  { %v1982_v38 = vor.u32 1.1754944e-38, %v1981_v32  ;;  %vm1980_vm9 = vcmp.eq.f32.partialorder %v1979_v34, 8.507059e+37 }
 0x70f   :  { %v1958_v16 = vmul.f32 %v2233_v7, %v1957_v12  ;;  %v1934_v20 = vadd.f32 %v2227_v56, %v1925_v13 }
 0x711   :  { %v2235_v21 = vpop.eup %2234  ;;  %v1959_v22 = vadd.f32 %v2233_v7, %v1958_v16  ;;  %1938 = vst [vmem:[%s3380_s17 + $0x18] sm:$0xff] %v1934_v20  ;;  %v2127_v23 = vmul.f32 -1.442695, %v1934_v20 }
 0x712   :  { %v2237_v24 = vpop.eup %2236  ;;  %v1953_v27 = vadd.f32 1.0, %v2235_v21 }
 0x713   :  { %v1963_v28 = vsel %vm1962_vm4, %v2233_v7, %v1959_v22  ;;  %v1971_v29 = vmul.f32 %v2237_v24, %v1952_v8  ;;  %2238 = vpow2.f32 %v2127_v23  ;;  %vm1976_vm6 = vweird.f32 %v2237_v24 }
 0x714   :  { %v1968_v30 = vsel %vm1965_vm5, %v1967_v26, %v1963_v28  ;;  %2240 = vrcp.f32 %v1953_v27  ;;  %vm1977_vm8 = vmor %vm1975_vm7, %vm1976_vm6  ;;  %v1996_v43 = vand.u32 2147483648, %v1953_v27  ;;  %v1994_v45 = vand.u32 2147483647, %v1953_v27 }
 0x715   :  { %2015 = vst [vmem:[%s3375_s24] sm:$0xff] %v1968_v30  ;;  %v1972_v31 = vsub.f32 1.0, %v1971_v29  ;;  %vm1990_vm11 = vweird.f32 %v1953_v27 }
 0x716   :  { %v1997_v48 = vor.u32 1.1754944e-38, %v1996_v43  ;;  %vm1995_vm13 = vcmp.eq.f32.partialorder %v1994_v45, 8.507059e+37 }
 0x717   :  { %v1973_v33 = vmul.f32 %v2237_v24, %v1972_v31 }
 0x719   :  { %v2239_v35 = vpop.eup %2238  ;;  %v1974_v36 = vadd.f32 %v2237_v24, %v1973_v33 }
 0x71a   :  { %v2241_v37 = vpop.eup %2240  ;;  %v1954_v39 = vadd.f32 1.0, %v2239_v35 }
 0x71b   :  { %v1978_v15 = vsel %vm1977_vm8, %v2237_v24, %v1974_v36  ;;  %v1986_v40 = vmul.f32 %v2241_v37, %v1953_v27  ;;  %vm1991_vm10 = vweird.f32 %v2241_v37 }
 0x71c   :  { %v1983_v41 = vsel %vm1980_vm9, %v1982_v38, %v1978_v15  ;;  %2242 = vrcp.f32 %v1954_v39  ;;  %vm1992_vm12 = vmor %vm1990_vm11, %vm1991_vm10  ;;  %v2011_v52 = vand.u32 2147483648, %v1954_v39  ;;  %v2009_v55 = vand.u32 2147483647, %v1954_v39 }
 0x71d   :  { %2016 = vst [vmem:[%s3375_s24 + $0x8] sm:$0xff] %v1983_v41  ;;  %v1987_v42 = vsub.f32 1.0, %v1986_v40  ;;  %vm2005_vm15 = vweird.f32 %v1954_v39 }
 0x71e   :  { %v2012_v25 = vor.u32 1.1754944e-38, %v2011_v52  ;;  %vm2010_vm1 = vcmp.eq.f32.partialorder %v2009_v55, 8.507059e+37 }
 0x71f   :  { %v1988_v44 = vmul.f32 %v2241_v37, %v1987_v42 }
 0x721   :  { %v1989_v46 = vadd.f32 %v2241_v37, %v1988_v44 }
 0x722   :  { %v2243_v47 = vpop.eup %2242 }
 0x723   :  { %v1993_v49 = vsel %vm1992_vm12, %v2241_v37, %v1989_v46  ;;  %v2001_v50 = vmul.f32 %v2243_v47, %v1954_v39  ;;  %vm2006_vm14 = vweird.f32 %v2243_v47 }
 0x724   :  { %v1998_v19 = vsel %vm1995_vm13, %v1997_v48, %v1993_v49  ;;  %vm2007_vm0 = vmor %vm2005_vm15, %vm2006_vm14 }
 0x725   :  { %2017 = vst [vmem:[%s3375_s24 + $0x10] sm:$0xff] %v1998_v19  ;;  %v2002_v51 = vsub.f32 1.0, %v2001_v50 }
 0x727   :  { %v2003_v54 = vmul.f32 %v2243_v47, %v2002_v51 }
 0x729   :  { %v2004_v56 = vadd.f32 %v2243_v47, %v2003_v54 }
 0x72b   :  { %v2008_v57 = vsel %vm2007_vm0, %v2243_v47, %v2004_v56 }
 0x72c   :  { %v2013_v58 = vsel %vm2010_vm1, %v2012_v25, %v2008_v57 }
 0x72d   :  { %2018 = vst [vmem:[%s3375_s24 + $0x18] sm:$0xff] %v2013_v58 }
 0x72e   :  { %2027 = vsyncpa [#allocation3], 1 }
 0x72f   :  { %2028 = vsyncpa [#allocation5], 1 }
 0x730   :  { %2029 = vsyncpa [#allocation8], 1 }
 0x731   :  { %2030 = vsyncpa [#allocation11], 1 }
 0x732   :  { %2031 = vsyncpa [#allocation14], 1 }
 0x733   :  { %2032 = vsyncpa [#allocation17], 1 }
 0x734   :  { %2033 = vsyncpa [#allocation20], 1 }
 0x735   :  { %2034 = vsyncpa [#allocation23], 1 }
 0x736   :  { %2035 = vsyncpa [#allocation26], 1 }
 0x737   :  { %2036 = vsyncpa [#allocation29], 1 }
 0x738   :  { %2037 = vsyncpa [#allocation32], 1 }
 0x739   :  { %2038 = vsyncpa [#allocation35], 1 }
 0x73a   :  { %2039 = vsyncpa [#allocation38], 1 }
 0x73b   :  { %2040 = vsyncpa [#allocation41], 1 }
 0x73c   :  { %2041 = vsyncpa [#allocation44], 1 }
 0x73d   :  { %2042 = vsyncpa [#allocation47], 1 }
 0x73e   :  { %2043 = vsyncpa [#allocation50], 1 }
 0x73f   :  { %2044 = vsyncpa [#allocation53], 1 }

</bundles_post_ra>
